<compile_context>
chip_gen: v6e
topology: v6e:2x2x1
jax: 0.10.0
libtpu: 0.0.40
codegen_flags: <defaults>
</compile_context>

<pallas_src>
import functools

import numpy as np

import jax
import jax.numpy as jnp
from jax.experimental import pallas as pl
from jax.experimental.pallas import tpu as pltpu


# ----------------------------------------------------------------------------
# Pallas kernel: `blocks_per_step` block-diagonal 128-blocks per grid step,
# both GCN layers + mean-pool fused, all propagation as full-width MXU dots.
# ----------------------------------------------------------------------------
def graphlet_encoder_kernel(adj_ref, x_ref, w1_ref, b1_ref, w2_ref, b2_ref,
                            pool_ref, out_ref):
    bps = adj_ref.shape[0]          # block-diagonal 128-blocks per grid step
    gpb = pool_ref.shape[1]         # graphlets per block (8)
    f_in = x_ref.shape[-1]          # raw input feature dim (8, unpadded)

    w1 = w1_ref[...]                # [f_in, h]  f32 (tiny, used on the VPU)
    b1 = b1_ref[...]                # [1, h]     f32
    w2 = w2_ref[...]                # [h, h]     bf16
    b2 = b2_ref[...]                # [1, h]     f32

    # Static unroll over the few blocks handled this step (each is MXU-native 128x128).
    for blk in range(bps):
        adj = adj_ref[blk]                                    # [128, 128] bf16 block-diag A_hat
        x = x_ref[blk].astype(jnp.float32)                    # [128, f_in] f32

        # ---- X @ W1 on the VPU: K = f_in is tiny, so 8 broadcast-multiply-adds ----
        xw1 = x[:, 0:1] * w1[0:1, :]                          # [128, h] f32
        for k in range(1, f_in):
            xw1 = xw1 + x[:, k:k + 1] * w1[k:k + 1, :]

        # ---- GCNConv 1: ReLU(A_hat @ (X W1) + b1) ----------------------------------
        h1 = jnp.dot(adj, xw1.astype(jnp.bfloat16),
                     preferred_element_type=jnp.float32)       # [128, h] f32 acc
        h1 = jnp.maximum(h1 + b1, 0.0)

        # ---- Dropout: module evaluated in inference mode -> identity ---------------

        # ---- GCNConv 2: ReLU(A_hat @ (H1 W2) + b2) ----------------------------------
        hw2 = jnp.dot(h1.astype(jnp.bfloat16), w2,
                      preferred_element_type=jnp.float32)
        h2 = jnp.dot(adj, hw2.astype(jnp.bfloat16),
                     preferred_element_type=jnp.float32)
        h2 = jnp.maximum(h2 + b2, 0.0)                         # [128, h] f32

        # ---- global_mean_pool as a matmul: P [gpb, 128] @ H2 [128, h] ---------------
        out_ref[blk * gpb:(blk + 1) * gpb, :] = jnp.dot(
            pool_ref[blk], h2, preferred_element_type=jnp.float32)


def graphlet_encoder(adj_blk, x_blk, w1, b1, w2, b2, pool_blk, *, blocks_per_step=2):
    """adj_blk [NB, 128, 128] bf16 (block-diag A_hat, 8 graphlets/block),
       x_blk   [NB, 128, F_in] bf16 (F_in unpadded),
       w1 [F_in, Hp] f32, b1 [1, Hp] f32, w2 [Hp, Hp] bf16, b2 [1, Hp] f32,
       pool_blk [NB, 8, 128] f32  ->  [NB*8, Hp] f32 graphlet embeddings."""
    nb, blk_n, _ = adj_blk.shape
    gpb = pool_blk.shape[1]
    f_in = x_blk.shape[-1]
    h_pad = w1.shape[-1]
    bps = blocks_per_step
    assert nb % bps == 0, "number of 128-blocks must be a multiple of blocks_per_step"

    grid_spec = pltpu.PrefetchScalarGridSpec(
        num_scalar_prefetch=0,
        grid=(nb // bps,),
        in_specs=[
            pl.BlockSpec((bps, blk_n, blk_n), lambda s: (s, 0, 0)),   # block-diag A_hat
            pl.BlockSpec((bps, blk_n, f_in), lambda s: (s, 0, 0)),    # X (unpadded feature axis)
            pl.BlockSpec((f_in, h_pad), lambda s: (0, 0)),            # W1 (resident)
            pl.BlockSpec((1, h_pad), lambda s: (0, 0)),               # b1
            pl.BlockSpec((h_pad, h_pad), lambda s: (0, 0)),           # W2 (resident)
            pl.BlockSpec((1, h_pad), lambda s: (0, 0)),               # b2
            pl.BlockSpec((bps, gpb, blk_n), lambda s: (s, 0, 0)),     # pooling matrices
        ],
        out_specs=pl.BlockSpec((bps * gpb, h_pad), lambda s: (s, 0)), # lane-dense f32 tile
    )

    return pl.pallas_call(
        graphlet_encoder_kernel,
        out_shape=jax.ShapeDtypeStruct((nb * gpb, h_pad), jnp.float32),
        grid_spec=grid_spec,
        compiler_params=pltpu.CompilerParams(
            # Independent graphlet blocks: megacore-shardable on v7x (grid length kept even),
            # plain pipelined loop on v5e/v6e.
            dimension_semantics=("parallel",),
            # Explicit scoped-VMEM budget; safe on all gens (v5e default is only 16 MiB).
            vmem_limit_bytes=32 * 1024 * 1024,
        ),
    )(adj_blk, x_blk, w1, b1, w2, b2, pool_blk)


# ----------------------------------------------------------------------------
# Glue: build block-diagonal GCN-normalized adjacency blocks, features, and
# per-block mean-pool matrices (8 graphlets x 16 node slots per 128-block).
# ----------------------------------------------------------------------------
def build_graphlet_blocks(feat_key, num_graphlets, n_slots, in_dim, graphlets_per_block):
    """Each graphlet is a small ring graph with 4..n_slots real nodes; padded node slots get
    zero adjacency rows/cols and zero pool weight, so they never contribute."""
    gpb = graphlets_per_block
    assert num_graphlets % gpb == 0
    nb = num_graphlets // gpb
    blk_n = gpb * n_slots

    adj = np.zeros((nb, blk_n, blk_n), np.float32)
    pool = np.zeros((nb, gpb, blk_n), np.float32)
    for g in range(num_graphlets):
        b, gl = divmod(g, gpb)
        off = gl * n_slots
        n_g = 4 + (g % (n_slots - 3))                    # 4 .. n_slots real nodes
        a = np.zeros((n_slots, n_slots), np.float32)
        for i in range(n_g):                             # undirected ring
            j = (i + 1) % n_g
            a[i, j] = 1.0
            a[j, i] = 1.0
        a[:n_g, :n_g] += np.eye(n_g, dtype=np.float32)   # self loops (GCNConv default)
        deg = a.sum(axis=1)
        d_inv_sqrt = np.where(deg > 0.0, 1.0 / np.sqrt(deg), 0.0).astype(np.float32)
        adj[b, off:off + n_slots, off:off + n_slots] = d_inv_sqrt[:, None] * a * d_inv_sqrt[None, :]
        pool[b, gl, off:off + n_g] = 1.0 / n_g            # global_mean_pool weights

    x = jax.random.normal(feat_key, (nb, blk_n, in_dim), jnp.float32)
    valid = jnp.asarray((pool.sum(axis=1) > 0.0).astype(np.float32))   # [nb, blk_n]
    x = x * valid[:, :, None]                             # zero padded node slots
    return jnp.asarray(adj), x, jnp.asarray(pool)


def pad_to(a, shape):
    return jnp.pad(a, [(0, t - s) for s, t in zip(a.shape, shape)])


# ----------------------------------------------------------------------------
# Pure-JAX reference mirroring the kernel's bf16 operands + f32 accumulation
# (also validates the zero-padding of the hidden axis and the padded node slots).
# ----------------------------------------------------------------------------
def reference_forward(adj_blk_bf, x_blk_bf, w1, b1, w2_bf, b2, pool_blk):
    x = x_blk_bf.astype(jnp.float32)
    xw1 = jnp.einsum('bnf,fh->bnh', x, w1).astype(jnp.bfloat16)
    h1 = jnp.maximum(jnp.einsum('bnm,bmh->bnh', adj_blk_bf, xw1,
                                preferred_element_type=jnp.float32) + b1[None], 0.0)
    hw2 = jnp.einsum('bnh,hk->bnk', h1.astype(jnp.bfloat16), w2_bf,
                     preferred_element_type=jnp.float32).astype(jnp.bfloat16)
    h2 = jnp.maximum(jnp.einsum('bnm,bmh->bnh', adj_blk_bf, hw2,
                                preferred_element_type=jnp.float32) + b2[None], 0.0)
    out = jnp.einsum('bgn,bnh->bgh', pool_blk, h2)        # per-block mean pool
    return out.reshape(-1, out.shape[-1])                 # [G, Hp]


if __name__ == "__main__":
    # G = 32 graphlets, each with up to N = 16 node slots, in_dim = 8, hidden = 32.
    G, N, IN_DIM, HIDDEN = 32, 16, 8, 32
    GPB = 8          # graphlets per block-diagonal 128-block (8 * 16 = 128, MXU-native)
    BPS = 2          # 128-blocks per grid step -> 16 graphlets/step, grid=(2,) (even for v7x)
    H_PAD = 128      # lane-dense hidden axis

    key = jax.random.PRNGKey(0)
    k_x, k_w1, k_b1, k_w2, k_b2 = jax.random.split(key, 5)

    adj, x, pool = build_graphlet_blocks(k_x, G, N, IN_DIM, GPB)

    def glorot(k, shape):
        limit = jnp.sqrt(6.0 / (shape[0] + shape[1]))
        return jax.random.uniform(k, shape, jnp.float32, -limit, limit)

    w1 = glorot(k_w1, (IN_DIM, HIDDEN))
    b1 = jax.random.uniform(k_b1, (1, HIDDEN), jnp.float32, -0.1, 0.1)
    w2 = glorot(k_w2, (HIDDEN, HIDDEN))
    b2 = jax.random.uniform(k_b2, (1, HIDDEN), jnp.float32, -0.1, 0.1)

    # Streaming operands in bf16 (f32 accumulation on the MXU inside the kernel);
    # W1 stays f32 (it feeds the tiny VPU X@W1), biases and pool matrices stay f32.
    adj_bf = adj.astype(jnp.bfloat16)           # [NB, 128, 128]
    x_bf = x.astype(jnp.bfloat16)               # [NB, 128, 8]  -- feature axis NOT padded
    w2_bf = w2.astype(jnp.bfloat16)

    # Lane-dense zero padding of the hidden axis only (padded columns stay exactly
    # zero through both layers, so semantics are unchanged).
    w1_p = pad_to(w1, (IN_DIM, H_PAD))
    b1_p = pad_to(b1, (1, H_PAD))
    w2_p = pad_to(w2_bf, (H_PAD, H_PAD))
    b2_p = pad_to(b2, (1, H_PAD))

    run = jax.jit(functools.partial(graphlet_encoder, blocks_per_step=BPS))
    out = jax.block_until_ready(run(adj_bf, x_bf, w1_p, b1_p, w2_p, b2_p, pool))

    ref = reference_forward(adj_bf, x_bf, w1_p, b1_p, w2_p, b2_p, pool)

    assert out.shape == (G, H_PAD)
    assert jnp.allclose(out[:, :HIDDEN], ref[:, :HIDDEN], atol=1e-2, rtol=1e-2)
    assert jnp.allclose(out[:, HIDDEN:], 0.0, atol=1e-6)   # padded hidden lanes stay zero

    print("KERNEL_OK")
</pallas_src>

<mosaic_0001>
module attributes {stable_mosaic.version = 11 : i64} {
  func.func @graphlet_encoder_kernel(%arg0: i32, %arg1: memref<2x128x128xbf16, #tpu.memory_space<vmem>>, %arg2: memref<2x128x8xbf16, #tpu.memory_space<vmem>>, %arg3: memref<8x128xf32, #tpu.memory_space<vmem>>, %arg4: memref<1x128xf32, #tpu.memory_space<vmem>>, %arg5: memref<128x128xbf16, #tpu.memory_space<vmem>>, %arg6: memref<1x128xf32, #tpu.memory_space<vmem>>, %arg7: memref<2x8x128xf32, #tpu.memory_space<vmem>>, %arg8: memref<16x128xf32, #tpu.memory_space<vmem>>) attributes {dimension_semantics = [#tpu.dimension_semantics<parallel>], iteration_bounds = array<i64: 2>, scalar_prefetch = 0 : i64, scratch_operands = 0 : i64, tpu.core_type = #tpu.core_type<tc>, window_params = [{transform_indices = @transform_0, window_bounds = array<i64: 2, 128, 128>}, {transform_indices = @transform_1, window_bounds = array<i64: 2, 128, 8>}, {pipeline_mode = #tpu.pipeline_mode<synchronous>, transform_indices = @transform_2, window_bounds = array<i64: 8, 128>}, {pipeline_mode = #tpu.pipeline_mode<synchronous>, transform_indices = @transform_3, window_bounds = array<i64: 1, 128>}, {pipeline_mode = #tpu.pipeline_mode<synchronous>, transform_indices = @transform_4, window_bounds = array<i64: 128, 128>}, {pipeline_mode = #tpu.pipeline_mode<synchronous>, transform_indices = @transform_5, window_bounds = array<i64: 1, 128>}, {transform_indices = @transform_6, window_bounds = array<i64: 2, 8, 128>}, {transform_indices = @transform_7, window_bounds = array<i64: 16, 128>}]} {
    %c0 = arith.constant 0 : index
    %c0_0 = arith.constant 0 : index
    %0 = vector.load %arg3[%c0, %c0_0] : memref<8x128xf32, #tpu.memory_space<vmem>>, vector<8x128xf32>
    %c0_1 = arith.constant 0 : index
    %c0_2 = arith.constant 0 : index
    %1 = vector.load %arg4[%c0_1, %c0_2] : memref<1x128xf32, #tpu.memory_space<vmem>>, vector<1x128xf32>
    %c0_3 = arith.constant 0 : index
    %c0_4 = arith.constant 0 : index
    %2 = vector.load %arg5[%c0_3, %c0_4] : memref<128x128xbf16, #tpu.memory_space<vmem>>, vector<128x128xbf16>
    %c0_5 = arith.constant 0 : index
    %c0_6 = arith.constant 0 : index
    %3 = vector.load %arg6[%c0_5, %c0_6] : memref<1x128xf32, #tpu.memory_space<vmem>>, vector<1x128xf32>
    %c0_7 = arith.constant 0 : index
    %c0_8 = arith.constant 0 : index
    %c0_9 = arith.constant 0 : index
    %4 = vector.load %arg1[%c0_7, %c0_8, %c0_9] : memref<2x128x128xbf16, #tpu.memory_space<vmem>>, vector<1x128x128xbf16>
    %5 = vector.shape_cast %4 : vector<1x128x128xbf16> to vector<128x128xbf16>
    %c0_10 = arith.constant 0 : index
    %c0_11 = arith.constant 0 : index
    %c0_12 = arith.constant 0 : index
    %6 = vector.load %arg2[%c0_10, %c0_11, %c0_12] : memref<2x128x8xbf16, #tpu.memory_space<vmem>>, vector<1x128x8xbf16>
    %7 = vector.shape_cast %6 : vector<1x128x8xbf16> to vector<128x8xbf16>
    %8 = arith.extf %7 : vector<128x8xbf16> to vector<128x8xf32>
    %9 = vector.extract_strided_slice %8 {offsets = [0, 0], sizes = [128, 1], strides = [1, 1]} : vector<128x8xf32> to vector<128x1xf32>
    %10 = vector.extract_strided_slice %0 {offsets = [0, 0], sizes = [1, 128], strides = [1, 1]} : vector<8x128xf32> to vector<1x128xf32>
    %11 = vector.broadcast %9 : vector<128x1xf32> to vector<128x128xf32>
    %12 = vector.broadcast %10 : vector<1x128xf32> to vector<128x128xf32>
    %13 = arith.mulf %11, %12 : vector<128x128xf32>
    %14 = vector.extract_strided_slice %8 {offsets = [0, 1], sizes = [128, 1], strides = [1, 1]} : vector<128x8xf32> to vector<128x1xf32>
    %15 = vector.extract_strided_slice %0 {offsets = [1, 0], sizes = [1, 128], strides = [1, 1]} : vector<8x128xf32> to vector<1x128xf32>
    %16 = vector.broadcast %14 : vector<128x1xf32> to vector<128x128xf32>
    %17 = vector.broadcast %15 : vector<1x128xf32> to vector<128x128xf32>
    %18 = arith.mulf %16, %17 : vector<128x128xf32>
    %19 = arith.addf %13, %18 : vector<128x128xf32>
    %20 = vector.extract_strided_slice %8 {offsets = [0, 2], sizes = [128, 1], strides = [1, 1]} : vector<128x8xf32> to vector<128x1xf32>
    %21 = vector.extract_strided_slice %0 {offsets = [2, 0], sizes = [1, 128], strides = [1, 1]} : vector<8x128xf32> to vector<1x128xf32>
    %22 = vector.broadcast %20 : vector<128x1xf32> to vector<128x128xf32>
    %23 = vector.broadcast %21 : vector<1x128xf32> to vector<128x128xf32>
    %24 = arith.mulf %22, %23 : vector<128x128xf32>
    %25 = arith.addf %19, %24 : vector<128x128xf32>
    %26 = vector.extract_strided_slice %8 {offsets = [0, 3], sizes = [128, 1], strides = [1, 1]} : vector<128x8xf32> to vector<128x1xf32>
    %27 = vector.extract_strided_slice %0 {offsets = [3, 0], sizes = [1, 128], strides = [1, 1]} : vector<8x128xf32> to vector<1x128xf32>
    %28 = vector.broadcast %26 : vector<128x1xf32> to vector<128x128xf32>
    %29 = vector.broadcast %27 : vector<1x128xf32> to vector<128x128xf32>
    %30 = arith.mulf %28, %29 : vector<128x128xf32>
    %31 = arith.addf %25, %30 : vector<128x128xf32>
    %32 = vector.extract_strided_slice %8 {offsets = [0, 4], sizes = [128, 1], strides = [1, 1]} : vector<128x8xf32> to vector<128x1xf32>
    %33 = vector.extract_strided_slice %0 {offsets = [4, 0], sizes = [1, 128], strides = [1, 1]} : vector<8x128xf32> to vector<1x128xf32>
    %34 = vector.broadcast %32 : vector<128x1xf32> to vector<128x128xf32>
    %35 = vector.broadcast %33 : vector<1x128xf32> to vector<128x128xf32>
    %36 = arith.mulf %34, %35 : vector<128x128xf32>
    %37 = arith.addf %31, %36 : vector<128x128xf32>
    %38 = vector.extract_strided_slice %8 {offsets = [0, 5], sizes = [128, 1], strides = [1, 1]} : vector<128x8xf32> to vector<128x1xf32>
    %39 = vector.extract_strided_slice %0 {offsets = [5, 0], sizes = [1, 128], strides = [1, 1]} : vector<8x128xf32> to vector<1x128xf32>
    %40 = vector.broadcast %38 : vector<128x1xf32> to vector<128x128xf32>
    %41 = vector.broadcast %39 : vector<1x128xf32> to vector<128x128xf32>
    %42 = arith.mulf %40, %41 : vector<128x128xf32>
    %43 = arith.addf %37, %42 : vector<128x128xf32>
    %44 = vector.extract_strided_slice %8 {offsets = [0, 6], sizes = [128, 1], strides = [1, 1]} : vector<128x8xf32> to vector<128x1xf32>
    %45 = vector.extract_strided_slice %0 {offsets = [6, 0], sizes = [1, 128], strides = [1, 1]} : vector<8x128xf32> to vector<1x128xf32>
    %46 = vector.broadcast %44 : vector<128x1xf32> to vector<128x128xf32>
    %47 = vector.broadcast %45 : vector<1x128xf32> to vector<128x128xf32>
    %48 = arith.mulf %46, %47 : vector<128x128xf32>
    %49 = arith.addf %43, %48 : vector<128x128xf32>
    %50 = vector.extract_strided_slice %8 {offsets = [0, 7], sizes = [128, 1], strides = [1, 1]} : vector<128x8xf32> to vector<128x1xf32>
    %51 = vector.extract_strided_slice %0 {offsets = [7, 0], sizes = [1, 128], strides = [1, 1]} : vector<8x128xf32> to vector<1x128xf32>
    %52 = vector.broadcast %50 : vector<128x1xf32> to vector<128x128xf32>
    %53 = vector.broadcast %51 : vector<1x128xf32> to vector<128x128xf32>
    %54 = arith.mulf %52, %53 : vector<128x128xf32>
    %55 = arith.addf %49, %54 : vector<128x128xf32>
    %56 = arith.truncf %55 : vector<128x128xf32> to vector<128x128xbf16>
    %cst = arith.constant dense<0.000000e+00> : vector<128x128xf32>
    %57 = tpu.matmul %5, %56, %cst {dimension_numbers = #tpu.dot_dimension_numbers<[1], [0], [0], [1], [0, 0, 1, 1], [], []>} : vector<128x128xbf16>, vector<128x128xbf16>, vector<128x128xf32> -> vector<128x128xf32>
    %58 = vector.broadcast %1 : vector<1x128xf32> to vector<128x128xf32>
    %59 = arith.addf %57, %58 : vector<128x128xf32>
    %cst_13 = arith.constant 0.000000e+00 : f32
    %60 = vector.broadcast %cst_13 : f32 to vector<128x128xf32>
    %61 = arith.maximumf %59, %60 : vector<128x128xf32>
    %62 = arith.truncf %61 : vector<128x128xf32> to vector<128x128xbf16>
    %cst_14 = arith.constant dense<0.000000e+00> : vector<128x128xf32>
    %63 = tpu.matmul %62, %2, %cst_14 {dimension_numbers = #tpu.dot_dimension_numbers<[1], [0], [0], [1], [0, 0, 1, 1], [], []>} : vector<128x128xbf16>, vector<128x128xbf16>, vector<128x128xf32> -> vector<128x128xf32>
    %64 = arith.truncf %63 : vector<128x128xf32> to vector<128x128xbf16>
    %cst_15 = arith.constant dense<0.000000e+00> : vector<128x128xf32>
    %65 = tpu.matmul %5, %64, %cst_15 {dimension_numbers = #tpu.dot_dimension_numbers<[1], [0], [0], [1], [0, 0, 1, 1], [], []>} : vector<128x128xbf16>, vector<128x128xbf16>, vector<128x128xf32> -> vector<128x128xf32>
    %66 = vector.broadcast %3 : vector<1x128xf32> to vector<128x128xf32>
    %67 = arith.addf %65, %66 : vector<128x128xf32>
    %cst_16 = arith.constant 0.000000e+00 : f32
    %68 = vector.broadcast %cst_16 : f32 to vector<128x128xf32>
    %69 = arith.maximumf %67, %68 : vector<128x128xf32>
    %c0_17 = arith.constant 0 : index
    %c0_18 = arith.constant 0 : index
    %c0_19 = arith.constant 0 : index
    %70 = vector.load %arg7[%c0_17, %c0_18, %c0_19] : memref<2x8x128xf32, #tpu.memory_space<vmem>>, vector<1x8x128xf32>
    %71 = vector.shape_cast %70 : vector<1x8x128xf32> to vector<8x128xf32>
    %cst_20 = arith.constant dense<0.000000e+00> : vector<8x128xf32>
    %72 = tpu.matmul %71, %69, %cst_20 {dimension_numbers = #tpu.dot_dimension_numbers<[1], [0], [0], [1], [0, 0, 1, 1], [], []>} : vector<8x128xf32>, vector<128x128xf32>, vector<8x128xf32> -> vector<8x128xf32>
    %c0_21 = arith.constant 0 : index
    %c0_22 = arith.constant 0 : index
    %73 = vector.load %arg8[%c0_21, %c0_22] : memref<16x128xf32, #tpu.memory_space<vmem>>, vector<8x128xf32>
    tpu.vector_store %arg8[%c0_21, %c0_22], %72 {strides = array<i32>} : memref<16x128xf32, #tpu.memory_space<vmem>>, vector<8x128xf32>,
    %c1 = arith.constant 1 : index
    %c0_23 = arith.constant 0 : index
    %c0_24 = arith.constant 0 : index
    %74 = vector.load %arg1[%c1, %c0_23, %c0_24] : memref<2x128x128xbf16, #tpu.memory_space<vmem>>, vector<1x128x128xbf16>
    %75 = vector.shape_cast %74 : vector<1x128x128xbf16> to vector<128x128xbf16>
    %c1_25 = arith.constant 1 : index
    %c0_26 = arith.constant 0 : index
    %c0_27 = arith.constant 0 : index
    %76 = vector.load %arg2[%c1_25, %c0_26, %c0_27] : memref<2x128x8xbf16, #tpu.memory_space<vmem>>, vector<1x128x8xbf16>
    %77 = vector.shape_cast %76 : vector<1x128x8xbf16> to vector<128x8xbf16>
    %78 = arith.extf %77 : vector<128x8xbf16> to vector<128x8xf32>
    %79 = vector.extract_strided_slice %78 {offsets = [0, 0], sizes = [128, 1], strides = [1, 1]} : vector<128x8xf32> to vector<128x1xf32>
    %80 = vector.extract_strided_slice %0 {offsets = [0, 0], sizes = [1, 128], strides = [1, 1]} : vector<8x128xf32> to vector<1x128xf32>
    %81 = vector.broadcast %79 : vector<128x1xf32> to vector<128x128xf32>
    %82 = vector.broadcast %80 : vector<1x128xf32> to vector<128x128xf32>
    %83 = arith.mulf %81, %82 : vector<128x128xf32>
    %84 = vector.extract_strided_slice %78 {offsets = [0, 1], sizes = [128, 1], strides = [1, 1]} : vector<128x8xf32> to vector<128x1xf32>
    %85 = vector.extract_strided_slice %0 {offsets = [1, 0], sizes = [1, 128], strides = [1, 1]} : vector<8x128xf32> to vector<1x128xf32>
    %86 = vector.broadcast %84 : vector<128x1xf32> to vector<128x128xf32>
    %87 = vector.broadcast %85 : vector<1x128xf32> to vector<128x128xf32>
    %88 = arith.mulf %86, %87 : vector<128x128xf32>
    %89 = arith.addf %83, %88 : vector<128x128xf32>
    %90 = vector.extract_strided_slice %78 {offsets = [0, 2], sizes = [128, 1], strides = [1, 1]} : vector<128x8xf32> to vector<128x1xf32>
    %91 = vector.extract_strided_slice %0 {offsets = [2, 0], sizes = [1, 128], strides = [1, 1]} : vector<8x128xf32> to vector<1x128xf32>
    %92 = vector.broadcast %90 : vector<128x1xf32> to vector<128x128xf32>
    %93 = vector.broadcast %91 : vector<1x128xf32> to vector<128x128xf32>
    %94 = arith.mulf %92, %93 : vector<128x128xf32>
    %95 = arith.addf %89, %94 : vector<128x128xf32>
    %96 = vector.extract_strided_slice %78 {offsets = [0, 3], sizes = [128, 1], strides = [1, 1]} : vector<128x8xf32> to vector<128x1xf32>
    %97 = vector.extract_strided_slice %0 {offsets = [3, 0], sizes = [1, 128], strides = [1, 1]} : vector<8x128xf32> to vector<1x128xf32>
    %98 = vector.broadcast %96 : vector<128x1xf32> to vector<128x128xf32>
    %99 = vector.broadcast %97 : vector<1x128xf32> to vector<128x128xf32>
    %100 = arith.mulf %98, %99 : vector<128x128xf32>
    %101 = arith.addf %95, %100 : vector<128x128xf32>
    %102 = vector.extract_strided_slice %78 {offsets = [0, 4], sizes = [128, 1], strides = [1, 1]} : vector<128x8xf32> to vector<128x1xf32>
    %103 = vector.extract_strided_slice %0 {offsets = [4, 0], sizes = [1, 128], strides = [1, 1]} : vector<8x128xf32> to vector<1x128xf32>
    %104 = vector.broadcast %102 : vector<128x1xf32> to vector<128x128xf32>
    %105 = vector.broadcast %103 : vector<1x128xf32> to vector<128x128xf32>
    %106 = arith.mulf %104, %105 : vector<128x128xf32>
    %107 = arith.addf %101, %106 : vector<128x128xf32>
    %108 = vector.extract_strided_slice %78 {offsets = [0, 5], sizes = [128, 1], strides = [1, 1]} : vector<128x8xf32> to vector<128x1xf32>
    %109 = vector.extract_strided_slice %0 {offsets = [5, 0], sizes = [1, 128], strides = [1, 1]} : vector<8x128xf32> to vector<1x128xf32>
    %110 = vector.broadcast %108 : vector<128x1xf32> to vector<128x128xf32>
    %111 = vector.broadcast %109 : vector<1x128xf32> to vector<128x128xf32>
    %112 = arith.mulf %110, %111 : vector<128x128xf32>
    %113 = arith.addf %107, %112 : vector<128x128xf32>
    %114 = vector.extract_strided_slice %78 {offsets = [0, 6], sizes = [128, 1], strides = [1, 1]} : vector<128x8xf32> to vector<128x1xf32>
    %115 = vector.extract_strided_slice %0 {offsets = [6, 0], sizes = [1, 128], strides = [1, 1]} : vector<8x128xf32> to vector<1x128xf32>
    %116 = vector.broadcast %114 : vector<128x1xf32> to vector<128x128xf32>
    %117 = vector.broadcast %115 : vector<1x128xf32> to vector<128x128xf32>
    %118 = arith.mulf %116, %117 : vector<128x128xf32>
    %119 = arith.addf %113, %118 : vector<128x128xf32>
    %120 = vector.extract_strided_slice %78 {offsets = [0, 7], sizes = [128, 1], strides = [1, 1]} : vector<128x8xf32> to vector<128x1xf32>
    %121 = vector.extract_strided_slice %0 {offsets = [7, 0], sizes = [1, 128], strides = [1, 1]} : vector<8x128xf32> to vector<1x128xf32>
    %122 = vector.broadcast %120 : vector<128x1xf32> to vector<128x128xf32>
    %123 = vector.broadcast %121 : vector<1x128xf32> to vector<128x128xf32>
    %124 = arith.mulf %122, %123 : vector<128x128xf32>
    %125 = arith.addf %119, %124 : vector<128x128xf32>
    %126 = arith.truncf %125 : vector<128x128xf32> to vector<128x128xbf16>
    %cst_28 = arith.constant dense<0.000000e+00> : vector<128x128xf32>
    %127 = tpu.matmul %75, %126, %cst_28 {dimension_numbers = #tpu.dot_dimension_numbers<[1], [0], [0], [1], [0, 0, 1, 1], [], []>} : vector<128x128xbf16>, vector<128x128xbf16>, vector<128x128xf32> -> vector<128x128xf32>
    %128 = vector.broadcast %1 : vector<1x128xf32> to vector<128x128xf32>
    %129 = arith.addf %127, %128 : vector<128x128xf32>
    %cst_29 = arith.constant 0.000000e+00 : f32
    %130 = vector.broadcast %cst_29 : f32 to vector<128x128xf32>
    %131 = arith.maximumf %129, %130 : vector<128x128xf32>
    %132 = arith.truncf %131 : vector<128x128xf32> to vector<128x128xbf16>
    %cst_30 = arith.constant dense<0.000000e+00> : vector<128x128xf32>
    %133 = tpu.matmul %132, %2, %cst_30 {dimension_numbers = #tpu.dot_dimension_numbers<[1], [0], [0], [1], [0, 0, 1, 1], [], []>} : vector<128x128xbf16>, vector<128x128xbf16>, vector<128x128xf32> -> vector<128x128xf32>
    %134 = arith.truncf %133 : vector<128x128xf32> to vector<128x128xbf16>
    %cst_31 = arith.constant dense<0.000000e+00> : vector<128x128xf32>
    %135 = tpu.matmul %75, %134, %cst_31 {dimension_numbers = #tpu.dot_dimension_numbers<[1], [0], [0], [1], [0, 0, 1, 1], [], []>} : vector<128x128xbf16>, vector<128x128xbf16>, vector<128x128xf32> -> vector<128x128xf32>
    %136 = vector.broadcast %3 : vector<1x128xf32> to vector<128x128xf32>
    %137 = arith.addf %135, %136 : vector<128x128xf32>
    %cst_32 = arith.constant 0.000000e+00 : f32
    %138 = vector.broadcast %cst_32 : f32 to vector<128x128xf32>
    %139 = arith.maximumf %137, %138 : vector<128x128xf32>
    %c1_33 = arith.constant 1 : index
    %c0_34 = arith.constant 0 : index
    %c0_35 = arith.constant 0 : index
    %140 = vector.load %arg7[%c1_33, %c0_34, %c0_35] : memref<2x8x128xf32, #tpu.memory_space<vmem>>, vector<1x8x128xf32>
    %141 = vector.shape_cast %140 : vector<1x8x128xf32> to vector<8x128xf32>
    %cst_36 = arith.constant dense<0.000000e+00> : vector<8x128xf32>
    %142 = tpu.matmul %141, %139, %cst_36 {dimension_numbers = #tpu.dot_dimension_numbers<[1], [0], [0], [1], [0, 0, 1, 1], [], []>} : vector<8x128xf32>, vector<128x128xf32>, vector<8x128xf32> -> vector<8x128xf32>
    %c8 = arith.constant 8 : index
    %c0_37 = arith.constant 0 : index
    %143 = vector.load %arg8[%c8, %c0_37] : memref<16x128xf32, #tpu.memory_space<vmem>>, vector<8x128xf32>
    tpu.vector_store %arg8[%c8, %c0_37], %142 {strides = array<i32>} : memref<16x128xf32, #tpu.memory_space<vmem>>, vector<8x128xf32>,
    return
  }
  func.func @transform_0(%arg0: i32) -> (i32, i32, i32) {
    %c0_i32 = arith.constant 0 : i32
    %c0_i32_0 = arith.constant 0 : i32
    %c0_i32_1 = arith.constant 0 : i32
    return %arg0, %c0_i32, %c0_i32_0 : i32, i32, i32
  }
  func.func @transform_1(%arg0: i32) -> (i32, i32, i32) {
    %c0_i32 = arith.constant 0 : i32
    %c0_i32_0 = arith.constant 0 : i32
    %c0_i32_1 = arith.constant 0 : i32
    return %arg0, %c0_i32, %c0_i32_0 : i32, i32, i32
  }
  func.func @transform_2(%arg0: i32) -> (i32, i32) {
    %c0_i32 = arith.constant 0 : i32
    %c0_i32_0 = arith.constant 0 : i32
    %c0_i32_1 = arith.constant 0 : i32
    return %c0_i32, %c0_i32_0 : i32, i32
  }
  func.func @transform_3(%arg0: i32) -> (i32, i32) {
    %c0_i32 = arith.constant 0 : i32
    %c0_i32_0 = arith.constant 0 : i32
    %c0_i32_1 = arith.constant 0 : i32
    return %c0_i32, %c0_i32_0 : i32, i32
  }
  func.func @transform_4(%arg0: i32) -> (i32, i32) {
    %c0_i32 = arith.constant 0 : i32
    %c0_i32_0 = arith.constant 0 : i32
    %c0_i32_1 = arith.constant 0 : i32
    return %c0_i32, %c0_i32_0 : i32, i32
  }
  func.func @transform_5(%arg0: i32) -> (i32, i32) {
    %c0_i32 = arith.constant 0 : i32
    %c0_i32_0 = arith.constant 0 : i32
    %c0_i32_1 = arith.constant 0 : i32
    return %c0_i32, %c0_i32_0 : i32, i32
  }
  func.func @transform_6(%arg0: i32) -> (i32, i32, i32) {
    %c0_i32 = arith.constant 0 : i32
    %c0_i32_0 = arith.constant 0 : i32
    %c0_i32_1 = arith.constant 0 : i32
    return %arg0, %c0_i32, %c0_i32_0 : i32, i32, i32
  }
  func.func @transform_7(%arg0: i32) -> (i32, i32) {
    %c0_i32 = arith.constant 0 : i32
    %c0_i32_0 = arith.constant 0 : i32
    return %arg0, %c0_i32 : i32, i32
  }
}

</mosaic_0001>

<bundles_post_ra>
// kernel: graphlet_encoder.1
= control target key start
LH: loop header
LB: loop body
LE: loop exit
PB: predicated region body
PF: predicated region fallthrough
CT: control target
= control target key end

     0   :  { %s6158_s0 = inlined_call_operand.vmem [shape: bf16[4,128,128], index: 0, kind: input, shape index: {}]   ;;  %s6159_s1 = inlined_call_operand.vmem [shape: bf16[4,128,8], index: 1, kind: input, shape index: {}]   ;;  %s6160_s2 = inlined_call_operand.vmem [shape: f32[8,128], index: 2, kind: input, shape index: {}]   ;;  %s6161_s3 = inlined_call_operand.vmem [shape: f32[1,128], index: 3, kind: input, shape index: {}]   ;;  %s6162_s4 = inlined_call_operand.hbm [shape: bf16[128,128], index: 4, kind: input, shape index: {}]   ;;  %s6163_s5 = inlined_call_operand.vmem [shape: f32[1,128], index: 5, kind: input, shape index: {}]   ;;  %s6164_s6 = inlined_call_operand.hbm [shape: f32[4,8,128], index: 6, kind: input, shape index: {}]   ;;  %s6165_s7 = inlined_call_operand.hbm [shape: f32[32,128], index: 7, kind: output, shape index: {}]  }
   0x1   :  { %6173 = sst [smem:[#allocation16_spill]] %s6162_s4 }
   0x2   :  { %12 = vsyncpa [#allocation3], 0 }
   0x3   :  { %13 = vsyncpa [#allocation6], 0 }
   0x4   :  { %15 = vsyncpa [#allocation6 + $0x1], 0 }
   0x5   :  { %16 = vsyncpa [#allocation4], 0 }
   0x6   :  { %18 = vsyncpa [#allocation4 + $0x1], 0  ;;  %s4763_s24 = smov 0   ;;  %s4765_s25 = smov 0  }
   0x7   :  { %s4767_s26 = smov 0   ;;  %s4769_s27 = smov 0  }
   0x8 LB: > { %s4784_s28 = sadd.s32 4294967295, %s4702_s27   ;;  %s3168_s29 = sadd.s32 4294967294, %s4702_s27   ;;  %s4702_s27 = sphi %s4769_s27, %s6207_s27   ;;  %s4698_s26 = sphi %s4767_s26, %s6206_s26   ;;  %s4694_s25 = sphi %s4765_s25, %s6205_s25   ;;  %s4690_s24 = sphi %s4763_s24, %s6204_s24  }
   0x9   : > { %p180_p0 = scmp.ne.s32.totalorder %s4694_s25, %s4690_s24  ;;  %p6166_p1 = scmp.eq.s32.totalorder %s4784_s28, 0 }
   0xa   : > { %p210_p3 = scmp.eq.s32.totalorder %s3168_s29, 1  ;;  %p3169_p5 = scmp.ge.s32.totalorder %s4702_s27, 1 }
   0xb   : > { %p4793_p4 = por %p6166_p1, %p180_p0  ;;  %p217_p7 = scmp.lt.s32.totalorder %s4702_s27, 3 }
   0xc   : > { %p4798_p6 = por %p210_p3, %p180_p0  ;;  %s4704_s10 = smov [#allocation2]  }
   0xd   : > { %s6174_s30 = scalar_select %p4793_p4, 1, 0 }
   0xe   : > { %s6175_s8 = scalar_select %p4798_p6, 1, 0 }
   0xf   : > { %p4803_p8 = pnand %p3169_p5, %p217_p7  ;;  %s235_s11 = sshll.u32 %s4704_s10, 4  ;;  %s236_s11 = int_to_ptr.vmem [resolvable:$true] %s235_s11 }
  0x10   : > { %s4817_s13 = sadd.s32 1, %s4702_s27   ;;  %s167_s14 = sadd.s32 1, %s4698_s26 }
  0x11   : > { %s6176_s9 = scalar_select %p4803_p8, 1, 0 }
  0x12   : > { %p3732_p9 = pneg %p4803_p8  ;;  %s164_s15 = ssub.s32 %s4702_s27, %s4817_s13 }
  0x13   : > { %s4591_s16 = scalar_lea.vmem %s236_s11, 1024  ;;  %p4599_p5 = scmp.lt.s32.totalorder %s236_s11, %s236_s11 }
  0x14   : > { %p4812_p11 = pnand %p3732_p9, %p6166_p1  ;;  %p4592_p13 = scmp.ne.s32.totalorder %s236_s11, %s4591_s16 }
  0x15   : > { %p4600_p7 = scmp.lt.s32.totalorder %s4591_s16, %s4591_s16 }
  0x16   : > { %p4582_p12 = pneg %p4812_p11 }
  0x17   : > { %p4601_p10 = por %p4600_p7, %p4599_p5 }
  0x18   : > { %p4594_p0 = pnand %p4592_p13, %p4582_p12 }
  0x1a   : > { %p4595_p3 = pneg %p4594_p0 }
  0x1c   : > { %p4602_p2 = pnand %p4601_p10, %p4595_p3 }
  0x1e   : > { %4605 = shalt.err (!%p4602_p2)
}
  0x1f   : > { %s4705_s17 = smov 64   ;;  %s4706_s18 = smov 4  }
  0x20   : > { %s6178_s4 = sld [smem:[#allocation16_spill]]  ;;  %p165_p9 = scmp.eq.s32.totalorder %s164_s15, 0 }
  0x21   : > { %p174_p12 = scmp.ne.s32.totalorder %s4698_s26, %s4694_s25  ;;  %p175_p10 = scmp.eq.s32.totalorder %s4702_s27, 0 }
  0x22   : > { %p3745_p2 = scmp.lt.s32.totalorder %s4702_s27, 2  ;;  %p6179_p0 = scmp.eq.s32.totalorder %s4784_s28, 1 }
  0x23   : > { %s4834_s21 = scalar_select %p165_p9, %s4698_s26, %s167_s14  }
  0x24   : > { %p176_p13 = por %p175_p10, %p174_p12  ;;  %p4838_p3 = por %p6179_p0, %p174_p12 }
  0x25   : > { %s272_s23 = sand.u32 1, %s4698_s26   ;;  %s3249_s29 = sshll.u32 %s4702_s27, 8 }
  0x26   : > { %3735 = dma.hbm_to_vmem [thread:$0]  (!%p4812_p11), %s6178_s4, 1024, %s236_s11, [#allocation3], %s4705_s17, %s4705_s17, %s4706_s18  }
  0x27   : > { %s6180_s22 = scalar_select %p4838_p3, 1, 0 }
  0x28   : > { %s3172_s10 = sshll.u32 %s272_s23, 4  ;;  %s4847_s19 = scalar_lea.hbm %s6164_s6, %s3249_s29 }
  0x29   : > { %s276_s11 = scalar_lea.vmem [#allocation5], %s3172_s10  ;;  %p4849_p11 = pnand %p3745_p2, %p176_p13 }
  0x2a   : > { %s283_s14 = sshll.u32 %s276_s11, 4  ;;  %s4855_s17 = scalar_lea.sflag [#allocation6], %s272_s23  ;;  %s4853_s14 = int_to_ptr.vmem [resolvable:$true] %s283_s14 }
  0x2b   : > { %s4606_s18 = scalar_lea.hbm %s4847_s19, 256  ;;  %p4608_p7 = pneg %p4849_p11 }
  0x2c   : > { %p4607_p5 = scmp.ne.s32.totalorder %s4847_s19, %s4606_s18  ;;  %s4611_s10 = scalar_lea.hbm %s6164_s6, 512 }
  0x2d   : > { %p4612_p10 = scmp.lt.s32.totalorder %s4847_s19, %s6164_s6  ;;  %p4613_p2 = scmp.lt.s32.totalorder %s4611_s10, %s4606_s18 }
  0x2e   : > { %p4609_p9 = pnand %p4608_p7, %p4607_p5 }
  0x2f   : > { %p4614_p13 = por %p4613_p2, %p4612_p10 }
  0x30   : > { %p4610_p12 = pneg %p4609_p9 }
  0x32   : > { %p4615_p0 = pnand %p4614_p13, %p4610_p12 }
  0x34   : > { %4618 = shalt.err (!%p4615_p0)
}
  0x35   : > { %s4619_s23 = scalar_lea.vmem %s4853_s14, 256  ;;  %s4707_s11 = smov [#allocation5]  }
  0x36   : > { %p4620_p1 = scmp.ne.s32.totalorder %s4853_s14, %s4619_s23  ;;  %s4624_s4 = sshll.u32 %s4707_s11, 4  ;;  %s4625_s4 = int_to_ptr.vmem [resolvable:$false] %s4624_s4 }
  0x37   : > { %s4626_s20 = scalar_lea.vmem %s4625_s4, 512  ;;  %p4627_p9 = scmp.lt.s32.totalorder %s4853_s14, %s4625_s4 }
  0x38   : > { %p4622_p6 = pnand %p4620_p1, %p4608_p7  ;;  %p4628_p3 = scmp.lt.s32.totalorder %s4626_s20, %s4619_s23 }
  0x3a   : > { %p4623_p5 = pneg %p4622_p6  ;;  %p4629_p4 = por %p4628_p3, %p4627_p9 }
  0x3c   : > { %p4630_p8 = pnand %p4629_p4, %p4623_p5 }
  0x3e   : > { %4633 = shalt.err (!%p4630_p8)
}
  0x3f   : > { %s4708_s18 = smov 128   ;;  %s4709_s29 = smov 8  }
  0x40   : > { %3739 = dma.hbm_to_vmem [thread:$0]  (!%p4849_p11), %s4847_s19, 256, %s4853_s14, %s4855_s17, %s4708_s18, %s4708_s18, %s4709_s29  }
  0x41   : > { %p6182_p1 = scmp.ne.s32.totalorder %s6176_s9, 0 }
  0x43   : > { %295 = sbr.rel (%p6182_p1) target bundleno = 1898 (0x76a), region = 48 }
  0x48   : > { %p6183_p6 = scmp.eq.s32.totalorder %s4784_s28, 0 }
  0x4a   : > { %4677 = dma.done.wait (%p6183_p6), [#allocation3], 1024   ;;  %p6184_p7 = pmov %p6183_p6 }
  0x4b   : > { %s4883_s4 = sand.u32 1, %s4694_s25   ;;  %p6185_p4 = scmp.ne.s32.totalorder %s6174_s30, 0 }
  0x4c   : > { %4679 = vsyncadd (%p6184_p7), [#allocation3], 4294966272  ;;  %s3177_s10 = sshll.u32 %s4883_s4, 4  ;;  %s302_s12 = scalar_lea.sflag [#allocation6], %s4883_s4 }
  0x4d   : > { %s4889_s19 = scalar_lea.vmem [#allocation5], %s3177_s10 }
  0x4e   : > { %4681 = dma.done.wait (%p6185_p4), %s302_s12, 256  }
  0x4f   : > { %4683 = vsyncadd (%p6185_p4), %s302_s12, 4294967040  ;;  %s3179_s9 = sshll.u32 %s4784_s28, 1  ;;  %v4710_v0 = vmov 5   ;;  %v4711_v1 = vmov 2   ;;  %v4712_v16 = vmov 0   ;;  %v4713_v20 = vmov 1  }
  0x50   : > { %3839 = vset.pattern.permute.xlu0 %v4710_v0  ;;  %3797 = vset.pattern.permute.xlu1 %v4711_v1  ;;  %p349_p8 = scmp.lt.s32.totalorder %s3179_s9, 3  ;;  %v4714_v28 = vmov 7   ;;  %v4715_v29 = vmov 4   ;;  %v4716_v30 = vmov 6   ;;  %v4717_v31 = vmov 3   ;;  %s3252_s30 = sshll.u32 %s4784_s28, 8 }
  0x51   : > { %v512_v59 = vlaneseq  ;;  %vm4719_vm0 = vmmov 0   ;;  %s6114_s20 = scalar_lea.hbm %s6165_s7, %s3252_s30  ;;  %p6201_p11 = scmp.ne.s32.totalorder %s6180_s22, 0 }
  0x52   : > { %s6209_s9 = smov (!%p349_p8, %s3179_s9), 3  ;;  %s4720_s28 = smov [#allocation7]  }
  0x53   : > { %s3250_s14 = sshll.u32 %s6209_s9, 6  ;;  %v513_v60 = vshrl.u32 %v512_v59, 7  ;;  %s4638_s29 = sshll.u32 %s4720_s28, 4  ;;  %s4639_s29 = int_to_ptr.vmem [resolvable:$false] %s4638_s29 }
  0x54   : > { %s4901_s16 = scalar_lea.vmem %s6159_s1, %s3250_s14  ;;  %s4909_s11 = scalar_lea.vmem %s6158_s0, %s3250_s14 }
  0x55   : > { %v3323_v2 = vld [vmem:[%s4901_s16 + $0x38] sm:$0xff]   ;;  %v3321_v3 = vld [vmem:[%s4901_s16 + $0x28] sm:$0xff]   ;;  %v3322_v4 = vld [vmem:[%s4901_s16 + $0x30] sm:$0xff]   ;;  %v598_v63 = vsub.s32 1, %v513_v60  ;;  %s4640_s12 = scalar_lea.vmem %s4639_s29, 512 }
  0x56   : > { %v3283_v5 = vunpack.c.l.bf16 %v3323_v2  ;;  %v3284_v6 = vunpack.c.h.bf16 %v3323_v2  ;;  %v3275_v7 = vunpack.c.l.bf16 %v3321_v3  ;;  %v3276_v8 = vunpack.c.h.bf16 %v3321_v3  ;;  %v3318_v13 = vld [vmem:[%s4901_s16 + $0x10] sm:$0xff]   ;;  %v3320_v15 = vld [vmem:[%s4901_s16 + $0x20] sm:$0xff]   ;;  %v3319_v19 = vld [vmem:[%s4901_s16 + $0x18] sm:$0xff]  }
  0x57   : > { %v3279_v9 = vunpack.c.l.bf16 %v3322_v4  ;;  %v3280_v10 = vunpack.c.h.bf16 %v3322_v4  ;;  %v3263_v17 = vunpack.c.l.bf16 %v3318_v13  ;;  %v3264_v18 = vunpack.c.h.bf16 %v3318_v13  ;;  %v3317_v32 = vld [vmem:[%s4901_s16 + $0x8] sm:$0xff]   ;;  %v3254_v36 = vld [vmem:[%s4901_s16] sm:$0xff]  }
  0x58   : > { %v4911_v11 = vpack.i.bf16 %v3284_v6, %v3283_v5  ;;  %v4915_v12 = vpack.i.bf16 %v3276_v8, %v3275_v7  ;;  %v3271_v21 = vunpack.c.l.bf16 %v3320_v15  ;;  %v3272_v22 = vunpack.c.h.bf16 %v3320_v15  ;;  %v365_v5 = vld [vmem:[%s6160_s2] sm:$0xff] }
  0x59   : > { %v4918_v14 = vpack.i.bf16 %v3280_v10, %v3279_v9  ;;  %v4928_v23 = vpack.i.bf16 %v3264_v18, %v3263_v17  ;;  %v3267_v24 = vunpack.c.l.bf16 %v3319_v19  ;;  %v3268_v25 = vunpack.c.h.bf16 %v3319_v19 }
  0x5a   : > { %3841 = vperm.xlu0 %3839, %v4911_v11   ;;  %3799 = vperm.xlu1 %3797, %v4911_v11   ;;  %v4931_v26 = vpack.i.bf16 %v3272_v22, %v3271_v21  ;;  %v3259_v33 = vunpack.c.l.bf16 %v3317_v32  ;;  %v3260_v34 = vunpack.c.h.bf16 %v3317_v32  ;;  %v3255_v37 = vunpack.c.l.bf16 %v3254_v36 }
  0x5b   : > { %v4933_v27 = vpack.i.bf16 %v3268_v25, %v3267_v24  ;;  %v3256_v38 = vunpack.c.h.bf16 %v3254_v36  ;;  %v698_v2 = vsub.s32 2, %v513_v60  ;;  %v514_v3 = vsub.s32 0, %v513_v60 }
  0x5c   : > { %v4962_v35 = vpack.i.bf16 %v3260_v34, %v3259_v33  ;;  %v5079_v9 = vrot.slane %v365_v5, %v598_v63  ;;  %v898_v10 = vsub.s32 4, %v513_v60  ;;  %v1198_v33 = vsub.s32 7, %v513_v60 }
  0x5d   : > { %v4976_v39 = vpack.i.bf16 %v3256_v38, %v3255_v37  ;;  %v5084_v13 = vrot.slane %v365_v5, %v514_v3  ;;  %v1098_v34 = vsub.s32 6, %v513_v60 }
  0x5e   : > { %3803 = vset.pattern.permute.xlu1 %v4712_v16  ;;  %3906 = vperm.xlu0 %3839, %v4915_v12   ;;  %v5092_v32 = vrot.slane %v365_v5, %v898_v10 }
  0x5f   : > { %3805 = vperm.xlu1 %3803, %v4918_v14  }
  0x62   : > { %3910 = vset.pattern.permute.xlu0 %v4713_v20 }
  0x63   : > { %3809 = vset.pattern.permute.xlu1 %v4713_v20  ;;  %3912 = vperm.xlu0 %3910, %v4911_v11  }
  0x64   : > { %3811 = vperm.xlu1 %3809, %v4918_v14  }
  0x67   : > { %3941 = vperm.xlu0 %3910, %v4928_v23  }
  0x68   : > { %3815 = vset.pattern.permute.xlu1 %v4711_v1 }
  0x69   : > { %3817 = vperm.xlu1 %3815, %v4918_v14  }
  0x6b   : > { %3957 = vset.pattern.permute.xlu0 %v4714_v28 }
  0x6c   : > { %3959 = vperm.xlu0 %3957, %v4915_v12  }
  0x6d   : > { %3821 = vset.pattern.permute.xlu1 %v4715_v29 }
  0x6e   : > { %3823 = vperm.xlu1 %3821, %v4911_v11  }
  0x70   : > { %3963 = vset.pattern.permute.xlu0 %v4716_v30 }
  0x71   : > { %3965 = vperm.xlu0 %3963, %v4911_v11  }
  0x72   : > { %3827 = vset.pattern.permute.xlu1 %v4713_v20 }
  0x73   : > { %3829 = vperm.xlu1 %3827, %v4915_v12  }
  0x75   : > { %3982 = vperm.xlu0 %3963, %v4931_v26  }
  0x77   : > { %3833 = vset.pattern.permute.xlu1 %v4717_v31 }
  0x78   : > { %3835 = vperm.xlu1 %3833, %v4918_v14  }
  0x79   : > { %3986 = vset.pattern.permute.xlu0 %v4717_v31 }
  0x7a   : > { %3988 = vperm.xlu0 %3986, %v4911_v11  }
  0x7c   : > { %3845 = vset.pattern.permute.xlu1 %v4711_v1 }
  0x7d   : > { %3847 = vperm.xlu1 %3845, %v4915_v12  }
  0x7e   : > { %3993 = vperm.xlu0 %3986, %v4915_v12  }
  0x81   : > { %3851 = vset.pattern.permute.xlu1 %v4715_v29 }
  0x82   : > { %3853 = vperm.xlu1 %3851, %v4918_v14   ;;  %4010 = vperm.xlu0 %3986, %v4928_v23  }
  0x86   : > { %3857 = vset.pattern.permute.xlu1 %v4712_v16  ;;  %4014 = vset.pattern.permute.xlu0 %v4711_v1 }
  0x87   : > { %3859 = vperm.xlu1 %3857, %v4931_v26   ;;  %4016 = vperm.xlu0 %4014, %v4931_v26  }
  0x8b   : > { %3863 = vset.pattern.permute.xlu1 %v4713_v20  ;;  %4033 = vperm.xlu0 %4014, %v4962_v35  }
  0x8c   : > { %3865 = vperm.xlu1 %3863, %v4931_v26  }
  0x8f   : > { %4037 = vset.pattern.permute.xlu0 %v4712_v16 }
  0x90   : > { %3869 = vset.pattern.permute.xlu1 %v4710_v0  ;;  %4039 = vperm.xlu0 %4037, %v4911_v11  }
  0x91   : > { %3871 = vperm.xlu1 %3869, %v4918_v14  }
  0x94   : > { %4044 = vperm.xlu0 %4037, %v4915_v12  }
  0x95   : > { %3875 = vset.pattern.permute.xlu1 %v4714_v28 }
  0x96   : > { %3877 = vperm.xlu1 %3875, %v4911_v11   ;;  %v798_v11 = vsub.s32 3, %v513_v60 }
  0x98   : > { %4049 = vperm.xlu0 %4037, %v4933_v27   ;;  %v5094_v36 = vrot.slane %v365_v5, %v798_v11 }
  0x9a   : > { %3881 = vset.pattern.permute.xlu1 %v4715_v29 }
  0x9b   : > { %3883 = vperm.xlu1 %3881, %v4915_v12  }
  0x9c   : > { %4066 = vperm.xlu0 %4037, %v4976_v39  }
  0x9f   : > { %3887 = vset.pattern.permute.xlu1 %v4716_v30 }
  0xa0   : > { %3889 = vperm.xlu1 %3887, %v4918_v14   ;;  %4070 = vset.pattern.permute.xlu0 %v4715_v29 }
  0xa1   : > { %4072 = vperm.xlu0 %4070, %v4931_v26  }
  0xa4   : > { %3893 = vset.pattern.permute.xlu1 %v4713_v20 }
  0xa5   : > { %3895 = vperm.xlu1 %3893, %v4933_v27   ;;  %4101 = vperm.xlu0 %4070, %v4962_v35  }
  0xa9   : > { %3899 = vset.pattern.permute.xlu1 %v4717_v31  ;;  %4105 = vset.pattern.permute.xlu0 %v4710_v0 }
  0xaa   : > { %3901 = vperm.xlu1 %3899, %v4931_v26   ;;  %4107 = vperm.xlu0 %4105, %v4928_v23  }
  0xae   : > { %3916 = vset.pattern.permute.xlu1 %v4714_v28  ;;  %4124 = vperm.xlu0 %4105, %v4962_v35  }
  0xaf   : > { %3918 = vperm.xlu1 %3916, %v4918_v14   ;;  %v998_v14 = vsub.s32 5, %v513_v60 }
  0xb2   : > { %4140 = vset.pattern.permute.xlu0 %v4716_v30 }
  0xb3   : > { %3922 = vset.pattern.permute.xlu1 %v4711_v1  ;;  %4142 = vperm.xlu0 %4140, %v4962_v35  }
  0xb4   : > { %3924 = vperm.xlu1 %3922, %v4933_v27  }
  0xb7   : > { %4159 = vperm.xlu0 %4140, %v4976_v39  }
  0xb8   : > { %3928 = vset.pattern.permute.xlu1 %v4716_v30 }
  0xb9   : > { %3930 = vperm.xlu1 %3928, %v4915_v12   ;;  %v5082_v12 = vrot.slane %v365_v5, %v698_v2 }
  0xbb   : > { %4210 = vset.pattern.permute.xlu0 %v4710_v0 }
  0xbd   : > { %3934 = vset.pattern.permute.xlu1 %v4712_v16 }
  0xbe   : > { %3936 = vperm.xlu1 %3934, %v4928_v23  }
  0xc2   : > { %3945 = vset.pattern.permute.xlu1 %v4717_v31 }
  0xc3   : > { %3947 = vperm.xlu1 %3945, %v4933_v27  }
  0xc7   : > { %3951 = vset.pattern.permute.xlu1 %v4710_v0 }
  0xc8   : > { %3953 = vperm.xlu1 %3951, %v4931_v26  }
  0xcc   : > { %3969 = vset.pattern.permute.xlu1 %v4711_v1 }
  0xcd   : > { %3971 = vperm.xlu1 %3969, %v4928_v23  }
  0xd1   : > { %3975 = vset.pattern.permute.xlu1 %v4715_v29 }
  0xd2   : > { %3977 = vperm.xlu1 %3975, %v4933_v27  }
  0xd5   : > { %v5013_v40 = vpop.permute.xlu1 %3799  ;;  %v5015_v41 = vpop.permute.xlu0 %3841 }
  0xd6   : > { %3997 = vset.pattern.permute.xlu1 %v4712_v16  ;;  %v3802_v15 = vunpack.i.h.bf16 %v5013_v40  ;;  %v3801_v17 = vunpack.i.l.bf16 %v5013_v40  ;;  %v3844_v37 = vunpack.i.h.bf16 %v5015_v41  ;;  %v3843_v38 = vunpack.i.l.bf16 %v5015_v41 }
  0xd7   : > { %3999 = vperm.xlu1 %3997, %v4962_v35  }
  0xd8   : > { %v715_v59 = vmul.f32 %v3802_v15, %v5082_v12 }
  0xd9   : > { %v5019_v42 = vpop.permute.xlu0 %3906 }
  0xda   : > { %v5021_v43 = vpop.permute.xlu1 %3805 }
  0xdb   : > { %4003 = vset.pattern.permute.xlu1 %v4713_v20 }
  0xdc   : > { %4005 = vperm.xlu1 %4003, %v4962_v35  }
  0xde   : > { %v3913_v44 = vpop.permute.xlu0 %3912 }
  0xdf   : > { %v5025_v45 = vpop.permute.xlu1 %3811  ;;  %v3915_v6 = vunpack.i.h.bf16 %v3913_v44  ;;  %v3914_v7 = vunpack.i.l.bf16 %v3913_v44 }
  0xe0   : > { %4020 = vset.pattern.permute.xlu1 %v4710_v0 }
  0xe1   : > { %4022 = vperm.xlu1 %4020, %v4933_v27   ;;  %v614_v18 = vmul.f32 %v3914_v7, %v5079_v9  ;;  %v615_v19 = vmul.f32 %v3915_v6, %v5079_v9  ;;  %v5108_v7 = vrot.slane %v365_v5, %v998_v14 }
  0xe2   : > { %v5029_v46 = vpop.permute.xlu0 %3941 }
  0xe4   : > { %v5031_v47 = vpop.permute.xlu1 %3817 }
  0xe5   : > { %4026 = vset.pattern.permute.xlu1 %v4714_v28 }
  0xe6   : > { %4028 = vperm.xlu1 %4026, %v4931_v26  }
  0xe7   : > { %v5035_v48 = vpop.permute.xlu0 %3959 }
  0xe9   : > { %v5037_v49 = vpop.permute.xlu1 %3823 }
  0xea   : > { %4053 = vset.pattern.permute.xlu1 %v4715_v29  ;;  %v3826_v60 = vunpack.i.h.bf16 %v5037_v49  ;;  %v3825_v63 = vunpack.i.l.bf16 %v5037_v49  ;;  %v1014_v49 = vmul.f32 %v3843_v38, %v5108_v7 }
  0xeb   : > { %4055 = vperm.xlu1 %4053, %v4928_v23  }
  0xec   : > { %v5041_v50 = vpop.permute.xlu0 %3965  ;;  %v914_v14 = vmul.f32 %v3825_v63, %v5092_v32 }
  0xed   : > { %v3968_v10 = vunpack.i.h.bf16 %v5041_v50  ;;  %v3967_v11 = vunpack.i.l.bf16 %v5041_v50 }
  0xee   : > { %v5043_v51 = vpop.permute.xlu1 %3829 }
  0xef   : > { %4059 = vset.pattern.permute.xlu1 %v4716_v30 }
  0xf0   : > { %4061 = vperm.xlu1 %4059, %v4933_v27   ;;  %v5047_v52 = vpop.permute.xlu0 %3982 }
  0xf3   : > { %v5049_v53 = vpop.permute.xlu1 %3835 }
  0xf4   : > { %4076 = vset.pattern.permute.xlu1 %v4713_v20 }
  0xf5   : > { %4078 = vperm.xlu1 %4076, %v4976_v39   ;;  %v3989_v54 = vpop.permute.xlu0 %3988 }
  0xf6   : > { %v3991_v22 = vunpack.i.h.bf16 %v3989_v54  ;;  %v3990_v24 = vunpack.i.l.bf16 %v3989_v54  ;;  %v714_v54 = vmul.f32 %v3801_v17, %v5082_v12 }
  0xf8   : > { %v5053_v55 = vpop.permute.xlu1 %3847  ;;  %v814_v2 = vmul.f32 %v3990_v24, %v5094_v36  ;;  %v815_v3 = vmul.f32 %v3991_v22, %v5094_v36  ;;  %v1015_v24 = vmul.f32 %v3844_v37, %v5108_v7  ;;  %v5117_v22 = vrot.slane %v365_v5, %v1198_v33 }
  0xf9   : > { %4082 = vset.pattern.permute.xlu1 %v4717_v31  ;;  %v5056_v56 = vpop.permute.xlu0 %3993 }
  0xfa   : > { %4084 = vperm.xlu1 %4082, %v4962_v35  }
  0xfd   : > { %v5059_v57 = vpop.permute.xlu1 %3853  ;;  %v5061_v58 = vpop.permute.xlu0 %4010 }
  0xfe   : > { %4088 = vset.pattern.permute.xlu1 %v4714_v28 }
  0xff   : > { %4090 = vperm.xlu1 %4088, %v4933_v27  }
 0x102   : > { %v5065_v61 = vpop.permute.xlu1 %3859  ;;  %v5067_v62 = vpop.permute.xlu0 %4016 }
 0x103   : > { %4094 = vset.pattern.permute.xlu1 %v4711_v1 }
 0x104   : > { %4096 = vperm.xlu1 %4094, %v4976_v39  }
 0x106   : > { %v5071_v4 = vpop.permute.xlu0 %4033 }
 0x107   : > { %v5076_v8 = vpop.permute.xlu1 %3865 }
 0x108   : > { %4111 = vset.pattern.permute.xlu1 %v4716_v30 }
 0x109   : > { %4113 = vperm.xlu1 %4111, %v4928_v23  }
 0x10b   : > { %v4040_v21 = vpop.permute.xlu0 %4039 }
 0x10c   : > { %v4042_v25 = vunpack.i.h.bf16 %v4040_v21  ;;  %v4041_v26 = vunpack.i.l.bf16 %v4040_v21  ;;  %v5090_v27 = vpop.permute.xlu1 %3871  ;;  %v5112_v21 = vrot.slane %v365_v5, %v1098_v34  ;;  %v3813_v34 = vunpack.i.l.bf16 %v5025_v45 }
 0x10d   : > { %4117 = vset.pattern.permute.xlu1 %v4717_v31 }
 0x10e   : > { %v530_v40 = vmul.f32 %v4041_v26, %v5084_v13  ;;  %v531_v44 = vmul.f32 %v4042_v25, %v5084_v13  ;;  %4119 = vperm.xlu1 %4117, %v4976_v39   ;;  %v3814_v26 = vunpack.i.h.bf16 %v5025_v45  ;;  %v1115_v38 = vmul.f32 %v3968_v10, %v5112_v21 }
 0x10f   : > { %v612_v63 = vmul.f32 %v3813_v34, %v5079_v9 }
 0x110   : > { %v630_v6 = vadd.f32 %v614_v18, %v530_v40  ;;  %v631_v41 = vadd.f32 %v615_v19, %v531_v44  ;;  %v915_v18 = vmul.f32 %v3826_v60, %v5092_v32  ;;  %v1114_v40 = vmul.f32 %v3967_v11, %v5112_v21 }
 0x111   : > { %v3878_v17 = vpop.permute.xlu1 %3877 }
 0x112   : > { %v730_v15 = vadd.f32 %v714_v54, %v630_v6  ;;  %v731_v25 = vadd.f32 %v715_v59, %v631_v41  ;;  %4128 = vset.pattern.permute.xlu1 %v4714_v28  ;;  %v3880_v44 = vunpack.i.h.bf16 %v3878_v17  ;;  %v3879_v37 = vunpack.i.l.bf16 %v3878_v17 }
 0x113   : > { %4130 = vperm.xlu1 %4128, %v4928_v23   ;;  %v3807_v54 = vunpack.i.l.bf16 %v5021_v43  ;;  %v3808_v59 = vunpack.i.h.bf16 %v5021_v43  ;;  %v3819_v6 = vunpack.i.l.bf16 %v5031_v47 }
 0x114   : > { %v830_v50 = vadd.f32 %v814_v2, %v730_v15  ;;  %v831_v19 = vadd.f32 %v815_v3, %v731_v25  ;;  %v613_v2 = vmul.f32 %v3814_v26, %v5079_v9  ;;  %v3820_v3 = vunpack.i.h.bf16 %v5031_v47 }
 0x115   : > { %v1214_v11 = vmul.f32 %v3879_v37, %v5117_v22  ;;  %v1215_v17 = vmul.f32 %v3880_v44, %v5117_v22  ;;  %v528_v43 = vmul.f32 %v3807_v54, %v5084_v13  ;;  %v3838_v15 = vunpack.i.h.bf16 %v5049_v53 }
 0x116   : > { %v5126_v5 = vpop.permute.xlu1 %3883  ;;  %v930_v33 = vadd.f32 %v914_v14, %v830_v50  ;;  %v931_v23 = vadd.f32 %v915_v18, %v831_v19  ;;  %v3837_v25 = vunpack.i.l.bf16 %v5049_v53  ;;  %v529_v14 = vmul.f32 %v3808_v59, %v5084_v13 }
 0x117   : > { %4134 = vset.pattern.permute.xlu1 %v4715_v29  ;;  %v628_v50 = vadd.f32 %v612_v63, %v528_v43  ;;  %v712_v19 = vmul.f32 %v3819_v6, %v5082_v12  ;;  %v713_v26 = vmul.f32 %v3820_v3, %v5082_v12  ;;  %v3832_v53 = vunpack.i.h.bf16 %v5043_v51 }
 0x118   : > { %4136 = vperm.xlu1 %4134, %v4976_v39   ;;  %v1030_v60 = vadd.f32 %v1014_v49, %v930_v33  ;;  %v1031_v45 = vadd.f32 %v1015_v24, %v931_v23  ;;  %v4045_v49 = vpop.permute.xlu0 %4044  ;;  %v629_v34 = vadd.f32 %v613_v2, %v529_v14  ;;  %v3831_v37 = vunpack.i.l.bf16 %v5043_v51 }
 0x119   : > { %v812_v33 = vmul.f32 %v3837_v25, %v5094_v36  ;;  %v813_v23 = vmul.f32 %v3838_v15, %v5094_v36  ;;  %v3856_v54 = vunpack.i.h.bf16 %v5059_v57  ;;  %v3855_v59 = vunpack.i.l.bf16 %v5059_v57 }
 0x11a   : > { %v1130_v41 = vadd.f32 %v1114_v40, %v1030_v60  ;;  %v1131_v10 = vadd.f32 %v1115_v38, %v1031_v45  ;;  %v4047_v40 = vunpack.i.h.bf16 %v4045_v49  ;;  %v4046_v38 = vunpack.i.l.bf16 %v4045_v49 }
 0x11b   : > { %v3890_v24 = vpop.permute.xlu1 %3889  ;;  %v728_v45 = vadd.f32 %v712_v19, %v628_v50  ;;  %v729_v63 = vadd.f32 %v713_v26, %v629_v34  ;;  %v3874_v2 = vunpack.i.h.bf16 %v5090_v27  ;;  %v3873_v51 = vunpack.i.l.bf16 %v5090_v27 }
 0x11c   : > { %4146 = vset.pattern.permute.xlu1 %v4710_v0  ;;  %v1230_v18 = vadd.f32 %v1214_v11, %v1130_v41  ;;  %v1231_v47 = vadd.f32 %v1215_v17, %v1131_v10  ;;  %v526_v3 = vmul.f32 %v4046_v38, %v5084_v13  ;;  %v527_v6 = vmul.f32 %v4047_v40, %v5084_v13 }
 0x11d   : > { %4148 = vperm.xlu1 %4146, %v4976_v39   ;;  %v610_v57 = vmul.f32 %v3831_v37, %v5079_v9  ;;  %v611_v41 = vmul.f32 %v3832_v53, %v5079_v9  ;;  %v828_v10 = vadd.f32 %v812_v33, %v728_v45  ;;  %v829_v11 = vadd.f32 %v813_v23, %v729_v63 }
 0x11e   : > { %v1239_v44 = vpack.c.bf16 %v1231_v47, %v1230_v18  ;;  %v3850_v17 = vunpack.i.h.bf16 %v5053_v55  ;;  %v3849_v43 = vunpack.i.l.bf16 %v5053_v55  ;;  %v912_v15 = vmul.f32 %v3855_v59, %v5092_v32 }
 0x11f   : > { %v913_v27 = vmul.f32 %v3856_v54, %v5092_v32  ;;  %v3996_v25 = vunpack.i.h.bf16 %v5056_v56  ;;  %v3995_v49 = vunpack.i.l.bf16 %v5056_v56  ;;  %v3892_v14 = vunpack.i.h.bf16 %v3890_v24 }
 0x120   : > { %v5152_v60 = vpop.permute.xlu1 %3895  ;;  %3462 = vmatprep.subr.bf16.mxu0 %v1239_v44  ;;  %v1012_v47 = vmul.f32 %v3873_v51, %v5108_v7  ;;  %v1013_v50 = vmul.f32 %v3874_v2, %v5108_v7  ;;  %v626_v19 = vadd.f32 %v610_v57, %v526_v3  ;;  %v627_v26 = vadd.f32 %v611_v41, %v527_v6  ;;  %v5183_v51 = vld [vmem:[%s4909_s11] sm:$0xff]  }
 0x121   : > { %4152 = vset.pattern.permute.xlu1 %v4714_v28  ;;  %3463 = vmatpush3.bf16.msra.mxu0 %v1239_v44  ;;  %v710_v55 = vmul.f32 %v3849_v43, %v5082_v12  ;;  %v711_v34 = vmul.f32 %v3850_v17, %v5082_v12  ;;  %v928_v40 = vadd.f32 %v912_v15, %v828_v10  ;;  %v3886_v59 = vunpack.i.h.bf16 %v5126_v5 }
 0x122   : > { %4154 = vperm.xlu1 %4152, %v4962_v35   ;;  %v3891_v35 = vunpack.i.l.bf16 %v3890_v24  ;;  %v929_v38 = vadd.f32 %v913_v27, %v829_v11  ;;  %v810_v56 = vmul.f32 %v3995_v49, %v5094_v36  ;;  %v811_v24 = vmul.f32 %v3996_v25, %v5094_v36  ;;  %3478 = vmatprep.mubr.bf16.mxu0 %v5183_v51  ;;  %v5192_v27 = vpop.permute.xlu0 %4049 }
 0x123   : > { %v1113_v53 = vmul.f32 %v3892_v14, %v5112_v21  ;;  %v1028_v37 = vadd.f32 %v1012_v47, %v928_v40  ;;  %v726_v23 = vadd.f32 %v710_v55, %v626_v19  ;;  %v727_v54 = vadd.f32 %v711_v34, %v627_v26 }
 0x124   : > { %v1112_v44 = vmul.f32 %v3891_v35, %v5112_v21  ;;  %v1029_v33 = vadd.f32 %v1013_v50, %v929_v38  ;;  %v3885_v45 = vunpack.i.l.bf16 %v5126_v5  ;;  %v3909_v10 = vunpack.i.h.bf16 %v5019_v42 }
 0x125   : > { %v5168_v18 = vpop.permute.xlu1 %3901  ;;  %v3908_v11 = vunpack.i.l.bf16 %v5019_v42  ;;  %v826_v17 = vadd.f32 %v810_v56, %v726_v23  ;;  %v827_v43 = vadd.f32 %v811_v24, %v727_v54  ;;  %v911_v15 = vmul.f32 %v3886_v59, %v5092_v32 }
 0x126   : > { %4164 = vperm.xlu1 %4152, %v4976_v39   ;;  %v1128_v3 = vadd.f32 %v1112_v44, %v1028_v37  ;;  %v1129_v6 = vadd.f32 %v1113_v53, %v1029_v33  ;;  %v910_v5 = vmul.f32 %v3885_v45, %v5092_v32  ;;  %v3962_v47 = vunpack.i.h.bf16 %v5035_v48  ;;  %v5202_v56 = vpop.permute.xlu0 %4066 }
 0x127   : > { %v3961_v50 = vunpack.i.l.bf16 %v5035_v48  ;;  %v1010_v19 = vmul.f32 %v3908_v11, %v5108_v7  ;;  %v1011_v42 = vmul.f32 %v3909_v10, %v5108_v7  ;;  %v927_v55 = vadd.f32 %v911_v15, %v827_v43 }
 0x128   : > { %v926_v26 = vadd.f32 %v910_v5, %v826_v17  ;;  %v3868_v34 = vunpack.i.h.bf16 %v5076_v8  ;;  %v3867_v40 = vunpack.i.l.bf16 %v5076_v8  ;;  %v1211_v48 = vmul.f32 %v3962_v47, %v5117_v22 }
 0x129   : > { %v1210_v53 = vmul.f32 %v3961_v50, %v5117_v22  ;;  %v3862_v37 = vunpack.i.h.bf16 %v5065_v61  ;;  %v3861_v33 = vunpack.i.l.bf16 %v5065_v61  ;;  %v1027_v54 = vadd.f32 %v1011_v42, %v927_v55 }
 0x12a   : > { %v3919_v39 = vpop.permute.xlu1 %3918  ;;  %4168 = vset.pattern.permute.xlu1 %v4713_v20  ;;  %v1026_v23 = vadd.f32 %v1010_v19, %v926_v26  ;;  %v4019_v59 = vunpack.i.h.bf16 %v5067_v62  ;;  %v4018_v45 = vunpack.i.l.bf16 %v5067_v62  ;;  %v3904_v10 = vunpack.i.h.bf16 %v5168_v18  ;;  %v4073_v17 = vpop.permute.xlu0 %4072 }
 0x12b   : > { %v3921_v63 = vunpack.i.h.bf16 %v3919_v39  ;;  %v3920_v2 = vunpack.i.l.bf16 %v3919_v39  ;;  %v525_v61 = vmul.f32 %v3862_v37, %v5084_v13  ;;  %v3903_v11 = vunpack.i.l.bf16 %v5168_v18 }
 0x12c   : > { %v708_v62 = vmul.f32 %v4018_v45, %v5082_v12  ;;  %v709_v15 = vmul.f32 %v4019_v59, %v5082_v12  ;;  %v809_v50 = vmul.f32 %v3904_v10, %v5094_v36  ;;  %v4075_v19 = vunpack.i.h.bf16 %v4073_v17 }
 0x12d   : > { %v1212_v57 = vmul.f32 %v3920_v2, %v5117_v22  ;;  %v1213_v41 = vmul.f32 %v3921_v63, %v5117_v22  ;;  %v608_v63 = vmul.f32 %v3867_v40, %v5079_v9  ;;  %v609_v2 = vmul.f32 %v3868_v34, %v5079_v9 }
 0x12e   : > { %v808_v47 = vmul.f32 %v3903_v11, %v5094_v36  ;;  %v4074_v42 = vunpack.i.l.bf16 %v4073_v17  ;;  %v3944_v18 = vunpack.i.h.bf16 %v5029_v46  ;;  %v3943_v55 = vunpack.i.l.bf16 %v5029_v46 }
 0x12f   : > { %v5194_v25 = vpop.permute.xlu1 %3924  ;;  %v1228_v49 = vadd.f32 %v1212_v57, %v1128_v3  ;;  %v1229_v14 = vadd.f32 %v1213_v41, %v1129_v6  ;;  %v524_v41 = vmul.f32 %v3861_v33, %v5084_v13  ;;  %v909_v37 = vmul.f32 %v4075_v19, %v5092_v32 }
 0x130   : > { %v605_v46 = vmul.f32 %v3944_v18, %v5079_v9 }
 0x131   : > { %v1238_v35 = vpack.c.bf16 %v1229_v14, %v1228_v49  ;;  %v624_v49 = vadd.f32 %v608_v63, %v524_v41  ;;  %v625_v14 = vadd.f32 %v609_v2, %v525_v61  ;;  %v4013_v63 = vunpack.i.h.bf16 %v5061_v58  ;;  %v3331_v61 = vld [vmem:[%s4901_s16 + $0x78] sm:$0xff]  }
 0x132   : > { %v4012_v2 = vunpack.i.l.bf16 %v5061_v58  ;;  %v3315_v17 = vunpack.c.l.bf16 %v3331_v61  ;;  %v4549_v58 = vld [vmem:[#allocation2 + $0x30] sm:$0xff]  }
 0x133   : > { %3464 = vmatprep.subr.bf16.mxu0 %v1238_v35  ;;  %v724_v34 = vadd.f32 %v708_v62, %v624_v49  ;;  %v725_v40 = vadd.f32 %v709_v15, %v625_v14 }
 0x134   : > { %v3931_v38 = vpop.permute.xlu1 %3930  ;;  %3465 = vmatpush3.bf16.msra.mxu0 %v1238_v35  ;;  %v804_v19 = vmul.f32 %v4012_v2, %v5094_v36 }
 0x135   : > { %v3933_v24 = vunpack.i.h.bf16 %v3931_v38  ;;  %v3932_v44 = vunpack.i.l.bf16 %v3931_v38  ;;  %v3985_v38 = vunpack.i.h.bf16 %v5047_v52 }
 0x137   : > { %v1110_v39 = vmul.f32 %v3932_v44, %v5112_v21  ;;  %v1111_v8 = vmul.f32 %v3933_v24, %v5112_v21  ;;  %v3984_v24 = vunpack.i.l.bf16 %v5047_v52  ;;  %v824_v44 = vadd.f32 %v808_v47, %v724_v34  ;;  %v3330_v34 = vld [vmem:[%s4901_s16 + $0x70] sm:$0xff]  }
 0x138   : > { %v1109_v52 = vmul.f32 %v3985_v38, %v5112_v21 }
 0x139   : > { %v1126_v3 = vadd.f32 %v1110_v39, %v1026_v23  ;;  %v1127_v6 = vadd.f32 %v1111_v8, %v1027_v54  ;;  %v3937_v57 = vpop.permute.xlu1 %3936  ;;  %v604_v39 = vmul.f32 %v3943_v55, %v5079_v9  ;;  %v1108_v45 = vmul.f32 %v3984_v24, %v5112_v21 }
 0x13a   : > { %v3939_v33 = vunpack.i.h.bf16 %v3937_v57  ;;  %v3938_v23 = vunpack.i.l.bf16 %v3937_v57 }
 0x13b   : > { %v1226_v43 = vadd.f32 %v1210_v53, %v1126_v3  ;;  %v1227_v5 = vadd.f32 %v1211_v48, %v1127_v6  ;;  %v825_v53 = vadd.f32 %v809_v50, %v725_v40  ;;  %v908_v48 = vmul.f32 %v4074_v42, %v5092_v32  ;;  %v3329_v50 = vld [vmem:[%s4901_s16 + $0x68] sm:$0xff]  }
 0x13c   : > { %v520_v10 = vmul.f32 %v3938_v23, %v5084_v13  ;;  %v521_v11 = vmul.f32 %v3939_v33, %v5084_v13  ;;  %v805_v42 = vmul.f32 %v4013_v63, %v5094_v36  ;;  %v3326_v33 = vld [vmem:[%s4901_s16 + $0x50] sm:$0xff]  }
 0x13d   : > { %v1237_v35 = vpack.c.bf16 %v1227_v5, %v1226_v43  ;;  %v924_v3 = vadd.f32 %v908_v48, %v824_v44  ;;  %v925_v6 = vadd.f32 %v909_v37, %v825_v53  ;;  %v3316_v43 = vunpack.c.h.bf16 %v3331_v61  ;;  %v4548_v5 = vld [vmem:[#allocation2 + $0x38] sm:$0xff]   ;;  %v4550_v53 = vld [vmem:[#allocation2 + $0x28] sm:$0xff]  }
 0x13e   : > { %v5222_v26 = vpop.permute.xlu1 %3947  ;;  %3494 = vmatprep.subr.bf16.mxu1 %v4548_v5  ;;  %v620_v40 = vadd.f32 %v604_v39, %v520_v10  ;;  %v621_v38 = vadd.f32 %v605_v46, %v521_v11  ;;  %v3307_v48 = vunpack.c.l.bf16 %v3329_v50  ;;  %v3308_v37 = vunpack.c.h.bf16 %v3329_v50  ;;  %v4552_v61 = vld [vmem:[#allocation2 + $0x18] sm:$0xff]  }
 0x13f   : > { %3466 = vmatprep.subr.bf16.mxu0 %v1237_v35  ;;  %v5241_v47 = vpack.i.bf16 %v3316_v43, %v3315_v17  ;;  %3495 = vmatpush3.bf16.msra.mxu1 %v4548_v5  ;;  %v3295_v63 = vunpack.c.l.bf16 %v3326_v33  ;;  %v3296_v2 = vunpack.c.h.bf16 %v3326_v33  ;;  %v3328_v17 = vld [vmem:[%s4901_s16 + $0x60] sm:$0xff]  }
 0x140   : > { %3467 = vmatpush3.bf16.msra.mxu0 %v1237_v35  ;;  %3496 = vmatprep.subr.bf16.mxu1 %v4549_v58  ;;  %v5258_v39 = vpack.i.bf16 %v3308_v37, %v3307_v48  ;;  %v3303_v43 = vunpack.c.l.bf16 %v3328_v17  ;;  %v3304_v5 = vunpack.c.h.bf16 %v3328_v17 }
 0x141   : > { %4170 = vperm.xlu1 %4168, %v5241_v47   ;;  %4212 = vperm.xlu0 %4210, %v5241_v47  }
 0x143   : > { %v3954_v54 = vpop.permute.xlu1 %3953  ;;  %3497 = vmatpush3.bf16.msra.mxu1 %v4549_v58 }
 0x144   : > { %v3956_v8 = vunpack.i.h.bf16 %v3954_v54  ;;  %v3955_v59 = vunpack.i.l.bf16 %v3954_v54  ;;  %3498 = vmatprep.subr.bf16.mxu1 %v4550_v53 }
 0x145   : > { %4174 = vset.pattern.permute.xlu1 %v4711_v1  ;;  %4277 = vperm.xlu0 %4210, %v5258_v39  }
 0x146   : > { %v1008_v57 = vmul.f32 %v3955_v59, %v5108_v7  ;;  %v1009_v41 = vmul.f32 %v3956_v8, %v5108_v7  ;;  %v3311_v59 = vunpack.c.l.bf16 %v3330_v34  ;;  %4176 = vperm.xlu1 %4174, %v5241_v47  }
 0x147   : > { %3499 = vmatpush3.bf16.msra.mxu1 %v4550_v53  ;;  %v3926_v53 = vunpack.i.l.bf16 %v5194_v25 }
 0x148   : > { %v1024_v62 = vadd.f32 %v1008_v57, %v924_v3  ;;  %v1025_v15 = vadd.f32 %v1009_v41, %v925_v6  ;;  %v3972_v49 = vpop.permute.xlu1 %3971  ;;  %v4551_v3 = vld [vmem:[#allocation2 + $0x20] sm:$0xff]   ;;  %v5271_v41 = vpack.i.bf16 %v3296_v2, %v3295_v63 }
 0x149   : > { %v3974_v14 = vunpack.i.h.bf16 %v3972_v49  ;;  %v3973_v35 = vunpack.i.l.bf16 %v3972_v49  ;;  %3500 = vmatprep.subr.bf16.mxu1 %v4551_v3  ;;  %4305 = vset.pattern.permute.xlu0 %v4713_v20 }
 0x14a   : > { %v5246_v18 = vadd.f32 %v1108_v45, %v1024_v62  ;;  %v5248_v55 = vadd.f32 %v1109_v52, %v1025_v15  ;;  %v3312_v45 = vunpack.c.h.bf16 %v3330_v34  ;;  %4180 = vset.pattern.permute.xlu1 %v4713_v20  ;;  %4307 = vperm.xlu0 %4305, %v5271_v41   ;;  %v5290_v15 = vpack.i.bf16 %v3304_v5, %v3303_v43 }
 0x14b   : > { %v704_v24 = vmul.f32 %v3973_v35, %v5082_v12  ;;  %v705_v44 = vmul.f32 %v3974_v14, %v5082_v12  ;;  %3501 = vmatpush3.bf16.msra.mxu1 %v4551_v3 }
 0x14c   : > { %v5266_v6 = vpack.i.bf16 %v3312_v45, %v3311_v59  ;;  %3502 = vmatprep.subr.bf16.mxu1 %v4552_v61 }
 0x14d   : > { %v720_v23 = vadd.f32 %v704_v24, %v620_v40  ;;  %v721_v54 = vadd.f32 %v705_v44, %v621_v38  ;;  %v5255_v8 = vpop.permute.xlu1 %3977  ;;  %v4052_v40 = vunpack.i.h.bf16 %v5192_v27  ;;  %v4051_v38 = vunpack.i.l.bf16 %v5192_v27 }
 0x14e   : > { %4182 = vperm.xlu1 %4180, %v5266_v6   ;;  %4323 = vset.pattern.permute.xlu0 %v4714_v28  ;;  %v3898_v24 = vunpack.i.h.bf16 %v5152_v60  ;;  %v3897_v44 = vunpack.i.l.bf16 %v5152_v60  ;;  %v3950_v60 = vunpack.i.h.bf16 %v5222_v26  ;;  %v3980_v45 = vunpack.i.h.bf16 %v5255_v8 }
 0x14f   : > { %v5260_v46 = vadd.f32 %v804_v19, %v720_v23  ;;  %v5262_v52 = vadd.f32 %v805_v42, %v721_v54  ;;  %3503 = vmatpush3.bf16.msra.mxu1 %v4552_v61  ;;  %4325 = vperm.xlu0 %4323, %v5258_v39   ;;  %v522_v48 = vmul.f32 %v4051_v38, %v5084_v13  ;;  %v3949_v23 = vunpack.i.l.bf16 %v5222_v26 }
 0x150   : > { %v523_v27 = vmul.f32 %v4052_v40, %v5084_v13  ;;  %v606_v37 = vmul.f32 %v3897_v44, %v5079_v9  ;;  %v607_v33 = vmul.f32 %v3898_v24, %v5079_v9  ;;  %v3979_v63 = vunpack.i.l.bf16 %v5255_v8 }
 0x151   : > { %v806_v61 = vmul.f32 %v3949_v23, %v5094_v36  ;;  %v807_v26 = vmul.f32 %v3950_v60, %v5094_v36 }
 0x152   : > { %v5268_v57 = vpop.permute.xlu1 %3999  ;;  %4186 = vset.pattern.permute.xlu1 %v4711_v1  ;;  %v622_v2 = vadd.f32 %v606_v37, %v522_v48  ;;  %v623_v3 = vadd.f32 %v607_v33, %v523_v27  ;;  %v906_v8 = vmul.f32 %v3979_v63, %v5092_v32  ;;  %v5345_v37 = vpop.permute.xlu0 %4101 }
 0x153   : > { %4188 = vperm.xlu1 %4186, %v5266_v6   ;;  %4329 = vset.pattern.permute.xlu0 %v4716_v30 }
 0x154   : > { %4331 = vperm.xlu0 %4329, %v5241_v47  }
 0x157   : > { %v5276_v10 = vpop.permute.xlu1 %4005  ;;  %4192 = vset.pattern.permute.xlu1 %v4715_v29 }
 0x158   : > { %4194 = vperm.xlu1 %4192, %v5241_v47   ;;  %4348 = vperm.xlu0 %4329, %v5290_v15  }
 0x15c   : > { %v5282_v11 = vpop.permute.xlu1 %4022  ;;  %4198 = vset.pattern.permute.xlu1 %v4713_v20  ;;  %4352 = vset.pattern.permute.xlu0 %v4717_v31 }
 0x15d   : > { %4200 = vperm.xlu1 %4198, %v5258_v39   ;;  %4354 = vperm.xlu0 %4352, %v5241_v47   ;;  %v4025_v17 = vunpack.i.h.bf16 %v5282_v11  ;;  %v4024_v43 = vunpack.i.l.bf16 %v5282_v11 }
 0x15f   : > { %v1007_v11 = vmul.f32 %v4025_v17, %v5108_v7  ;;  %v4108_v17 = vpop.permute.xlu0 %4107 }
 0x161   : > { %v4029_v62 = vpop.permute.xlu1 %4028  ;;  %4204 = vset.pattern.permute.xlu1 %v4717_v31  ;;  %4359 = vperm.xlu0 %4352, %v5258_v39  }
 0x162   : > { %v4031_v49 = vunpack.i.h.bf16 %v4029_v62  ;;  %v4030_v58 = vunpack.i.l.bf16 %v4029_v62  ;;  %4206 = vperm.xlu1 %4204, %v5266_v6  }
 0x164   : > { %v1208_v14 = vmul.f32 %v4030_v58, %v5117_v22  ;;  %v1209_v35 = vmul.f32 %v4031_v49, %v5117_v22  ;;  %v907_v49 = vmul.f32 %v3980_v45, %v5092_v32 }
 0x165   : > { %4376 = vperm.xlu0 %4352, %v5271_v41  }
 0x166   : > { %v5297_v50 = vpop.permute.xlu1 %4055  ;;  %v1224_v19 = vadd.f32 %v1208_v14, %v5246_v18  ;;  %v1225_v42 = vadd.f32 %v1209_v35, %v5248_v55  ;;  %v3927_v55 = vunpack.i.h.bf16 %v5194_v25  ;;  %4216 = vset.pattern.permute.xlu1 %v4711_v1  ;;  %v706_v25 = vmul.f32 %v3926_v53, %v5082_v12 }
 0x167   : > { %4218 = vperm.xlu1 %4216, %v5258_v39  }
 0x168   : > { %v1236_v34 = vpack.c.bf16 %v1225_v42, %v1224_v19  ;;  %v707_v54 = vmul.f32 %v3927_v55, %v5082_v12  ;;  %v722_v5 = vadd.f32 %v706_v25, %v622_v2 }
 0x169   : > { %4380 = vset.pattern.permute.xlu0 %v4711_v1 }
 0x16a   : > { %3468 = vmatprep.subr.bf16.mxu0 %v1236_v34  ;;  %v723_v62 = vadd.f32 %v707_v54, %v623_v3  ;;  %v822_v19 = vadd.f32 %v806_v61, %v722_v5  ;;  %v4057_v3 = vunpack.i.l.bf16 %v5297_v50  ;;  %v4035_v61 = vunpack.i.l.bf16 %v5071_v4  ;;  %4382 = vperm.xlu0 %4380, %v5290_v15  }
 0x16b   : > { %v4062_v18 = vpop.permute.xlu1 %4061  ;;  %3469 = vmatpush3.bf16.msra.mxu0 %v1236_v34  ;;  %4222 = vset.pattern.permute.xlu1 %v4715_v29  ;;  %v1006_v34 = vmul.f32 %v4024_v43, %v5108_v7  ;;  %v4036_v43 = vunpack.i.h.bf16 %v5071_v4  ;;  %v4007_v5 = vunpack.i.l.bf16 %v5276_v10 }
 0x16c   : > { %4224 = vperm.xlu1 %4222, %v5266_v6   ;;  %v4064_v58 = vunpack.i.h.bf16 %v4062_v18  ;;  %v4063_v14 = vunpack.i.l.bf16 %v4062_v18  ;;  %v823_v42 = vadd.f32 %v807_v26, %v723_v62  ;;  %v922_v40 = vadd.f32 %v906_v8, %v822_v19 }
 0x16d   : > { %v4058_v26 = vunpack.i.h.bf16 %v5297_v50  ;;  %v4068_v8 = vunpack.i.l.bf16 %v5202_v56  ;;  %v4109_v19 = vunpack.i.l.bf16 %v4108_v17  ;;  %v702_v50 = vmul.f32 %v4035_v61, %v5082_v12 }
 0x16e   : > { %v923_v38 = vadd.f32 %v907_v49, %v823_v42  ;;  %v1106_v24 = vmul.f32 %v4063_v14, %v5112_v21  ;;  %v1107_v44 = vmul.f32 %v4064_v58, %v5112_v21  ;;  %v1022_v55 = vadd.f32 %v1006_v34, %v922_v40 }
 0x16f   : > { %v4001_v49 = vunpack.i.l.bf16 %v5268_v57  ;;  %v4008_v58 = vunpack.i.h.bf16 %v5276_v10  ;;  %v904_v14 = vmul.f32 %v4057_v3, %v5092_v32  ;;  %v4069_v42 = vunpack.i.h.bf16 %v5202_v56  ;;  %v4125_v3 = vpop.permute.xlu0 %4124 }
 0x170   : > { %v5322_v59 = vpop.permute.xlu1 %4078  ;;  %4228 = vset.pattern.permute.xlu1 %v4712_v16  ;;  %v1023_v53 = vadd.f32 %v1007_v11, %v923_v38  ;;  %v1122_v33 = vadd.f32 %v1106_v24, %v1022_v55  ;;  %v905_v4 = vmul.f32 %v4058_v26, %v5092_v32  ;;  %v4110_v34 = vunpack.i.h.bf16 %v4108_v17 }
 0x171   : > { %4230 = vperm.xlu1 %4228, %v5290_v15   ;;  %v703_v11 = vmul.f32 %v4036_v43, %v5082_v12  ;;  %v4002_v40 = vunpack.i.h.bf16 %v5268_v57  ;;  %v602_v10 = vmul.f32 %v4007_v5, %v5079_v9  ;;  %v5372_v38 = vmul.f32 %v4068_v8, %v5084_v13 }
 0x172   : > { %v1123_v60 = vadd.f32 %v1107_v44, %v1023_v53  ;;  %v4103_v24 = vunpack.i.l.bf16 %v5345_v37  ;;  %v518_v56 = vmul.f32 %v4001_v49, %v5084_v13  ;;  %v603_v53 = vmul.f32 %v4008_v58, %v5079_v9 }
 0x173   : > { %v517_v57 = vmul.f32 %v4069_v42, %v5084_v13  ;;  %v4080_v43 = vunpack.i.l.bf16 %v5322_v59  ;;  %v4127_v5 = vunpack.i.h.bf16 %v4125_v3  ;;  %v4081_v58 = vunpack.i.h.bf16 %v5322_v59 }
 0x175   : > { %v5335_v35 = vpop.permute.xlu1 %4084  ;;  %4234 = vset.pattern.permute.xlu1 %v4713_v20 }
 0x176   : > { %4236 = vperm.xlu1 %4234, %v5290_v15  }
 0x17a   : > { %v4091_v18 = vpop.permute.xlu1 %4090  ;;  %4240 = vset.pattern.permute.xlu1 %v4710_v0 }
 0x17b   : > { %v4093_v48 = vunpack.i.h.bf16 %v4091_v18  ;;  %v4092_v27 = vunpack.i.l.bf16 %v4091_v18  ;;  %4242 = vperm.xlu1 %4240, %v5266_v6  }
 0x17d   : > { %v1206_v23 = vmul.f32 %v4092_v27, %v5117_v22  ;;  %v1207_v25 = vmul.f32 %v4093_v48, %v5117_v22  ;;  %v920_v48 = vadd.f32 %v904_v14, %v5260_v46  ;;  %v1004_v27 = vmul.f32 %v4109_v19, %v5108_v7 }
 0x17e   : > { %v902_v46 = vmul.f32 %v4103_v24, %v5092_v32  ;;  %v600_v24 = vmul.f32 %v4080_v43, %v5079_v9  ;;  %v1003_v43 = vmul.f32 %v4127_v5, %v5108_v7 }
 0x17f   : > { %v5350_v54 = vpop.permute.xlu1 %4096  ;;  %v1222_v45 = vadd.f32 %v1206_v23, %v1122_v33  ;;  %v1223_v63 = vadd.f32 %v1207_v25, %v1123_v60  ;;  %4246 = vset.pattern.permute.xlu1 %v4714_v28  ;;  %v921_v33 = vadd.f32 %v905_v4, %v5262_v52  ;;  %v1005_v60 = vmul.f32 %v4110_v34, %v5108_v7 }
 0x180   : > { %4248 = vperm.xlu1 %4246, %v5241_v47   ;;  %v4086_v23 = vunpack.i.l.bf16 %v5335_v35  ;;  %v519_v25 = vmul.f32 %v4002_v40, %v5084_v13  ;;  %v1020_v17 = vadd.f32 %v1004_v27, %v920_v48  ;;  %v4098_v42 = vunpack.i.l.bf16 %v5350_v54 }
 0x181   : > { %v1235_v2 = vpack.c.bf16 %v1223_v63, %v1222_v45  ;;  %v618_v45 = vadd.f32 %v602_v10, %v518_v56  ;;  %v4104_v63 = vunpack.i.h.bf16 %v5345_v37  ;;  %v1021_v8 = vadd.f32 %v1005_v60, %v921_v33  ;;  %v4143_v56 = vpop.permute.xlu0 %4142 }
 0x182   : > { %v619_v26 = vadd.f32 %v603_v53, %v519_v25  ;;  %v802_v37 = vmul.f32 %v4086_v23, %v5094_v36  ;;  %v4099_v59 = vunpack.i.h.bf16 %v5350_v54  ;;  %v601_v23 = vmul.f32 %v4081_v58, %v5079_v9 }
 0x183   : > { %3470 = vmatprep.subr.bf16.mxu0 %v1235_v2  ;;  %v718_v14 = vadd.f32 %v702_v50, %v618_v45  ;;  %v903_v60 = vmul.f32 %v4104_v63, %v5092_v32 }
 0x184   : > { %v4114_v62 = vpop.permute.xlu1 %4113  ;;  %3471 = vmatpush3.bf16.msra.mxu0 %v1235_v2  ;;  %4252 = vset.pattern.permute.xlu1 %v4715_v29  ;;  %v4087_v2 = vunpack.i.h.bf16 %v5335_v35 }
 0x185   : > { %v4116_v44 = vunpack.i.h.bf16 %v4114_v62  ;;  %v4115_v18 = vunpack.i.l.bf16 %v4114_v62  ;;  %4254 = vperm.xlu1 %4252, %v5258_v39   ;;  %v818_v50 = vadd.f32 %v802_v37, %v718_v14 }
 0x186   : > { %v803_v19 = vmul.f32 %v4087_v2, %v5094_v36  ;;  %v700_v2 = vmul.f32 %v4098_v42, %v5082_v12 }
 0x187   : > { %v1104_v52 = vmul.f32 %v4115_v18, %v5112_v21  ;;  %v1105_v61 = vmul.f32 %v4116_v44, %v5112_v21  ;;  %v719_v44 = vadd.f32 %v703_v11, %v619_v26  ;;  %v4126_v18 = vunpack.i.l.bf16 %v4125_v3 }
 0x188   : > { %v918_v63 = vadd.f32 %v902_v46, %v818_v50 }
 0x189   : > { %v5375_v55 = vpop.permute.xlu1 %4119  ;;  %4258 = vset.pattern.permute.xlu1 %v4716_v30  ;;  %v1120_v4 = vadd.f32 %v1104_v52, %v1020_v17  ;;  %v1121_v34 = vadd.f32 %v1105_v61, %v1021_v8  ;;  %v819_v25 = vadd.f32 %v803_v19, %v719_v44  ;;  %v1002_v54 = vmul.f32 %v4126_v18, %v5108_v7 }
 0x18a   : > { %4260 = vperm.xlu1 %4258, %v5266_v6   ;;  %v4121_v53 = vunpack.i.l.bf16 %v5375_v55  ;;  %v4122_v45 = vunpack.i.h.bf16 %v5375_v55  ;;  %v4144_v52 = vunpack.i.l.bf16 %v4143_v56  ;;  %v701_v61 = vmul.f32 %v4099_v59, %v5082_v12  ;;  %v4160_v55 = vpop.permute.xlu0 %4159 }
 0x18b   : > { %v616_v17 = vadd.f32 %v600_v24, %v5372_v38  ;;  %v617_v8 = vadd.f32 %v601_v23, %v517_v57  ;;  %v919_v37 = vadd.f32 %v903_v60, %v819_v25  ;;  %v4161_v24 = vunpack.i.l.bf16 %v4160_v55 }
 0x18c   : > { %v1102_v38 = vmul.f32 %v4144_v52, %v5112_v21 }
 0x18d   : > { %v716_v14 = vadd.f32 %v700_v2, %v616_v17  ;;  %v717_v46 = vadd.f32 %v701_v61, %v617_v8  ;;  %v1019_v44 = vadd.f32 %v1003_v43, %v919_v37  ;;  %v1100_v25 = vmul.f32 %v4161_v24, %v5112_v21 }
 0x18e   : > { %v4131_v62 = vpop.permute.xlu1 %4130  ;;  %4264 = vset.pattern.permute.xlu1 %v4713_v20 }
 0x18f   : > { %v4133_v49 = vunpack.i.h.bf16 %v4131_v62  ;;  %v4132_v35 = vunpack.i.l.bf16 %v4131_v62  ;;  %v800_v62 = vmul.f32 %v4121_v53, %v5094_v36 }
 0x191   : > { %v1204_v40 = vmul.f32 %v4132_v35, %v5117_v22  ;;  %v1205_v10 = vmul.f32 %v4133_v49, %v5117_v22  ;;  %v4145_v49 = vunpack.i.h.bf16 %v4143_v56  ;;  %v801_v35 = vmul.f32 %v4122_v45, %v5094_v36 }
 0x193   : > { %v1220_v48 = vadd.f32 %v1204_v40, %v1120_v4  ;;  %v1221_v27 = vadd.f32 %v1205_v10, %v1121_v34  ;;  %v4137_v33 = vpop.permute.xlu1 %4136  ;;  %v4162_v34 = vunpack.i.h.bf16 %v4160_v55  ;;  %v1018_v40 = vadd.f32 %v1002_v54, %v918_v63 }
 0x194   : > { %v4138_v11 = vunpack.i.l.bf16 %v4137_v33  ;;  %v4139_v26 = vunpack.i.h.bf16 %v4137_v33  ;;  %v816_v10 = vadd.f32 %v800_v62, %v716_v14  ;;  %v1103_v18 = vmul.f32 %v4145_v49, %v5112_v21  ;;  %v4541_v14 = vld [vmem:[%s4909_s11 + $0x8] sm:$0xff]  }
 0x195   : > { %v1234_v3 = vpack.c.bf16 %v1221_v27, %v1220_v48  ;;  %v817_v59 = vadd.f32 %v801_v35, %v717_v46  ;;  %v1118_v60 = vadd.f32 %v1102_v38, %v1018_v40  ;;  %v1101_v45 = vmul.f32 %v4162_v34, %v5112_v21  ;;  %v4545_v38 = vld [vmem:[%s4909_s11 + $0x28] sm:$0xff]   ;;  %v4546_v46 = vld [vmem:[%s4909_s11 + $0x30] sm:$0xff]   ;;  %v3327_v34 = vld [vmem:[%s4901_s16 + $0x58] sm:$0xff]  }
 0x196   : > { %v900_v19 = vmul.f32 %v4138_v11, %v5092_v32  ;;  %v901_v5 = vmul.f32 %v4139_v26, %v5092_v32  ;;  %v1119_v2 = vadd.f32 %v1103_v18, %v1019_v44  ;;  %v3299_v40 = vunpack.c.l.bf16 %v3327_v34  ;;  %v3325_v44 = vld [vmem:[%s4901_s16 + $0x48] sm:$0xff]  }
 0x197   : > { %3472 = vmatprep.subr.bf16.mxu0 %v1234_v3  ;;  %v3291_v18 = vunpack.c.l.bf16 %v3325_v44 }
 0x198   : > { %v4149_v58 = vpop.permute.xlu1 %4148  ;;  %3473 = vmatpush3.bf16.msra.mxu0 %v1234_v3  ;;  %v916_v56 = vadd.f32 %v900_v19, %v816_v10  ;;  %v917_v48 = vadd.f32 %v901_v5, %v817_v59  ;;  %v4542_v19 = vld [vmem:[%s4909_s11 + $0x10] sm:$0xff]   ;;  %v4547_v5 = vld [vmem:[%s4909_s11 + $0x38] sm:$0xff]   ;;  %v3300_v10 = vunpack.c.h.bf16 %v3327_v34  ;;  %v3292_v59 = vunpack.c.h.bf16 %v3325_v44 }
 0x199   : > { %v4151_v42 = vunpack.i.h.bf16 %v4149_v58  ;;  %v4150_v4 = vunpack.i.l.bf16 %v4149_v58 }
 0x19a   : > { %v5437_v24 = vpack.i.bf16 %v3300_v10, %v3299_v40 }
 0x19b   : > { %v1000_v57 = vmul.f32 %v4150_v4, %v5108_v7  ;;  %v1001_v50 = vmul.f32 %v4151_v42, %v5108_v7  ;;  %v4543_v42 = vld [vmem:[%s4909_s11 + $0x18] sm:$0xff]   ;;  %v4544_v4 = vld [vmem:[%s4909_s11 + $0x20] sm:$0xff]  }
 0x19c   : > { %4266 = vperm.xlu1 %4264, %v5437_v24  }
 0x19d   : > { %v4155_v53 = vpop.permute.xlu1 %4154  ;;  %v1016_v23 = vadd.f32 %v1000_v57, %v916_v56  ;;  %v1017_v11 = vadd.f32 %v1001_v50, %v917_v48  ;;  %v4553_v57 = vld [vmem:[#allocation2 + $0x10] sm:$0xff]   ;;  %v5442_v50 = vpack.i.bf16 %v3292_v59, %v3291_v18  ;;  %v4554_v56 = vld [vmem:[#allocation2 + $0x8] sm:$0xff]  }
 0x19e   : > { %v4157_v27 = vunpack.i.h.bf16 %v4155_v53  ;;  %v4156_v33 = vunpack.i.l.bf16 %v4155_v53  ;;  %3504 = vmatprep.subr.bf16.mxu1 %v4553_v57 }
 0x19f   : > { %v1116_v43 = vadd.f32 %v1100_v25, %v1016_v23  ;;  %v1117_v62 = vadd.f32 %v1101_v45, %v1017_v11  ;;  %3505 = vmatpush3.bf16.msra.mxu1 %v4553_v57  ;;  %4399 = vperm.xlu0 %4380, %v5442_v50  }
 0x1a0   : > { %v1202_v3 = vmul.f32 %v4156_v33, %v5117_v22  ;;  %v1203_v54 = vmul.f32 %v4157_v27, %v5117_v22  ;;  %3506 = vmatprep.subr.bf16.mxu1 %v4554_v56  ;;  %4270 = vset.pattern.permute.xlu1 %v4717_v31 }
 0x1a1   : > { %v4165_v52 = vpop.permute.xlu1 %4164  ;;  %4272 = vperm.xlu1 %4270, %v5290_v15  }
 0x1a2   : > { %v1218_v61 = vadd.f32 %v1202_v3, %v1118_v60  ;;  %v1219_v26 = vadd.f32 %v1203_v54, %v1119_v2  ;;  %v4167_v17 = vunpack.i.h.bf16 %v4165_v52  ;;  %v4166_v63 = vunpack.i.l.bf16 %v4165_v52 }
 0x1a3   : > { %3507 = vmatpush3.bf16.msra.mxu1 %v4554_v56  ;;  %4403 = vset.pattern.permute.xlu0 %v4712_v16 }
 0x1a4   : > { %v1200_v55 = vmul.f32 %v4166_v63, %v5117_v22  ;;  %v1201_v8 = vmul.f32 %v4167_v17, %v5117_v22  ;;  %v1233_v37 = vpack.c.bf16 %v1219_v26, %v1218_v61  ;;  %4405 = vperm.xlu0 %4403, %v5241_v47   ;;  %v3324_v47 = vld [vmem:[%s4901_s16 + $0x40] sm:$0xff]   ;;  %s6062_s16 = scalar_lea.vmem [#allocation7], %s3177_s10 }
 0x1a5   : > { %4281 = vset.pattern.permute.xlu1 %v4714_v28  ;;  %v3288_v48 = vunpack.c.h.bf16 %v3324_v47  ;;  %s3059_s10 = sshll.u32 %s6062_s16, 4  ;;  %s6109_s10 = int_to_ptr.vmem [resolvable:$true] %s3059_s10 }
 0x1a6   : > { %v1216_v49 = vadd.f32 %v1200_v55, %v1116_v43  ;;  %v1217_v35 = vadd.f32 %v1201_v8, %v1117_v62  ;;  %3474 = vmatprep.subr.bf16.mxu0 %v1233_v37  ;;  %4283 = vperm.xlu1 %4281, %v5266_v6   ;;  %s4634_s18 = scalar_lea.vmem %s6109_s10, 256  ;;  %p4641_p2 = scmp.lt.s32.totalorder %s6109_s10, %s4639_s29 }
 0x1a7   : > { %3475 = vmatpush3.bf16.msra.mxu0 %v1233_v37  ;;  %p4635_p3 = scmp.ne.s32.totalorder %s6109_s10, %s4634_s18  ;;  %p4642_p13 = scmp.lt.s32.totalorder %s4640_s12, %s4634_s18 }
 0x1a8   : > { %v1232_v58 = vpack.c.bf16 %v1217_v35, %v1216_v49  ;;  %4410 = vperm.xlu0 %4403, %v5266_v6   ;;  %v3287_v6 = vunpack.c.l.bf16 %v3324_v47 }
 0x1a9   : > { %p4636_p12 = pnand %p4635_p3, %p6201_p11  ;;  %p4643_p0 = por %p4642_p13, %p4641_p2 }
 0x1aa   : > { %3476 = vmatprep.subr.bf16.mxu0 %v1232_v58  ;;  %4287 = vset.pattern.permute.xlu1 %v4711_v1  ;;  %v5467_v27 = vpack.i.bf16 %v3288_v48, %v3287_v6 }
 0x1ab   : > { %3477 = vmatpush3.bf16.msra.mxu0 %v1232_v58  ;;  %4289 = vperm.xlu1 %4287, %v5437_v24   ;;  %p4637_p10 = pneg %p4636_p12 }
 0x1ac   : > { %4415 = vperm.xlu0 %4403, %v5258_v39  }
 0x1ad   : > { %p4644_p5 = pnand %p4643_p0, %p4637_p10 }
 0x1ae   : > { %3479 = vmatmul.mubr.bf16.vlgmr.msra.gmra.mxu0 %v4541_v14 }
 0x1af   : > { %3482 = vmatprep.mubr.bf16.mxu0 %v4542_v19  ;;  %4293 = vset.pattern.permute.xlu1 %v4716_v30 }
 0x1b0   : > { %4295 = vperm.xlu1 %4293, %v5258_v39   ;;  %4420 = vperm.xlu0 %4403, %v5437_v24  }
 0x1b4   : > { %4299 = vset.pattern.permute.xlu1 %v4712_v16  ;;  %4437 = vperm.xlu0 %4403, %v5467_v27  }
 0x1b5   : > { %4301 = vperm.xlu1 %4299, %v5271_v41  }
 0x1b6   : > { %3483 = vmatmul.mubr.bf16.gmra.mxu0 %v4543_v42 }
 0x1b7   : > { %3486 = vmatprep.mubr.bf16.mxu0 %v4544_v4 }
 0x1b8   : > { %4441 = vset.pattern.permute.xlu0 %v4715_v29 }
 0x1b9   : > { %4311 = vset.pattern.permute.xlu1 %v4717_v31  ;;  %4443 = vperm.xlu0 %4441, %v5290_v15  }
 0x1ba   : > { %4313 = vperm.xlu1 %4311, %v5437_v24  }
 0x1bc   : > { %v5463_v53 = vpop.permute.xlu1 %4170  ;;  %v4213_v11 = vpop.permute.xlu0 %4212 }
 0x1bd   : > { %4472 = vperm.xlu0 %4441, %v5442_v50  }
 0x1be   : > { %3487 = vmatmul.mubr.bf16.gmra.mxu0 %v4545_v38  ;;  %4317 = vset.pattern.permute.xlu1 %v4710_v0  ;;  %v4172_v38 = vunpack.i.l.bf16 %v5463_v53 }
 0x1bf   : > { %3490 = vmatprep.mubr.bf16.mxu0 %v4546_v46  ;;  %4319 = vperm.xlu1 %4317, %v5290_v15  }
 0x1c0   : > { %v5511_v61 = vpop.permute.xlu0 %4277  ;;  %v5563_v40 = vmul.f32 %v4172_v38, %v5079_v9  ;;  %v5623_v38 = vld [vmem:[%s6161_s3] ss:$0 sm:$0xff] }
 0x1c1   : > { %v5469_v33 = vpop.permute.xlu1 %4176  ;;  %4476 = vset.pattern.permute.xlu0 %v4710_v0 }
 0x1c2   : > { %4478 = vperm.xlu0 %4476, %v5271_v41   ;;  %v4178_v10 = vunpack.i.l.bf16 %v5469_v33 }
 0x1c3   : > { %4335 = vset.pattern.permute.xlu1 %v4711_v1 }
 0x1c4   : > { %4337 = vperm.xlu1 %4335, %v5271_v41  }
 0x1c5   : > { %v5524_v49 = vpop.permute.xlu0 %4307 }
 0x1c6   : > { %3491 = vmatmul.mubr.bf16.gmra.mxu0 %v4547_v5  ;;  %4495 = vperm.xlu0 %4476, %v5442_v50   ;;  %6186 = vst [vmem:[#allocation11_spill] sm:$0xff] %v5524_v49  ;;  %v4215_v5 = vunpack.i.h.bf16 %v4213_v11 }
 0x1c7   : > { %3542 = vmatprep.mubr.bf16.mxu0 %v5183_v51  ;;  %v4555_v51 = vld [vmem:[#allocation2] sm:$0xff]  }
 0x1c8   : > { %3508 = vmatprep.subr.bf16.mxu1 %v4555_v51  ;;  %4341 = vset.pattern.permute.xlu1 %v4715_v29  ;;  %v5579_v59 = vmul.f32 %v4215_v5, %v5108_v7 }
 0x1c9   : > { %3509 = vmatpush3.bf16.msra.mxu1 %v4555_v51  ;;  %v5474_v39 = vpop.permute.xlu1 %4182  ;;  %4343 = vperm.xlu1 %4341, %v5437_v24  }
 0x1ca   : > { %4511 = vset.pattern.permute.xlu0 %v4716_v30  ;;  %v5528_v35 = vpop.permute.xlu0 %4325  ;;  %v4185_v44 = vunpack.i.h.bf16 %v5474_v39  ;;  %v4184_v18 = vunpack.i.l.bf16 %v5474_v39 }
 0x1cb   : > { %4513 = vperm.xlu0 %4511, %v5442_v50  }
 0x1cd   : > { %4363 = vset.pattern.permute.xlu1 %v4712_v16 }
 0x1ce   : > { %v5480_v60 = vpop.permute.xlu1 %4188  ;;  %4365 = vperm.xlu1 %4363, %v5442_v50  }
 0x1cf   : > { %4530 = vperm.xlu0 %4511, %v5467_v27   ;;  %v5532_v58 = vpop.permute.xlu0 %4331  ;;  %v4191_v56 = vunpack.i.h.bf16 %v5480_v60 }
 0x1d0   : > { %v4334_v48 = vunpack.i.h.bf16 %v5532_v58 }
 0x1d2   : > { %4369 = vset.pattern.permute.xlu1 %v4713_v20 }
 0x1d3   : > { %v5484_v23 = vpop.permute.xlu1 %4194  ;;  %4371 = vperm.xlu1 %4369, %v5442_v50   ;;  %4539 = vset.pattern.permute.xlu0 %v4714_v28 }
 0x1d4   : > { %v4197_v47 = vunpack.i.h.bf16 %v5484_v23 }
 0x1d7   : > { %4386 = vset.pattern.permute.xlu1 %v4710_v0 }
 0x1d8   : > { %v5488_v25 = vpop.permute.xlu1 %4200  ;;  %4388 = vperm.xlu1 %4386, %v5437_v24  }
 0x1dc   : > { %4392 = vset.pattern.permute.xlu1 %v4714_v28 }
 0x1dd   : > { %v5493_v45 = vpop.permute.xlu1 %4206  ;;  %4394 = vperm.xlu1 %4392, %v5290_v15  }
 0x1e1   : > { %4424 = vset.pattern.permute.xlu1 %v4715_v29 }
 0x1e2   : > { %v5498_v16 = vpop.permute.xlu1 %4218  ;;  %4426 = vperm.xlu1 %4424, %v5271_v41  }
 0x1e6   : > { %4430 = vset.pattern.permute.xlu1 %v4716_v30 }
 0x1e7   : > { %v5504_v2 = vpop.permute.xlu1 %4224  ;;  %4432 = vperm.xlu1 %4430, %v5437_v24  }
 0x1eb   : > { %4447 = vset.pattern.permute.xlu1 %v4713_v20  ;;  %v5536_v20 = vpop.permute.xlu0 %4348 }
 0x1ec   : > { %v4231_v3 = vpop.permute.xlu1 %4230  ;;  %4449 = vperm.xlu1 %4447, %v5467_v27  }
 0x1ed   : > { %v4233_v54 = vunpack.i.h.bf16 %v4231_v3  ;;  %v4232_v52 = vunpack.i.l.bf16 %v4231_v3 }
 0x1ef   : > { %v1897_v15 = vmul.f32 %v4232_v52, %v5084_v13  ;;  %v1898_v17 = vmul.f32 %v4233_v54, %v5084_v13  ;;  %v5542_v19 = vpop.permute.xlu0 %4354  ;;  %v5591_v52 = vmul.f32 %v4178_v10, %v5082_v12 }
 0x1f0   : > { %4453 = vset.pattern.permute.xlu1 %v4717_v31 }
 0x1f1   : > { %v4237_v26 = vpop.permute.xlu1 %4236  ;;  %4455 = vperm.xlu1 %4453, %v5442_v50  }
 0x1f2   : > { %v4239_v63 = vunpack.i.h.bf16 %v4237_v26  ;;  %v4238_v43 = vunpack.i.l.bf16 %v4237_v26  ;;  %v4203_v26 = vunpack.i.h.bf16 %v5488_v25 }
 0x1f4   : > { %v1977_v62 = vmul.f32 %v4238_v43, %v5079_v9  ;;  %v1978_v55 = vmul.f32 %v4239_v63, %v5079_v9 }
 0x1f5   : > { %4459 = vset.pattern.permute.xlu1 %v4714_v28 }
 0x1f6   : > { %v5519_v8 = vadd.f32 %v1977_v62, %v1897_v15  ;;  %v5521_v37 = vadd.f32 %v1978_v55, %v1898_v17  ;;  %4461 = vperm.xlu1 %4459, %v5437_v24   ;;  %v5539_v14 = vpop.permute.xlu1 %4242  ;;  %v5600_v15 = vmul.f32 %v4184_v18, %v5079_v9  ;;  %v5603_v17 = vmul.f32 %v4185_v44, %v5079_v9 }
 0x1f7   : > { %v5611_v55 = vmul.f32 %v4191_v56, %v5082_v12  ;;  %v4356_v56 = vunpack.i.l.bf16 %v5542_v19 }
 0x1f9   : > { %v2175_v24 = vmul.f32 %v4356_v56, %v5094_v36 }
 0x1fa   : > { %4465 = vset.pattern.permute.xlu1 %v4711_v1  ;;  %v5549_v1 = vpop.permute.xlu0 %4359 }
 0x1fb   : > { %4467 = vperm.xlu1 %4465, %v5467_v27   ;;  %v5546_v42 = vpop.permute.xlu1 %4248 }
 0x1fe   : > { %v5558_v46 = vpop.permute.xlu0 %4376 }
 0x1ff   : > { %4482 = vset.pattern.permute.xlu1 %v4716_v30  ;;  %v4173_v30 = vunpack.i.h.bf16 %v5463_v53  ;;  %6187 = vst [vmem:[#allocation12_spill] sm:$0xff] %v5558_v46  ;;  %v4196_v53 = vunpack.i.l.bf16 %v5484_v23  ;;  %v4202_v23 = vunpack.i.l.bf16 %v5488_v25 }
 0x200   : > { %4484 = vperm.xlu1 %4482, %v5271_v41   ;;  %v5552_v4 = vpop.permute.xlu1 %4254 }
 0x201   : > { %v5614_v25 = vmul.f32 %v4196_v53, %v5092_v32  ;;  %v5637_v18 = vmul.f32 %v4202_v23, %v5079_v9 }
 0x202   : > { %v4383_v6 = vpop.permute.xlu0 %4382 }
 0x203   : > { %v4384_v39 = vunpack.i.l.bf16 %v4383_v6 }
 0x204   : > { %4488 = vset.pattern.permute.xlu1 %v4717_v31  ;;  %v4214_v31 = vunpack.i.l.bf16 %v4213_v11  ;;  %v4385_v11 = vunpack.i.h.bf16 %v4383_v6 }
 0x205   : > { %4490 = vperm.xlu1 %4488, %v5467_v27   ;;  %v5560_v34 = vpop.permute.xlu1 %4260  ;;  %v2073_v43 = vmul.f32 %v4384_v39, %v5082_v12 }
 0x206   : > { %v5572_v57 = vmul.f32 %v4214_v31, %v5108_v7  ;;  %v4209_v31 = vunpack.i.h.bf16 %v5493_v45 }
 0x207   : > { %v2089_v53 = vadd.f32 %v2073_v43, %v5519_v8 }
 0x209   : > { %4499 = vset.pattern.permute.xlu1 %v4714_v28 }
 0x20a   : > { %4501 = vperm.xlu1 %4499, %v5271_v41   ;;  %v5566_v41 = vmul.f32 %v4173_v30, %v5079_v9 }
 0x20e   : > { %4505 = vset.pattern.permute.xlu1 %v4715_v29  ;;  %v4179_v29 = vunpack.i.h.bf16 %v5469_v33  ;;  %v4333_v33 = vunpack.i.l.bf16 %v5532_v58  ;;  %v2074_v58 = vmul.f32 %v4385_v11, %v5082_v12 }
 0x20f   : > { %4507 = vperm.xlu1 %4505, %v5467_v27  }
 0x210   : > { %v5630_v5 = vmul.f32 %v4333_v33, %v5112_v21  ;;  %v2090_v23 = vadd.f32 %v2074_v58, %v5521_v37  ;;  %v4220_v37 = vunpack.i.l.bf16 %v5498_v16 }
 0x213   : > { %4517 = vset.pattern.permute.xlu1 %v4710_v0  ;;  %v4190_v0 = vunpack.i.l.bf16 %v5480_v60  ;;  %v5594_v60 = vmul.f32 %v4179_v29, %v5082_v12  ;;  %v5633_v29 = vmul.f32 %v4334_v48, %v5112_v21 }
 0x214   : > { %4519 = vperm.xlu1 %4517, %v5467_v27  }
 0x215   : > { %v5606_v63 = vmul.f32 %v4190_v0, %v5082_v12  ;;  %v5640_v0 = vmul.f32 %v4203_v26, %v5079_v9  ;;  %v4357_v26 = vunpack.i.h.bf16 %v5542_v19 }
 0x217   : > { %v5588_v3 = vpop.permute.xlu1 %4266 }
 0x218   : > { %4523 = vset.pattern.permute.xlu1 %v4714_v28  ;;  %v4208_v28 = vunpack.i.l.bf16 %v5493_v45 }
 0x219   : > { %4525 = vperm.xlu1 %4523, %v5442_v50   ;;  %v5626_v50 = vmul.f32 %v4197_v47, %v5092_v32 }
 0x21a   : > { %v5618_v30 = vpop.permute.xlu0 %4399  ;;  %v5648_v39 = vmul.f32 %v4208_v28, %v5094_v36 }
 0x21b   : > { %6188 = vst [vmem:[#allocation13_spill] sm:$0xff] %v5618_v30 }
 0x21c   : > { %v4273_v47 = vpop.permute.xlu1 %4272 }
 0x21d   : > { %v4275_v6 = vunpack.i.h.bf16 %v4273_v47  ;;  %v4274_v33 = vunpack.i.l.bf16 %v4273_v47  ;;  %4535 = vperm.xlu1 %4523, %v5467_v27  }
 0x21f   : > { %v4406_v8 = vpop.permute.xlu0 %4405  ;;  %v2169_v43 = vmul.f32 %v4274_v33, %v5094_v36  ;;  %v2170_v27 = vmul.f32 %v4275_v6, %v5094_v36 }
 0x220   : > { %v4408_v28 = vunpack.i.h.bf16 %v4406_v8  ;;  %v4407_v51 = vunpack.i.l.bf16 %v4406_v8 }
 0x221   : > { %v5660_v58 = vadd.f32 %v2169_v43, %v2089_v53 }
 0x222   : > { %v1903_v33 = vmul.f32 %v4407_v51, %v5084_v13  ;;  %v1904_v6 = vmul.f32 %v4408_v28, %v5084_v13 }
 0x223   : > { %6189 = vst [vmem:[#allocation14_spill] sm:$0xff] %v5660_v58 }
 0x224   : > { %v2000_v58 = vadd.f32 %v5566_v41, %v1904_v6  ;;  %v4250_v6 = vunpack.i.l.bf16 %v5546_v42 }
 0x226   : > { %v2096_v41 = vadd.f32 %v5594_v60, %v2000_v58  ;;  %v4251_v58 = vunpack.i.h.bf16 %v5546_v42  ;;  %v2559_v42 = vmul.f32 %v4250_v6, %v5117_v22 }
 0x26e   : > { %v3480_v54 = vpop.f32.mrf.mxu0 }
 0x26f   : > { %v1337_v48 = vadd.f32 %v3480_v54, %v5623_v38 }
 0x270   : > { %v1328_v62 = vpop.f32.mrf.mxu0 }
 0x271   : > { %v1329_v10 = vadd.f32 %v5623_v38, %v1328_v62 }
 0x272   : > { %v3481_v44 = vpop.f32.mrf.mxu0 }
 0x273   : > { %v1340_v45 = vadd.f32 %v3481_v44, %v5623_v38  ;;  %v5654_v44 = vmul.f32 %v4209_v31, %v5094_v36  ;;  %v1391_v30 = vmax.f32 %v1329_v10, 0.0  ;;  %v1393_v31 = vmax.f32 %v1337_v48, 0.0 }
 0x274   : > { %v1331_v11 = vpop.f32.mrf.mxu0  ;;  %v4226_v10 = vunpack.i.l.bf16 %v5504_v2  ;;  %v1999_v48 = vadd.f32 %v5563_v40, %v1903_v33 }
 0x275   : > { %v1332_v62 = vadd.f32 %v5623_v38, %v1331_v11  ;;  %v1394_v47 = vmax.f32 %v1340_v45, 0.0  ;;  %v5662_v11 = vpop.permute.xlu1 %4283  ;;  %v5666_v45 = vadd.f32 %v2170_v27, %v2090_v23 }
 0x276   : > { %v3484_v54 = vpop.f32.mrf.mxu0  ;;  %v2095_v40 = vadd.f32 %v5591_v52, %v1999_v48  ;;  %v4411_v48 = vpop.permute.xlu0 %4410 }
 0x277   : > { %v1392_v19 = vmax.f32 %v1332_v62, 0.0  ;;  %6190 = vst [vmem:[#allocation15_spill] sm:$0xff] %v5666_v45  ;;  %v2176_v62 = vmul.f32 %v4357_v26, %v5094_v36  ;;  %v1408_v8 = vpack.c.bf16 %v1394_v47, %v1393_v31  ;;  %v1353_v51 = vadd.f32 %v3484_v54, %v5623_v38 }
 0x278   : > { %v1344_v46 = vpop.f32.mrf.mxu0  ;;  %v5679_v26 = vmul.f32 %v4220_v37, %v5082_v12  ;;  %v4227_v47 = vunpack.i.h.bf16 %v5504_v2  ;;  %v5688_v54 = vmul.f32 %v4226_v10, %v5092_v32  ;;  %v4244_v31 = vunpack.i.l.bf16 %v5539_v14 }
 0x279   : > { %v1407_v49 = vpack.c.bf16 %v1392_v19, %v1391_v30  ;;  %v1345_v23 = vadd.f32 %v5623_v38, %v1344_v46  ;;  %v5684_v19 = vpop.permute.xlu1 %4289  ;;  %v2191_v2 = vadd.f32 %v2175_v24, %v2095_v40  ;;  %v1397_v52 = vmax.f32 %v1353_v51, 0.0 }
 0x27a   : > { %v3485_v53 = vpop.f32.mrf.mxu0  ;;  %v4413_v27 = vunpack.i.h.bf16 %v4411_v48  ;;  %v4412_v56 = vunpack.i.l.bf16 %v4411_v48  ;;  %v2365_v45 = vmul.f32 %v4244_v31, %v5108_v7  ;;  %v4285_v48 = vunpack.i.l.bf16 %v5662_v11 }
 0x27b   : > { %v1356_v30 = vadd.f32 %v3485_v53, %v5623_v38  ;;  %3510 = vmatprep.mubr.bf16.mxu1 %v1407_v49  ;;  %v4245_v49 = vunpack.i.h.bf16 %v5539_v14  ;;  %v1395_v53 = vmax.f32 %v1345_v23, 0.0  ;;  %v2287_v10 = vadd.f32 %v5614_v25, %v2191_v2 }
 0x27c   : > { %v1347_v28 = vpop.f32.mrf.mxu0  ;;  %3511 = vmatmul.mubr.bf16.vlgmr.msra.gmra.mxu1 %v1408_v8  ;;  %v2192_v8 = vadd.f32 %v2176_v62, %v2096_v41  ;;  %v1901_v40 = vmul.f32 %v4412_v56, %v5084_v13  ;;  %v1902_v25 = vmul.f32 %v4413_v27, %v5084_v13  ;;  %v4263_v2 = vunpack.i.h.bf16 %v5560_v34 }
 0x27d   : > { %v1348_v46 = vadd.f32 %v5623_v38, %v1347_v28  ;;  %v1398_v33 = vmax.f32 %v1356_v30, 0.0  ;;  %v2270_v30 = vmul.f32 %v4227_v47, %v5092_v32  ;;  %v2366_v24 = vmul.f32 %v4245_v49, %v5108_v7  ;;  %v5699_v62 = vpop.permute.xlu1 %4295 }
 0x27e   : > { %v3488_v37 = vpop.f32.mrf.mxu0  ;;  %v2288_v43 = vadd.f32 %v5626_v50, %v2192_v8  ;;  %v2383_v47 = vadd.f32 %v5572_v57, %v2287_v10  ;;  %v1997_v6 = vadd.f32 %v5600_v15, %v1901_v40  ;;  %v1998_v56 = vadd.f32 %v5603_v17, %v1902_v25 }
 0x27f   : > { %v1396_v60 = vmax.f32 %v1348_v46, 0.0  ;;  %v1410_v51 = vpack.c.bf16 %v1398_v33, %v1397_v52  ;;  %v1369_v49 = vadd.f32 %v3488_v37, %v5623_v38  ;;  %v2560_v33 = vmul.f32 %v4251_v58, %v5117_v22 }
 0x280   : > { %v1360_v28 = vpop.f32.mrf.mxu0  ;;  %v2384_v46 = vadd.f32 %v5579_v59, %v2288_v43  ;;  %v4262_v8 = vunpack.i.l.bf16 %v5560_v34  ;;  %v2479_v57 = vadd.f32 %v5630_v5, %v2383_v47  ;;  %v2093_v43 = vadd.f32 %v5606_v63, %v1997_v6 }
 0x281   : > { %v1409_v14 = vpack.c.bf16 %v1396_v60, %v1395_v53  ;;  %v1361_v50 = vadd.f32 %v5623_v38, %v1360_v28  ;;  %v2094_v37 = vadd.f32 %v5611_v55, %v1998_v56  ;;  %v5718_v53 = vpop.permute.xlu1 %4301  ;;  %v4286_v58 = vunpack.i.h.bf16 %v5662_v11 }
 0x282   : > { %v3489_v23 = vpop.f32.mrf.mxu0  ;;  %v2480_v15 = vadd.f32 %v5633_v29, %v2384_v46  ;;  %v1401_v28 = vmax.f32 %v1369_v49, 0.0  ;;  %v2189_v5 = vadd.f32 %v5648_v39, %v2093_v43  ;;  %v6191_v55 = vunpack.i.h.bf16 %v5498_v16 }
 0x283   : > { %v1372_v41 = vadd.f32 %v3489_v23, %v5623_v38  ;;  %3514 = vmatprep.mubr.bf16.mxu1 %v1409_v14  ;;  %v1399_v60 = vmax.f32 %v1361_v50, 0.0  ;;  %v2190_v10 = vadd.f32 %v5654_v44, %v2094_v37  ;;  %v2575_v14 = vadd.f32 %v2559_v42, %v2479_v57 }
 0x284   : > { %v1363_v31 = vpop.f32.mrf.mxu0  ;;  %3515 = vmatmul.mubr.bf16.gmra.mxu1 %v1410_v51  ;;  %v2076_v51 = vmul.f32 %v6191_v55, %v5082_v12  ;;  %v2461_v29 = vmul.f32 %v4262_v8, %v5112_v21  ;;  %v2462_v23 = vmul.f32 %v4263_v2, %v5112_v21  ;;  %v2285_v11 = vadd.f32 %v5688_v54, %v2189_v5 }
 0x285   : > { %v1364_v27 = vadd.f32 %v5623_v38, %v1363_v31  ;;  %v1402_v52 = vmax.f32 %v1372_v41, 0.0  ;;  %v2286_v50 = vadd.f32 %v2270_v30, %v2190_v10  ;;  %v2576_v41 = vadd.f32 %v2560_v33, %v2480_v15  ;;  %v5737_v46 = vpop.permute.xlu1 %4313 }
 0x286   : > { %v3492_v59 = vpop.f32.mrf.mxu0  ;;  %v6192_v42 = vunpack.i.l.bf16 %v5549_v1  ;;  %v2558_v47 = vmul.f32 %v4286_v58, %v5117_v22  ;;  %v2381_v54 = vadd.f32 %v2365_v45, %v2285_v11  ;;  %v2557_v33 = vmul.f32 %v4285_v48, %v5117_v22 }
 0x287   : > { %v1400_v17 = vmax.f32 %v1364_v27, 0.0  ;;  %v1412_v40 = vpack.c.bf16 %v1402_v52, %v1401_v28  ;;  %v1385_v49 = vadd.f32 %v3492_v59, %v5623_v38  ;;  %v2382_v30 = vadd.f32 %v2366_v24, %v2286_v50  ;;  %v4416_v59 = vpop.permute.xlu0 %4415 }
 0x288   : > { %v1376_v34 = vpop.f32.mrf.mxu0  ;;  %v2171_v16 = vmul.f32 %v6192_v42, %v5094_v36  ;;  %v4257_v56 = vunpack.i.h.bf16 %v5552_v4  ;;  %v4256_v27 = vunpack.i.l.bf16 %v5552_v4  ;;  %v5744_v2 = vpack.c.bf16 %v2576_v41, %v2575_v14 }
 0x289   : > { %v1411_v63 = vpack.c.bf16 %v1400_v17, %v1399_v60  ;;  %v1377_v39 = vadd.f32 %v5623_v38, %v1376_v34  ;;  %v4269_v57 = vunpack.i.h.bf16 %v5588_v3  ;;  %v2477_v52 = vadd.f32 %v2461_v29, %v2381_v54  ;;  %v5748_v48 = vpop.permute.xlu1 %4319 }
 0x28a   : > { %v3493_v25 = vpop.f32.mrf.mxu0  ;;  %v2478_v43 = vadd.f32 %v2462_v23, %v2382_v30  ;;  %v4418_v45 = vunpack.i.h.bf16 %v4416_v59  ;;  %v4417_v24 = vunpack.i.l.bf16 %v4416_v59  ;;  %v1405_v60 = vmax.f32 %v1385_v49, 0.0 }
 0x28b   : > { %v1388_v44 = vadd.f32 %v3493_v25, %v5623_v38  ;;  %3518 = vmatprep.mubr.bf16.mxu1 %v1411_v63  ;;  %v1403_v37 = vmax.f32 %v1377_v39, 0.0  ;;  %v4268_v17 = vunpack.i.l.bf16 %v5588_v3  ;;  %v4292_v28 = vunpack.i.h.bf16 %v5684_v19  ;;  %v4421_v29 = vpop.permute.xlu0 %4420 }
 0x28c   : > { %v1379_v31 = vpop.f32.mrf.mxu0  ;;  %3519 = vmatmul.mubr.bf16.gmra.mxu1 %v1412_v40  ;;  %v2574_v58 = vadd.f32 %v2558_v47, %v2478_v43  ;;  %v1899_v34 = vmul.f32 %v4417_v24, %v5084_v13  ;;  %v1900_v5 = vmul.f32 %v4418_v45, %v5084_v13  ;;  %v6193_v14 = vunpack.i.h.bf16 %v5549_v1 }
 0x28d   : > { %v1380_v6 = vadd.f32 %v5623_v38, %v1379_v31  ;;  %v1406_v8 = vmax.f32 %v1388_v44, 0.0  ;;  %v2573_v38 = vadd.f32 %v2557_v33, %v2477_v52  ;;  %v4291_v55 = vunpack.i.l.bf16 %v5684_v19  ;;  %v5767_v47 = vpop.permute.xlu1 %4337 }
 0x28e   : > { %v2172_v63 = vmul.f32 %v6193_v14, %v5094_v36  ;;  %v1976_v23 = vmul.f32 %v4269_v57, %v5079_v9  ;;  %v1995_v40 = vadd.f32 %v5637_v18, %v1899_v34  ;;  %v1996_v25 = vadd.f32 %v5640_v0, %v1900_v5 }
 0x28f   : > { %v1404_v15 = vmax.f32 %v1380_v6, 0.0  ;;  %v1414_v10 = vpack.c.bf16 %v1406_v8, %v1405_v60  ;;  %v5757_v3 = vpack.c.bf16 %v2574_v58, %v2573_v38  ;;  %v4423_v11 = vunpack.i.h.bf16 %v4421_v29  ;;  %v5776_v33 = vpop.permute.xlu0 %4437 }
 0x290   : > { %v2267_v50 = vmul.f32 %v4256_v27, %v5092_v32  ;;  %v2268_v41 = vmul.f32 %v4257_v56, %v5092_v32  ;;  %v1975_v1 = vmul.f32 %v4268_v17, %v5079_v9  ;;  %v4422_v39 = vunpack.i.l.bf16 %v4421_v29 }
 0x291   : > { %v1413_v4 = vpack.c.bf16 %v1404_v15, %v1403_v37  ;;  %v2072_v19 = vmul.f32 %v4292_v28, %v5082_v12  ;;  %v2091_v44 = vadd.f32 %v5679_v26, %v1995_v40  ;;  %v2092_v42 = vadd.f32 %v2076_v51, %v1996_v25  ;;  %v4344_v24 = vpop.permute.xlu1 %4343 }
 0x292   : > { %v1896_v18 = vmul.f32 %v4423_v11, %v5084_v13  ;;  %v6194_v0 = vunpack.i.l.bf16 %v5511_v61  ;;  %v2071_v31 = vmul.f32 %v4291_v55, %v5082_v12  ;;  %v4297_v54 = vunpack.i.l.bf16 %v5699_v62 }
 0x293   : > { %3522 = vmatprep.mubr.bf16.mxu1 %v1413_v4  ;;  %v1895_v30 = vmul.f32 %v4422_v39, %v5084_v13  ;;  %v4298_v6 = vunpack.i.h.bf16 %v5699_v62  ;;  %v2187_v26 = vadd.f32 %v2171_v16, %v2091_v44  ;;  %v2188_v51 = vadd.f32 %v2172_v63, %v2092_v42  ;;  %v4444_v17 = vpop.permute.xlu0 %4443  ;;  %v6196_v39 = vld [vmem:[#allocation14_spill] sm:$0xff]  ;;  %v6197_v44 = vld [vmem:[#allocation15_spill] sm:$0xff] }
 0x294   : > { %3523 = vmatmul.mubr.bf16.gmra.mxu1 %v1414_v10  ;;  %v2363_v49 = vmul.f32 %v6194_v0, %v5108_v7  ;;  %v1992_v56 = vadd.f32 %v1976_v23, %v1896_v18  ;;  %v6195_v27 = vunpack.i.h.bf16 %v5511_v61  ;;  %v4328_v57 = vunpack.i.h.bf16 %v5528_v35 }
 0x295   : > { %v1991_v52 = vadd.f32 %v1975_v1, %v1895_v30  ;;  %v4327_v43 = vunpack.i.l.bf16 %v5528_v35  ;;  %v2283_v59 = vadd.f32 %v2267_v50, %v2187_v26  ;;  %v2284_v37 = vadd.f32 %v2268_v41, %v2188_v51  ;;  %v5788_v28 = vpop.permute.xlu1 %4365 }
 0x296   : > { %v2364_v8 = vmul.f32 %v6195_v27, %v5108_v7  ;;  %v2088_v15 = vadd.f32 %v2072_v19, %v1992_v56  ;;  %v2459_v45 = vmul.f32 %v4297_v54, %v5112_v21  ;;  %v2460_v62 = vmul.f32 %v4298_v6, %v5112_v21 }
 0x297   : > { %v2087_v60 = vadd.f32 %v2071_v31, %v1991_v52  ;;  %v2379_v16 = vadd.f32 %v2363_v49, %v2283_v59  ;;  %v2555_v38 = vmul.f32 %v4327_v43, %v5117_v22  ;;  %v2556_v61 = vmul.f32 %v4328_v57, %v5117_v22 }
 0x298   : > { %v2380_v58 = vadd.f32 %v2364_v8, %v2284_v37  ;;  %v4446_v35 = vunpack.i.h.bf16 %v4444_v17  ;;  %v4445_v34 = vunpack.i.l.bf16 %v4444_v17  ;;  %v4322_v63 = vunpack.i.h.bf16 %v5748_v48 }
 0x299   : > { %v2475_v4 = vadd.f32 %v2459_v45, %v2379_v16  ;;  %v4321_v55 = vunpack.i.l.bf16 %v5748_v48  ;;  %v5796_v25 = vpop.permute.xlu1 %4371  ;;  %v4351_v11 = vunpack.i.h.bf16 %v5536_v20  ;;  %v4350_v50 = vunpack.i.l.bf16 %v5536_v20 }
 0x29a   : > { %v2476_v5 = vadd.f32 %v2460_v62, %v2380_v58  ;;  %v2265_v29 = vmul.f32 %v4445_v34, %v5092_v32  ;;  %v2266_v23 = vmul.f32 %v4446_v35, %v5092_v32  ;;  %v2362_v1 = vmul.f32 %v4322_v63, %v5108_v7 }
 0x29b   : > { %v2571_v10 = vadd.f32 %v2555_v38, %v2475_v4  ;;  %v2361_v41 = vmul.f32 %v4321_v55, %v5108_v7  ;;  %v2457_v18 = vmul.f32 %v4350_v50, %v5112_v21  ;;  %v2458_v0 = vmul.f32 %v4351_v11, %v5112_v21 }
 0x29c   : > { %v2572_v14 = vadd.f32 %v2556_v61, %v2476_v5  ;;  %v2281_v19 = vadd.f32 %v2265_v29, %v6196_v39  ;;  %v2282_v48 = vadd.f32 %v2266_v23, %v6197_v44  ;;  %v4316_v52 = vunpack.i.h.bf16 %v5737_v46 }
 0x29d   : > { %v4389_v42 = vpop.permute.xlu1 %4388  ;;  %v4315_v43 = vunpack.i.l.bf16 %v5737_v46  ;;  %v4346_v62 = vunpack.i.h.bf16 %v4344_v24  ;;  %v4345_v16 = vunpack.i.l.bf16 %v4344_v24 }
 0x29e   : > { %v5794_v40 = vpack.c.bf16 %v2572_v14, %v2571_v10  ;;  %v2377_v49 = vadd.f32 %v2361_v41, %v2281_v19  ;;  %v2378_v31 = vadd.f32 %v2362_v1, %v2282_v48  ;;  %v2168_v45 = vmul.f32 %v4316_v52, %v5094_v36 }
 0x29f   : > { %v2167_v37 = vmul.f32 %v4315_v43, %v5094_v36  ;;  %v2263_v38 = vmul.f32 %v4345_v16, %v5092_v32  ;;  %v2264_v61 = vmul.f32 %v4346_v62, %v5092_v32  ;;  %v4391_v35 = vunpack.i.h.bf16 %v4389_v42 }
 0x2a0   : > { %v2473_v26 = vadd.f32 %v2457_v18, %v2377_v49  ;;  %v2474_v20 = vadd.f32 %v2458_v0, %v2378_v31  ;;  %v2184_v4 = vadd.f32 %v2168_v45, %v2088_v15  ;;  %v4390_v34 = vunpack.i.l.bf16 %v4389_v42 }
 0x2a1   : > { %v4395_v54 = vpop.permute.xlu1 %4394  ;;  %v2183_v58 = vadd.f32 %v2167_v37, %v2087_v60  ;;  %v2360_v63 = vmul.f32 %v4391_v35, %v5108_v7  ;;  %v4303_v35 = vunpack.i.l.bf16 %v5718_v53 }
 0x2a2   : > { %v4397_v30 = vunpack.i.h.bf16 %v4395_v54  ;;  %v4396_v6 = vunpack.i.l.bf16 %v4395_v54  ;;  %v2280_v10 = vadd.f32 %v2264_v61, %v2184_v4  ;;  %v2359_v14 = vmul.f32 %v4390_v34, %v5108_v7 }
 0x2a3   : > { %v2279_v5 = vadd.f32 %v2263_v38, %v2183_v58  ;;  %v6198_v58 = vld [vmem:[#allocation11_spill] sm:$0xff] }
 0x2a4   : > { %v2553_v51 = vmul.f32 %v4396_v6, %v5117_v22  ;;  %v2554_v56 = vmul.f32 %v4397_v30, %v5117_v22  ;;  %v2376_v11 = vadd.f32 %v2360_v63, %v2280_v10  ;;  %v4309_v4 = vunpack.i.l.bf16 %v6198_v58 }
 0x2a5   : > { %v5812_v59 = vpop.permute.xlu1 %4426  ;;  %v2375_v23 = vadd.f32 %v2359_v14, %v2279_v5  ;;  %v4310_v34 = vunpack.i.h.bf16 %v6198_v58  ;;  %v4304_v10 = vunpack.i.h.bf16 %v5718_v53 }
 0x2a6   : > { %v2569_v27 = vadd.f32 %v2553_v51, %v2473_v26  ;;  %v2570_v8 = vadd.f32 %v2554_v56, %v2474_v20  ;;  %v1973_v63 = vmul.f32 %v4309_v4, %v5079_v9 }
 0x2a8   : > { %v5808_v57 = vpack.c.bf16 %v2570_v8, %v2569_v27 }
 0x2a9   : > { %v4433_v17 = vpop.permute.xlu1 %4432 }
 0x2aa   : > { %v4435_v55 = vunpack.i.h.bf16 %v4433_v17  ;;  %v4434_v29 = vunpack.i.l.bf16 %v4433_v17 }
 0x2ac   : > { %v2455_v50 = vmul.f32 %v4434_v29, %v5112_v21  ;;  %v2456_v15 = vmul.f32 %v4435_v55, %v5112_v21  ;;  %v1893_v55 = vmul.f32 %v4303_v35, %v5084_v13  ;;  %v4339_v29 = vunpack.i.l.bf16 %v5767_v47 }
 0x2ad   : > { %v5818_v46 = vpop.permute.xlu1 %4449 }
 0x2ae   : > { %v2471_v41 = vadd.f32 %v2455_v50, %v2375_v23  ;;  %v2472_v1 = vadd.f32 %v2456_v15, %v2376_v11  ;;  %v1974_v23 = vmul.f32 %v4310_v34, %v5079_v9  ;;  %v6199_v11 = vld [vmem:[#allocation12_spill] sm:$0xff] }
 0x2af   : > { %v4378_v50 = vunpack.i.l.bf16 %v6199_v11  ;;  %v4379_v15 = vunpack.i.h.bf16 %v6199_v11  ;;  %v4429_v11 = vunpack.i.h.bf16 %v5812_v59 }
 0x2b1   : > { %v5822_v24 = vpop.permute.xlu1 %4455 }
 0x2b5   : > { %v4462_v60 = vpop.permute.xlu1 %4461 }
 0x2b6   : > { %v4464_v39 = vunpack.i.h.bf16 %v4462_v60  ;;  %v4463_v19 = vunpack.i.l.bf16 %v4462_v60  ;;  %v1894_v60 = vmul.f32 %v4304_v10, %v5084_v13 }
 0x2b8   : > { %v2551_v44 = vmul.f32 %v4463_v19, %v5117_v22  ;;  %v2552_v48 = vmul.f32 %v4464_v39, %v5117_v22  ;;  %v4367_v39 = vunpack.i.l.bf16 %v5788_v28  ;;  %v4374_v19 = vunpack.i.h.bf16 %v5796_v25 }
 0x2b9   : > { %v5838_v38 = vpop.permute.xlu1 %4467 }
 0x2ba   : > { %v2567_v42 = vadd.f32 %v2551_v44, %v2471_v41  ;;  %v2568_v18 = vadd.f32 %v2552_v48, %v2472_v1  ;;  %v4340_v41 = vunpack.i.h.bf16 %v5767_v47  ;;  %v4368_v1 = vunpack.i.h.bf16 %v5788_v28 }
 0x2bb   : > { %v4373_v44 = vunpack.i.l.bf16 %v5796_v25  ;;  %v2165_v47 = vmul.f32 %v4378_v50, %v5094_v36  ;;  %v4452_v28 = vunpack.i.h.bf16 %v5818_v46  ;;  %v5867_v25 = vpop.permute.xlu0 %4472  ;;  %v4469_v34 = vunpack.i.l.bf16 %v5838_v38 }
 0x2bc   : > { %v5828_v0 = vpack.c.bf16 %v2568_v18, %v2567_v42  ;;  %v1989_v42 = vadd.f32 %v1973_v63, %v1893_v55  ;;  %v2069_v18 = vmul.f32 %v4339_v29, %v5082_v12 }
 0x2bd   : > { %v5843_v5 = vpop.permute.xlu1 %4484 }
 0x2bf   : > { %v4479_v50 = vpop.permute.xlu0 %4478 }
 0x2c1   : > { %v5858_v48 = vpop.permute.xlu1 %4490 }
 0x2c5   : > { %v5882_v10 = vpop.permute.xlu1 %4501 }
 0x33c   : > { %v5830_v49 = vpop.f32.mrf.mxu1 }
 0x33e   : > { %v5832_v31 = vpop.f32.mrf.mxu1 }
 0x340   : > { %v5834_v54 = vpop.f32.mrf.mxu1 }
 0x341   : > { %v1561_v29 = vpack.c.bf16 %v5834_v54, %v5830_v49  ;;  %v4508_v54 = vpop.permute.xlu1 %4507 }
 0x342   : > { %v5836_v30 = vpop.f32.mrf.mxu1 }
 0x344   : > { %v3516_v6 = vpop.f32.mrf.mxu1 }
 0x346   : > { %v1513_v26 = vpop.f32.mrf.mxu1 }
 0x348   : > { %v3517_v20 = vpop.f32.mrf.mxu1 }
 0x349   : > { %v1563_v53 = vpack.c.bf16 %v3517_v20, %v3516_v6  ;;  %v6200_v6 = vld [vmem:[#allocation13_spill] sm:$0xff] }
 0x34a   : > { %v1516_v51 = vpop.f32.mrf.mxu1  ;;  %v4402_v20 = vunpack.i.h.bf16 %v6200_v6 }
 0x34c   : > { %v3520_v56 = vpop.f32.mrf.mxu1  ;;  %v2068_v63 = vmul.f32 %v4402_v20, %v5082_v12 }
 0x34e   : > { %v1529_v27 = vpop.f32.mrf.mxu1 }
 0x350   : > { %v3521_v8 = vpop.f32.mrf.mxu1 }
 0x351   : > { %v1565_v61 = vpack.c.bf16 %v3521_v8, %v3520_v56  ;;  %v4440_v56 = vunpack.i.h.bf16 %v5776_v33  ;;  %v4451_v8 = vunpack.i.l.bf16 %v5818_v46  ;;  %v2085_v46 = vadd.f32 %v2069_v18, %v1989_v42 }
 0x352   : > { %v1532_v52 = vpop.f32.mrf.mxu1 }
 0x353   : > { %v1564_v14 = vpack.c.bf16 %v1532_v52, %v1529_v27  ;;  %v4439_v27 = vunpack.i.l.bf16 %v5776_v33  ;;  %v4401_v52 = vunpack.i.l.bf16 %v6200_v6  ;;  %v1892_v33 = vmul.f32 %v4368_v1, %v5084_v13 }
 0x354   : > { %v3524_v43 = vpop.f32.mrf.mxu1  ;;  %v1890_v4 = vmul.f32 %v4440_v56, %v5084_v13  ;;  %v1969_v35 = vmul.f32 %v4451_v8, %v5079_v9  ;;  %v2065_v1 = vmul.f32 %v4469_v34, %v5082_v12  ;;  %v4475_v6 = vunpack.i.h.bf16 %v5867_v25 }
 0x355   : > { %v1889_v58 = vmul.f32 %v4439_v27, %v5084_v13  ;;  %v4496_v27 = vpop.permute.xlu0 %4495  ;;  %v4487_v8 = vunpack.i.h.bf16 %v5843_v5 }
 0x356   : > { %v1545_v37 = vpop.f32.mrf.mxu1 }
 0x357   : > { %v2454_v34 = vmul.f32 %v4487_v8, %v5112_v21 }
 0x358   : > { %v3525_v45 = vpop.f32.mrf.mxu1 }
 0x359   : > { %v1567_v62 = vpack.c.bf16 %v3525_v45, %v3524_v43  ;;  %v1990_v43 = vadd.f32 %v1974_v23, %v1894_v60  ;;  %v1562_v45 = vpack.c.bf16 %v1516_v51, %v1513_v26  ;;  %v1970_v26 = vmul.f32 %v4452_v28, %v5079_v9 }
 0x35a   : > { %v1548_v16 = vpop.f32.mrf.mxu1  ;;  %v4470_v51 = vunpack.i.h.bf16 %v5838_v38  ;;  %v4458_v38 = vunpack.i.h.bf16 %v5822_v24  ;;  %v4457_v60 = vunpack.i.l.bf16 %v5822_v24  ;;  %v2262_v24 = vmul.f32 %v4429_v11, %v5092_v32 }
 0x35b   : > { %v1566_v17 = vpack.c.bf16 %v1548_v16, %v1545_v37  ;;  %3526 = vmatprep.subr.bf16.mxu0 %v1567_v62  ;;  %v2070_v37 = vmul.f32 %v4340_v41, %v5082_v12  ;;  %v1971_v16 = vmul.f32 %v4373_v44, %v5079_v9  ;;  %v1985_v41 = vadd.f32 %v1969_v35, %v1889_v58 }
 0x35c   : > { %3527 = vmatpush3.bf16.msra.mxu0 %v1567_v62  ;;  %v1891_v62 = vmul.f32 %v4367_v39, %v5084_v13  ;;  %v2066_v49 = vmul.f32 %v4470_v51, %v5082_v12  ;;  %v4492_v44 = vunpack.i.l.bf16 %v5858_v48  ;;  %v4480_v28 = vunpack.i.l.bf16 %v4479_v50 }
 0x35d   : > { %3528 = vmatprep.subr.bf16.mxu0 %v1566_v17  ;;  %v2086_v55 = vadd.f32 %v2070_v37, %v1990_v43  ;;  %v2260_v58 = vmul.f32 %v4475_v6, %v5092_v32  ;;  %v4497_v35 = vunpack.i.l.bf16 %v4496_v27 }
 0x35e   : > { %v1987_v13 = vadd.f32 %v1971_v16, %v1891_v62  ;;  %v2161_v43 = vmul.f32 %v4492_v44, %v5094_v36  ;;  %v4509_v16 = vunpack.i.l.bf16 %v4508_v54 }
 0x360   : > { %3529 = vmatpush3.bf16.msra.mxu0 %v1566_v17  ;;  %v1972_v17 = vmul.f32 %v4374_v19, %v5079_v9  ;;  %v4428_v9 = vunpack.i.l.bf16 %v5812_v59  ;;  %v1560_v19 = vpack.c.bf16 %v5836_v30, %v5832_v31  ;;  %v4493_v59 = vunpack.i.h.bf16 %v5858_v48 }
 0x361   : > { %3530 = vmatprep.subr.bf16.mxu0 %v1565_v61  ;;  %v4474_v31 = vunpack.i.l.bf16 %v5867_v25  ;;  %v2081_v30 = vadd.f32 %v2065_v1, %v1985_v41  ;;  %v4481_v48 = vunpack.i.h.bf16 %v4479_v50  ;;  %v4520_v25 = vpop.permute.xlu1 %4519  ;;  %v2355_v1 = vmul.f32 %v4497_v35, %v5108_v7  ;;  %v4568_v35 = vld [vmem:[%s4909_s11 + $0x28] sm:$0xff]  }
 0x362   : > { %v1988_v23 = vadd.f32 %v1972_v17, %v1892_v33  ;;  %v2261_v42 = vmul.f32 %v4428_v9, %v5092_v32  ;;  %v2162_v37 = vmul.f32 %v4493_v59, %v5094_v36  ;;  %v4510_v33 = vunpack.i.h.bf16 %v4508_v54  ;;  %v4565_v9 = vld [vmem:[%s4909_s11 + $0x10] sm:$0xff]  }
 0x363   : > { %v4521_v11 = vunpack.i.l.bf16 %v4520_v25 }
 0x364   : > { %3531 = vmatpush3.bf16.msra.mxu0 %v1565_v61  ;;  %v2166_v61 = vmul.f32 %v4379_v15, %v5094_v36  ;;  %v2181_v15 = vadd.f32 %v2165_v47, %v2085_v46  ;;  %v2084_v56 = vadd.f32 %v2068_v63, %v1988_v23  ;;  %v2163_v47 = vmul.f32 %v4457_v60, %v5094_v36 }
 0x365   : > { %3532 = vmatprep.subr.bf16.mxu0 %v1564_v14  ;;  %v2259_v46 = vmul.f32 %v4474_v31, %v5092_v32  ;;  %v4522_v23 = vunpack.i.h.bf16 %v4520_v25  ;;  %v4503_v60 = vunpack.i.l.bf16 %v5882_v10  ;;  %v2353_v44 = vmul.f32 %v4521_v11, %v5108_v7  ;;  %v5967_v11 = vld [vmem:[%s4909_s11 + $0x68] sm:$0xff]  }
 0x366   : > { %v2182_v39 = vadd.f32 %v2166_v61, %v2086_v55  ;;  %v4564_v55 = vld [vmem:[%s4909_s11 + $0x8] sm:$0xff]  }
 0x368   : > { %3533 = vmatpush3.bf16.msra.mxu0 %v1564_v14  ;;  %v2067_v14 = vmul.f32 %v4401_v52, %v5082_v12  ;;  %v2164_v12 = vmul.f32 %v4458_v38, %v5094_v36  ;;  %v4486_v52 = vunpack.i.l.bf16 %v5843_v5  ;;  %v2278_v62 = vadd.f32 %v2262_v24, %v2182_v39 }
 0x369   : > { %3534 = vmatprep.subr.bf16.mxu0 %v1563_v53  ;;  %v2357_v5 = vmul.f32 %v4480_v28, %v5108_v7  ;;  %v2358_v36 = vmul.f32 %v4481_v48, %v5108_v7  ;;  %v4504_v38 = vunpack.i.h.bf16 %v5882_v10  ;;  %v2549_v10 = vmul.f32 %v4503_v60, %v5117_v22  ;;  %v4566_v48 = vld [vmem:[%s4909_s11 + $0x18] sm:$0xff]  }
 0x36a   : > { %v2083_v18 = vadd.f32 %v2067_v14, %v1987_v13  ;;  %v2180_v61 = vadd.f32 %v2164_v12, %v2084_v56  ;;  %v2453_v51 = vmul.f32 %v4486_v52, %v5112_v21  ;;  %v2177_v14 = vadd.f32 %v2161_v43, %v2081_v30  ;;  %v4567_v52 = vld [vmem:[%s4909_s11 + $0x20] sm:$0xff]  }
 0x36b   : > { %v2258_v13 = vmul.f32 %v4510_v33, %v5092_v32  ;;  %v2550_v24 = vmul.f32 %v4504_v38, %v5117_v22 }
 0x36c   : > { %3535 = vmatpush3.bf16.msra.mxu0 %v1563_v53  ;;  %v1986_v53 = vadd.f32 %v1970_v26, %v1890_v4  ;;  %v2179_v17 = vadd.f32 %v2163_v47, %v2083_v18  ;;  %v4498_v4 = vunpack.i.h.bf16 %v4496_v27  ;;  %v4514_v26 = vpop.permute.xlu0 %4513 }
 0x36d   : > { %3536 = vmatprep.subr.bf16.mxu0 %v1562_v45  ;;  %v4516_v39 = vunpack.i.h.bf16 %v4514_v26 }
 0x36e   : > { %v2082_v20 = vadd.f32 %v2066_v49, %v1986_v53  ;;  %v2275_v50 = vadd.f32 %v2259_v46, %v2179_v17  ;;  %v2374_v53 = vadd.f32 %v2358_v36, %v2278_v62  ;;  %v4526_v49 = vpop.permute.xlu1 %4525 }
 0x370   : > { %3537 = vmatpush3.bf16.msra.mxu0 %v1562_v45  ;;  %v2277_v45 = vadd.f32 %v2261_v42, %v2181_v15  ;;  %v2178_v63 = vadd.f32 %v2162_v37, %v2082_v20  ;;  %v2276_v15 = vadd.f32 %v2260_v58, %v2180_v61  ;;  %v4531_v54 = vpop.permute.xlu0 %4530  ;;  %v2354_v42 = vmul.f32 %v4522_v23, %v5108_v7  ;;  %v5962_v23 = vld [vmem:[%s4909_s11 + $0x60] sm:$0xff]  }
 0x371   : > { %3538 = vmatprep.subr.bf16.mxu0 %v1561_v29  ;;  %v4533_v18 = vunpack.i.h.bf16 %v4531_v54  ;;  %v4532_v56 = vunpack.i.l.bf16 %v4531_v54  ;;  %v2470_v47 = vadd.f32 %v2454_v34, %v2374_v53  ;;  %v2371_v12 = vadd.f32 %v2355_v1, %v2275_v50  ;;  %v5975_v50 = vld [vmem:[%s4909_s11 + $0x78] sm:$0xff]  }
 0x372   : > { %v2373_v41 = vadd.f32 %v2357_v5, %v2277_v45  ;;  %v2274_v59 = vadd.f32 %v2258_v13, %v2178_v63  ;;  %v4536_v31 = vpop.permute.xlu1 %4535  ;;  %v4528_v20 = vunpack.i.h.bf16 %v4526_v49  ;;  %v5959_v13 = vld [vmem:[%s4909_s11 + $0x58] sm:$0xff]  }
 0x373   : > { %v2449_v43 = vmul.f32 %v4532_v56, %v5112_v21  ;;  %v2450_v37 = vmul.f32 %v4533_v18, %v5112_v21  ;;  %v4538_v45 = vunpack.i.h.bf16 %v4536_v31  ;;  %v4537_v62 = vunpack.i.l.bf16 %v4536_v31 }
 0x374   : > { %3539 = vmatpush3.bf16.msra.mxu0 %v1561_v29  ;;  %v2257_v29 = vmul.f32 %v4509_v16, %v5092_v32  ;;  %v2356_v32 = vmul.f32 %v4498_v4, %v5108_v7  ;;  %v2469_v27 = vadd.f32 %v2453_v51, %v2373_v41  ;;  %v2452_v7 = vmul.f32 %v4516_v39, %v5112_v21  ;;  %v4569_v51 = vld [vmem:[%s4909_s11 + $0x30] sm:$0xff]  }
 0x375   : > { %3540 = vmatprep.subr.bf16.mxu0 %v1560_v19  ;;  %v2370_v8 = vadd.f32 %v2354_v42, %v2274_v59  ;;  %v2566_v16 = vadd.f32 %v2550_v24, %v2470_v47  ;;  %v2546_v5 = vmul.f32 %v4538_v45, %v5117_v22 }
 0x376   : > { %v2372_v6 = vadd.f32 %v2356_v32, %v2276_v15  ;;  %v2565_v33 = vadd.f32 %v2549_v10, %v2469_v27  ;;  %v4718_v15 = vmov 0.0   ;;  %v5990_v10 = vld [vmem:[%s6163_s5] ss:$0 sm:$0xff] }
 0x377   : > { %v2466_v58 = vadd.f32 %v2450_v37, %v2370_v8  ;;  %3558 = vmatprep.subr.mxu1 %v4718_v15  ;;  %3590 = vmatprep.mubr.msk.f32.mxu1 %vm4719_vm0, %v4718_v15 }
 0x378   : > { %3541 = vmatpush3.bf16.msra.mxu0 %v1560_v19  ;;  %v2273_v19 = vadd.f32 %v2257_v29, %v2177_v14  ;;  %v2468_v17 = vadd.f32 %v2452_v7, %v2372_v6  ;;  %v5954_v29 = vld [vmem:[%s4909_s11 + $0x50] sm:$0xff]  }
 0x379   : > { %3593 = vmatprep.subr.bf16.mxu0 %v5744_v2  ;;  %v2562_v34 = vadd.f32 %v2546_v5, %v2466_v58 }
 0x37a   : > { %v2369_v28 = vadd.f32 %v2353_v44, %v2273_v19 }
 0x37b   : > { %3543 = vmatmul.mubr.bf16.vlgmr.msra.gmra.mxu0 %v4564_v55  ;;  %v4570_v55 = vld [vmem:[%s4909_s11 + $0x38] sm:$0xff]  }
 0x37c   : > { %3594 = vmatpush3.bf16.msra.mxu0 %v5744_v2  ;;  %3546 = vmatprep.mubr.bf16.mxu0 %v4565_v9  ;;  %v4515_v2 = vunpack.i.l.bf16 %v4514_v26  ;;  %v2465_v46 = vadd.f32 %v2449_v43, %v2369_v28  ;;  %v2579_v26 = vpack.c.bf16 %v2566_v16, %v2565_v33  ;;  %v5970_v9 = vld [vmem:[%s4909_s11 + $0x70] sm:$0xff]  }
 0x37d   : > { %3595 = vmatprep.subr.bf16.mxu0 %v5757_v3 }
 0x37e   : > { %v2451_v30 = vmul.f32 %v4515_v2, %v5112_v21  ;;  %v2545_v21 = vmul.f32 %v4537_v62, %v5117_v22 }
 0x380   : > { %3596 = vmatpush3.bf16.msra.mxu0 %v5757_v3  ;;  %v4527_v3 = vunpack.i.l.bf16 %v4526_v49  ;;  %v2467_v25 = vadd.f32 %v2451_v30, %v2371_v12 }
 0x381   : > { %3597 = vmatprep.subr.bf16.mxu0 %v5794_v40 }
 0x382   : > { %v2547_v61 = vmul.f32 %v4527_v3, %v5117_v22 }
 0x383   : > { %3547 = vmatmul.mubr.bf16.gmra.mxu0 %v4566_v48 }
 0x384   : > { %3598 = vmatpush3.bf16.msra.mxu0 %v5794_v40  ;;  %3550 = vmatprep.mubr.bf16.mxu0 %v4567_v52  ;;  %v2548_v40 = vmul.f32 %v4528_v20, %v5117_v22  ;;  %v2563_v36 = vadd.f32 %v2547_v61, %v2467_v25  ;;  %v4556_v22 = vld [vmem:[%s4909_s11 + $0x40] sm:$0xff]  }
 0x385   : > { %3599 = vmatprep.subr.bf16.mxu0 %v5808_v57 }
 0x386   : > { %v2564_v4 = vadd.f32 %v2548_v40, %v2468_v17 }
 0x388   : > { %3600 = vmatpush3.bf16.msra.mxu0 %v5808_v57  ;;  %v2561_v57 = vadd.f32 %v2545_v21, %v2465_v46  ;;  %v2578_v14 = vpack.c.bf16 %v2564_v4, %v2563_v36 }
 0x389   : > { %3601 = vmatprep.subr.bf16.mxu0 %v5828_v0 }
 0x38a   : > { %v2577_v63 = vpack.c.bf16 %v2562_v34, %v2561_v57 }
 0x38b   : > { %3551 = vmatmul.mubr.bf16.gmra.mxu0 %v4568_v35  ;;  %v6024_v35 = vld [vmem:[%s6161_s3] ss:$0 sm:$0xff] }
 0x38c   : > { %3602 = vmatpush3.bf16.msra.mxu0 %v5828_v0  ;;  %3554 = vmatprep.mubr.bf16.mxu0 %v4569_v51  ;;  %v5951_v0 = vld [vmem:[%s4909_s11 + $0x48] sm:$0xff]  }
 0x38d   : > { %3603 = vmatprep.subr.bf16.mxu0 %v2579_v26 }
 0x390   : > { %3604 = vmatpush3.bf16.msra.mxu0 %v2579_v26 }
 0x391   : > { %3605 = vmatprep.subr.bf16.mxu0 %v2578_v14 }
 0x393   : > { %3555 = vmatmul.mubr.bf16.gmra.mxu0 %v4570_v55 }
 0x394   : > { %3606 = vmatpush3.bf16.msra.mxu0 %v2578_v14  ;;  %3609 = vmatprep.mubr.bf16.mxu0 %v4556_v22 }
 0x395   : > { %3607 = vmatprep.subr.bf16.mxu0 %v2577_v63 }
 0x398   : > { %3608 = vmatpush3.bf16.msra.mxu0 %v2577_v63 }
 0x39b   : > { %3610 = vmatmul.mubr.bf16.vlgmr.msra.gmra.mxu0 %v5951_v0 }
 0x39c   : > { %3613 = vmatprep.mubr.bf16.mxu0 %v5954_v29 }
 0x3a3   : > { %3614 = vmatmul.mubr.bf16.gmra.mxu0 %v5959_v13 }
 0x3a4   : > { %3617 = vmatprep.mubr.bf16.mxu0 %v5962_v23 }
 0x3ab   : > { %3618 = vmatmul.mubr.bf16.gmra.mxu0 %v5967_v11 }
 0x3ac   : > { %3621 = vmatprep.mubr.bf16.mxu0 %v5970_v9 }
 0x3b3   : > { %3622 = vmatmul.mubr.bf16.gmra.mxu0 %v5975_v50 }
 0x3b4   : > { %3673 = vmatprep.mubr.bf16.mxu0 %v4556_v22 }
 0x43b   : > { %v5981_v38 = vpop.f32.mrf.mxu0 }
 0x43c   : > { %v1617_v36 = vadd.f32 %v5981_v38, %v5990_v10 }
 0x43d   : > { %v5983_v60 = vpop.f32.mrf.mxu0 }
 0x43e   : > { %v1673_v22 = vmax.f32 %v1617_v36, 0.0  ;;  %v1609_v63 = vadd.f32 %v5990_v10, %v5983_v60  ;;  %v4572_v60 = vld [vmem:[#allocation2 + $0x38] sm:$0xff]  }
 0x43f   : > { %v3545_v41 = vpop.f32.mrf.mxu0 }
 0x440   : > { %v1620_v21 = vadd.f32 %v3545_v41, %v5990_v10 }
 0x441   : > { %v5985_v53 = vpop.f32.mrf.mxu0 }
 0x442   : > { %v1674_v34 = vmax.f32 %v1620_v21, 0.0  ;;  %v1612_v14 = vadd.f32 %v5990_v10, %v5985_v53  ;;  %v1687_v53 = vld [vmem:[%s4889_s19] sm:$0xff] }
 0x443   : > { %v3548_v1 = vpop.f32.mrf.mxu0 }
 0x444   : > { %v1633_v33 = vadd.f32 %v3548_v1, %v5990_v10  ;;  %v1672_v1 = vmax.f32 %v1612_v14, 0.0 }
 0x445   : > { %v1624_v32 = vpop.f32.mrf.mxu0 }
 0x446   : > { %v1677_v40 = vmax.f32 %v1633_v33, 0.0  ;;  %v1625_v46 = vadd.f32 %v5990_v10, %v1624_v32  ;;  %v1671_v32 = vmax.f32 %v1609_v63, 0.0 }
 0x447   : > { %v3549_v49 = vpop.f32.mrf.mxu0 }
 0x448   : > { %v1636_v45 = vadd.f32 %v3549_v49, %v5990_v10  ;;  %v1675_v4 = vmax.f32 %v1625_v46, 0.0 }
 0x449   : > { %v1627_v54 = vpop.f32.mrf.mxu0 }
 0x44a   : > { %v1678_v17 = vmax.f32 %v1636_v45, 0.0  ;;  %v1628_v61 = vadd.f32 %v5990_v10, %v1627_v54 }
 0x44b   : > { %v3552_v39 = vpop.f32.mrf.mxu0 }
 0x44c   : > { %v1649_v20 = vadd.f32 %v3552_v39, %v5990_v10  ;;  %v1676_v5 = vmax.f32 %v1628_v61, 0.0  ;;  %v4573_v39 = vld [vmem:[#allocation2 + $0x30] sm:$0xff]  }
 0x44d   : > { %v1640_v2 = vpop.f32.mrf.mxu0 }
 0x44e   : > { %v1681_v52 = vmax.f32 %v1649_v20, 0.0  ;;  %v1641_v43 = vadd.f32 %v5990_v10, %v1640_v2 }
 0x44f   : > { %v3553_v19 = vpop.f32.mrf.mxu0 }
 0x450   : > { %v1652_v30 = vadd.f32 %v3553_v19, %v5990_v10  ;;  %v1679_v16 = vmax.f32 %v1641_v43, 0.0  ;;  %v4574_v19 = vld [vmem:[#allocation2 + $0x28] sm:$0xff]  }
 0x451   : > { %v1643_v59 = vpop.f32.mrf.mxu0 }
 0x452   : > { %v1682_v28 = vmax.f32 %v1652_v30, 0.0  ;;  %v1644_v8 = vadd.f32 %v5990_v10, %v1643_v59  ;;  %v4578_v30 = vld [vmem:[#allocation2 + $0x8] sm:$0xff]  }
 0x453   : > { %v3556_v44 = vpop.f32.mrf.mxu0 }
 0x454   : > { %v1665_v18 = vadd.f32 %v3556_v44, %v5990_v10  ;;  %v1680_v62 = vmax.f32 %v1644_v8, 0.0  ;;  %v4575_v44 = vld [vmem:[#allocation2 + $0x20] sm:$0xff]  }
 0x455   : > { %v1656_v42 = vpop.f32.mrf.mxu0 }
 0x456   : > { %v1685_v6 = vmax.f32 %v1665_v18, 0.0  ;;  %v1657_v31 = vadd.f32 %v5990_v10, %v1656_v42 }
 0x457   : > { %v3557_v24 = vpop.f32.mrf.mxu0 }
 0x458   : > { %v1668_v56 = vadd.f32 %v3557_v24, %v5990_v10  ;;  %v1683_v3 = vmax.f32 %v1657_v31, 0.0  ;;  %v4576_v24 = vld [vmem:[#allocation2 + $0x18] sm:$0xff]  }
 0x459   : > { %v1659_v27 = vpop.f32.mrf.mxu0 }
 0x45a   : > { %v1686_v47 = vmax.f32 %v1668_v56, 0.0  ;;  %v1660_v12 = vadd.f32 %v5990_v10, %v1659_v27  ;;  %v4577_v56 = vld [vmem:[#allocation2 + $0x10] sm:$0xff]  }
 0x45b   : > { %v6001_v48 = vpop.f32.mrf.mxu0 }
 0x45c   : > { %3559 = vmatpush3.msra.mxu1 %v1686_v47  ;;  %v1684_v7 = vmax.f32 %v1660_v12, 0.0 }
 0x45d   : > { %3560 = vmatprep.subr.mxu1 %v4718_v15  ;;  %v2667_v37 = vpop.f32.mrf.mxu0 }
 0x45e   : > { %3561 = vmatpush3.msra.mxu1 %v1685_v6  ;;  %v2668_v26 = vadd.f32 %v6024_v35, %v2667_v37  ;;  %v2676_v6 = vadd.f32 %v6024_v35, %v6001_v48 }
 0x45f   : > { %3562 = vmatprep.subr.mxu1 %v4718_v15  ;;  %v6011_v25 = vpop.f32.mrf.mxu0 }
 0x460   : > { %3563 = vmatpush3.msra.mxu1 %v1684_v7  ;;  %v2730_v55 = vmax.f32 %v2668_v26, 0.0  ;;  %v2679_v31 = vadd.f32 %v6024_v35, %v6011_v25 }
 0x461   : > { %3564 = vmatprep.subr.mxu1 %v4718_v15  ;;  %v2670_v58 = vpop.f32.mrf.mxu0 }
 0x462   : > { %3565 = vmatpush3.msra.mxu1 %v1683_v3  ;;  %v2671_v51 = vadd.f32 %v6024_v35, %v2670_v58  ;;  %v2733_v8 = vmax.f32 %v2679_v31, 0.0 }
 0x463   : > { %3566 = vmatprep.subr.mxu1 %v4718_v15  ;;  %v6029_v57 = vpop.f32.mrf.mxu0 }
 0x464   : > { %3567 = vmatpush3.msra.mxu1 %v1682_v28  ;;  %v2731_v38 = vmax.f32 %v2671_v51, 0.0  ;;  %v2732_v28 = vmax.f32 %v2676_v6, 0.0  ;;  %v2692_v33 = vadd.f32 %v6024_v35, %v6029_v57 }
 0x465   : > { %3568 = vmatprep.subr.mxu1 %v4718_v15  ;;  %v2683_v41 = vpop.f32.mrf.mxu0 }
 0x466   : > { %3569 = vmatpush3.msra.mxu1 %v1681_v52  ;;  %v2746_v49 = vpack.c.bf16 %v2731_v38, %v2730_v55  ;;  %v2684_v47 = vadd.f32 %v6024_v35, %v2683_v41  ;;  %v4579_v52 = vld [vmem:[#allocation2] sm:$0xff]  }
 0x467   : > { %3570 = vmatprep.subr.mxu1 %v4718_v15  ;;  %v3616_v54 = vpop.f32.mrf.mxu0 }
 0x468   : > { %3571 = vmatpush3.msra.mxu1 %v1680_v62  ;;  %v2734_v20 = vmax.f32 %v2684_v47, 0.0  ;;  %v2747_v62 = vpack.c.bf16 %v2733_v8, %v2732_v28 }
 0x469   : > { %3572 = vmatprep.subr.mxu1 %v4718_v15  ;;  %v2686_v2 = vpop.f32.mrf.mxu0 }
 0x46a   : > { %3573 = vmatpush3.msra.mxu1 %v1679_v16  ;;  %v2687_v12 = vadd.f32 %v6024_v35, %v2686_v2  ;;  %v2695_v16 = vadd.f32 %v6024_v35, %v3616_v54 }
 0x46b   : > { %3574 = vmatprep.subr.mxu1 %v4718_v15  ;;  %v3619_v59 = vpop.f32.mrf.mxu0 }
 0x46c   : > { %3575 = vmatpush3.msra.mxu1 %v1678_v17  ;;  %v2735_v3 = vmax.f32 %v2687_v12, 0.0  ;;  %v2737_v46 = vmax.f32 %v2695_v16, 0.0  ;;  %v2708_v26 = vadd.f32 %v6024_v35, %v3619_v59 }
 0x46d   : > { %3576 = vmatprep.subr.mxu1 %v4718_v15  ;;  %v2699_v42 = vpop.f32.mrf.mxu0 }
 0x46e   : > { %3577 = vmatpush3.msra.mxu1 %v1677_v40  ;;  %v2748_v37 = vpack.c.bf16 %v2735_v3, %v2734_v20  ;;  %v2700_v45 = vadd.f32 %v6024_v35, %v2699_v42  ;;  %v2736_v40 = vmax.f32 %v2692_v33, 0.0  ;;  %v2740_v14 = vmax.f32 %v2708_v26, 0.0 }
 0x46f   : > { %3578 = vmatprep.subr.mxu1 %v4718_v15  ;;  %v3620_v18 = vpop.f32.mrf.mxu0 }
 0x470   : > { %3579 = vmatpush3.msra.mxu1 %v1676_v5  ;;  %v2738_v17 = vmax.f32 %v2700_v45, 0.0  ;;  %v2711_v51 = vadd.f32 %v6024_v35, %v3620_v18 }
 0x471   : > { %3580 = vmatprep.subr.mxu1 %v4718_v15  ;;  %v2702_v27 = vpop.f32.mrf.mxu0 }
 0x472   : > { %3581 = vmatpush3.msra.mxu1 %v1675_v4  ;;  %v2703_v48 = vadd.f32 %v6024_v35, %v2702_v27  ;;  %v2749_v4 = vpack.c.bf16 %v2737_v46, %v2736_v40 }
 0x473   : > { %3582 = vmatprep.subr.mxu1 %v4718_v15  ;;  %v3623_v7 = vpop.f32.mrf.mxu0 }
 0x474   : > { %3583 = vmatpush3.msra.mxu1 %v1674_v34  ;;  %v2739_v61 = vmax.f32 %v2703_v48, 0.0  ;;  %v2724_v38 = vadd.f32 %v6024_v35, %v3623_v7 }
 0x475   : > { %3584 = vmatprep.subr.mxu1 %v4718_v15  ;;  %v2715_v43 = vpop.f32.mrf.mxu0 }
 0x476   : > { %3585 = vmatpush3.msra.mxu1 %v1673_v22  ;;  %v2750_v21 = vpack.c.bf16 %v2739_v61, %v2738_v17  ;;  %v2716_v5 = vadd.f32 %v6024_v35, %v2715_v43  ;;  %v2741_v22 = vmax.f32 %v2711_v51, 0.0 }
 0x477   : > { %3586 = vmatprep.subr.mxu1 %v4718_v15  ;;  %v3624_v25 = vpop.f32.mrf.mxu0 }
 0x478   : > { %3587 = vmatpush3.msra.mxu1 %v1672_v1  ;;  %v2742_v57 = vmax.f32 %v2716_v5, 0.0  ;;  %v2751_v55 = vpack.c.bf16 %v2741_v22, %v2740_v14  ;;  %v2727_v41 = vadd.f32 %v6024_v35, %v3624_v25  ;;  %v2744_v1 = vmax.f32 %v2724_v38, 0.0 }
 0x479   : > { %3588 = vmatprep.subr.mxu1 %v4718_v15  ;;  %v2718_v58 = vpop.f32.mrf.mxu0 }
 0x47a   : > { %3589 = vmatpush3.msra.mxu1 %v1671_v32  ;;  %v2719_v36 = vadd.f32 %v6024_v35, %v2718_v58  ;;  %v2745_v32 = vmax.f32 %v2727_v41, 0.0 }
 0x47b   : > { %3591 = vmatmul.mubr.f32.vlgmr.msra.gmra.mxu1 %v1687_v53  ;;  %3625 = vmatprep.subr.bf16.mxu1 %v4572_v60 }
 0x47c   : > { %3626 = vmatpush3.bf16.msra.mxu1 %v4572_v60  ;;  %3641 = vmatprep.mubr.bf16.mxu1 %v2746_v49  ;;  %v2743_v34 = vmax.f32 %v2719_v36, 0.0  ;;  %v2753_v53 = vpack.c.bf16 %v2745_v32, %v2744_v1 }
 0x47d   : > { %3627 = vmatprep.subr.bf16.mxu1 %v4573_v39 }
 0x47e   : > { %v2752_v63 = vpack.c.bf16 %v2743_v34, %v2742_v57 }
 0x480   : > { %3628 = vmatpush3.bf16.msra.mxu1 %v4573_v39 }
 0x481   : > { %3629 = vmatprep.subr.bf16.mxu1 %v4574_v19 }
 0x484   : > { %3630 = vmatpush3.bf16.msra.mxu1 %v4574_v19 }
 0x485   : > { %3631 = vmatprep.subr.bf16.mxu1 %v4575_v44 }
 0x488   : > { %3632 = vmatpush3.bf16.msra.mxu1 %v4575_v44 }
 0x489   : > { %3633 = vmatprep.subr.bf16.mxu1 %v4576_v24 }
 0x48c   : > { %3634 = vmatpush3.bf16.msra.mxu1 %v4576_v24 }
 0x48d   : > { %3635 = vmatprep.subr.bf16.mxu1 %v4577_v56 }
 0x490   : > { %3636 = vmatpush3.bf16.msra.mxu1 %v4577_v56 }
 0x491   : > { %3637 = vmatprep.subr.bf16.mxu1 %v4578_v30 }
 0x494   : > { %3638 = vmatpush3.bf16.msra.mxu1 %v4578_v30 }
 0x495   : > { %3639 = vmatprep.subr.bf16.mxu1 %v4579_v52 }
 0x498   : > { %3640 = vmatpush3.bf16.msra.mxu1 %v4579_v52 }
 0x499   : > { %3689 = vmatprep.subr.mxu1 %v4718_v15 }
 0x49b   : > { %3642 = vmatmul.mubr.bf16.vlgmr.msra.gmra.mxu1 %v2747_v62 }
 0x49c   : > { %3645 = vmatprep.mubr.bf16.mxu1 %v2748_v37 }
 0x4a3   : > { %3646 = vmatmul.mubr.bf16.gmra.mxu1 %v2749_v4 }
 0x4a4   : > { %3649 = vmatprep.mubr.bf16.mxu1 %v2750_v21 }
 0x4ab   : > { %3650 = vmatmul.mubr.bf16.gmra.mxu1 %v2751_v55 }
 0x4ac   : > { %3653 = vmatprep.mubr.bf16.mxu1 %v2752_v63 }
 0x4b3   : > { %3654 = vmatmul.mubr.bf16.gmra.mxu1 %v2753_v53 }
 0x4b4   : > { %3721 = vmatprep.mubr.msk.f32.mxu1 %vm4719_vm0, %v4718_v15 }
 0x53b   : > { %v1754_v49 = vpop.f32.mrf.mxu1 }
 0x53c   : > { %1758 = vst [vmem:[%s6062_s16] sm:$0xff] %v1754_v49 }
 0x53d   : > { %v3592_v54 = vpop.f32.mrf.mxu1 }
 0x55b   : > { %v3643_v60 = vpop.f32.mrf.mxu1 }
 0x55d   : > { %v2788_v39 = vpop.f32.mrf.mxu1 }
 0x55f   : > { %v3644_v2 = vpop.f32.mrf.mxu1 }
 0x560   : > { %v2852_v52 = vpack.c.bf16 %v3644_v2, %v3643_v60 }
 0x561   : > { %v2791_v35 = vpop.f32.mrf.mxu1 }
 0x562   : > { %v2851_v43 = vpack.c.bf16 %v2791_v35, %v2788_v39 }
 0x563   : > { %v3647_v19 = vpop.f32.mrf.mxu1 }
 0x565   : > { %v2804_v59 = vpop.f32.mrf.mxu1 }
 0x567   : > { %v3648_v44 = vpop.f32.mrf.mxu1 }
 0x568   : > { %v2854_v28 = vpack.c.bf16 %v3648_v44, %v3647_v19 }
 0x569   : > { %v2807_v42 = vpop.f32.mrf.mxu1 }
 0x56a   : > { %v2853_v8 = vpack.c.bf16 %v2807_v42, %v2804_v59 }
 0x56b   : > { %v3651_v24 = vpop.f32.mrf.mxu1 }
 0x56d   : > { %v2820_v18 = vpop.f32.mrf.mxu1 }
 0x56f   : > { %v3652_v56 = vpop.f32.mrf.mxu1 }
 0x570   : > { %v2856_v20 = vpack.c.bf16 %v3652_v56, %v3651_v24  ;;  %v3243_v56 = vld [vmem:[%s4889_s19 + $0x8] sm:$0xff]  ;;  %s3046_s19 = scalar_lea.sflag [#allocation4], %s4883_s4 }
 0x571   : > { %v2823_v27 = vpop.f32.mrf.mxu1 }
 0x572   : > { %v2855_v3 = vpack.c.bf16 %v2823_v27, %v2820_v18 }
 0x573   : > { %v3655_v47 = vpop.f32.mrf.mxu1 }
 0x575   : > { %v2836_v12 = vpop.f32.mrf.mxu1 }
 0x577   : > { %v3656_v6 = vpop.f32.mrf.mxu1 }
 0x578   : > { %v2858_v31 = vpack.c.bf16 %v3656_v6, %v3655_v47 }
 0x579   : > { %v2839_v30 = vpop.f32.mrf.mxu1 }
 0x57a   : > { %v2857_v7 = vpack.c.bf16 %v2839_v30, %v2836_v12  ;;  %3657 = vmatprep.subr.bf16.mxu0 %v2858_v31 }
 0x57b   : > { %3658 = vmatpush3.bf16.msra.mxu0 %v2858_v31 }
 0x57c   : > { %3659 = vmatprep.subr.bf16.mxu0 %v2857_v7 }
 0x57f   : > { %3660 = vmatpush3.bf16.msra.mxu0 %v2857_v7 }
 0x580   : > { %3661 = vmatprep.subr.bf16.mxu0 %v2856_v20 }
 0x583   : > { %3662 = vmatpush3.bf16.msra.mxu0 %v2856_v20 }
 0x584   : > { %3663 = vmatprep.subr.bf16.mxu0 %v2855_v3 }
 0x587   : > { %3664 = vmatpush3.bf16.msra.mxu0 %v2855_v3 }
 0x588   : > { %3665 = vmatprep.subr.bf16.mxu0 %v2854_v28 }
 0x58b   : > { %3666 = vmatpush3.bf16.msra.mxu0 %v2854_v28 }
 0x58c   : > { %3667 = vmatprep.subr.bf16.mxu0 %v2853_v8 }
 0x58f   : > { %3668 = vmatpush3.bf16.msra.mxu0 %v2853_v8 }
 0x590   : > { %3669 = vmatprep.subr.bf16.mxu0 %v2852_v52 }
 0x593   : > { %3670 = vmatpush3.bf16.msra.mxu0 %v2852_v52 }
 0x594   : > { %3671 = vmatprep.subr.bf16.mxu0 %v2851_v43 }
 0x597   : > { %3672 = vmatpush3.bf16.msra.mxu0 %v2851_v43 }
 0x59a   : > { %3674 = vmatmul.mubr.bf16.vlgmr.msra.gmra.mxu0 %v5951_v0 }
 0x59b   : > { %3677 = vmatprep.mubr.bf16.mxu0 %v5954_v29 }
 0x5a2   : > { %3678 = vmatmul.mubr.bf16.gmra.mxu0 %v5959_v13 }
 0x5a3   : > { %3681 = vmatprep.mubr.bf16.mxu0 %v5962_v23 }
 0x5aa   : > { %3682 = vmatmul.mubr.bf16.gmra.mxu0 %v5967_v11 }
 0x5ab   : > { %3685 = vmatprep.mubr.bf16.mxu0 %v5970_v9 }
 0x5b2   : > { %3686 = vmatmul.mubr.bf16.gmra.mxu0 %v5975_v50 }
 0x65a   : > { %v3675_v37 = vpop.f32.mrf.mxu0 }
 0x65b   : > { %v2902_v2 = vadd.f32 %v3675_v37, %v5990_v10 }
 0x65c   : > { %v6072_v45 = vpop.f32.mrf.mxu0 }
 0x65d   : > { %v2958_v44 = vmax.f32 %v2902_v2, 0.0  ;;  %v2894_v42 = vadd.f32 %v5990_v10, %v6072_v45 }
 0x65e   : > { %v3676_v48 = vpop.f32.mrf.mxu0 }
 0x65f   : > { %v2905_v60 = vadd.f32 %v3676_v48, %v5990_v10  ;;  %v2956_v18 = vmax.f32 %v2894_v42, 0.0 }
 0x660   : > { %v2896_v62 = vpop.f32.mrf.mxu0 }
 0x661   : > { %v2959_v19 = vmax.f32 %v2905_v60, 0.0  ;;  %v2897_v59 = vadd.f32 %v5990_v10, %v2896_v62 }
 0x662   : > { %v3679_v33 = vpop.f32.mrf.mxu0 }
 0x663   : > { %v2918_v41 = vadd.f32 %v3679_v33, %v5990_v10  ;;  %v2957_v24 = vmax.f32 %v2897_v59, 0.0 }
 0x664   : > { %v2909_v16 = vpop.f32.mrf.mxu0 }
 0x665   : > { %v2962_v49 = vmax.f32 %v2918_v41, 0.0  ;;  %v2910_v54 = vadd.f32 %v5990_v10, %v2909_v16 }
 0x666   : > { %v3680_v0 = vpop.f32.mrf.mxu0 }
 0x667   : > { %v2921_v55 = vadd.f32 %v3680_v0, %v5990_v10  ;;  %v2960_v35 = vmax.f32 %v2910_v54, 0.0 }
 0x668   : > { %v2912_v25 = vpop.f32.mrf.mxu0 }
 0x669   : > { %v2963_v32 = vmax.f32 %v2921_v55, 0.0  ;;  %v2913_v53 = vadd.f32 %v5990_v10, %v2912_v25 }
 0x66a   : > { %v3683_v29 = vpop.f32.mrf.mxu0 }
 0x66b   : > { %v2934_v51 = vadd.f32 %v3683_v29, %v5990_v10  ;;  %v2961_v39 = vmax.f32 %v2913_v53, 0.0 }
 0x66c   : > { %v2925_v17 = vpop.f32.mrf.mxu0 }
 0x66d   : > { %v2966_v22 = vmax.f32 %v2934_v51, 0.0  ;;  %v2926_v63 = vadd.f32 %v5990_v10, %v2925_v17 }
 0x66e   : > { %v3684_v13 = vpop.f32.mrf.mxu0 }
 0x66f   : > { %v2937_v4 = vadd.f32 %v3684_v13, %v5990_v10  ;;  %v2964_v1 = vmax.f32 %v2926_v63, 0.0 }
 0x670   : > { %v2928_v61 = vpop.f32.mrf.mxu0 }
 0x671   : > { %v2967_v34 = vmax.f32 %v2937_v4, 0.0  ;;  %v2929_v14 = vadd.f32 %v5990_v10, %v2928_v61 }
 0x672   : > { %v3687_v23 = vpop.f32.mrf.mxu0 }
 0x673   : > { %v2950_v9 = vadd.f32 %v3687_v23, %v5990_v10  ;;  %v2965_v38 = vmax.f32 %v2929_v14, 0.0 }
 0x674   : > { %v2941_v40 = vpop.f32.mrf.mxu0 }
 0x675   : > { %v2970_v5 = vmax.f32 %v2950_v9, 0.0  ;;  %v2942_v36 = vadd.f32 %v5990_v10, %v2941_v40 }
 0x676   : > { %v3688_v11 = vpop.f32.mrf.mxu0 }
 0x677   : > { %v2953_v50 = vadd.f32 %v3688_v11, %v5990_v10  ;;  %v2968_v57 = vmax.f32 %v2942_v36, 0.0 }
 0x678   : > { %v2944_v46 = vpop.f32.mrf.mxu0 }
 0x679   : > { %v2971_v58 = vmax.f32 %v2953_v50, 0.0  ;;  %v2945_v21 = vadd.f32 %v5990_v10, %v2944_v46 }
 0x67b   : > { %3690 = vmatpush3.msra.mxu1 %v2971_v58  ;;  %v2969_v26 = vmax.f32 %v2945_v21, 0.0 }
 0x67c   : > { %3691 = vmatprep.subr.mxu1 %v4718_v15 }
 0x67d   : > { %3692 = vmatpush3.msra.mxu1 %v2970_v5 }
 0x67e   : > { %3693 = vmatprep.subr.mxu1 %v4718_v15 }
 0x67f   : > { %3694 = vmatpush3.msra.mxu1 %v2969_v26 }
 0x680   : > { %3695 = vmatprep.subr.mxu1 %v4718_v15 }
 0x681   : > { %3696 = vmatpush3.msra.mxu1 %v2968_v57 }
 0x682   : > { %3697 = vmatprep.subr.mxu1 %v4718_v15 }
 0x683   : > { %3698 = vmatpush3.msra.mxu1 %v2967_v34 }
 0x684   : > { %3699 = vmatprep.subr.mxu1 %v4718_v15 }
 0x685   : > { %3700 = vmatpush3.msra.mxu1 %v2966_v22 }
 0x686   : > { %3701 = vmatprep.subr.mxu1 %v4718_v15 }
 0x687   : > { %3702 = vmatpush3.msra.mxu1 %v2965_v38 }
 0x688   : > { %3703 = vmatprep.subr.mxu1 %v4718_v15 }
 0x689   : > { %3704 = vmatpush3.msra.mxu1 %v2964_v1 }
 0x68a   : > { %3705 = vmatprep.subr.mxu1 %v4718_v15 }
 0x68b   : > { %3706 = vmatpush3.msra.mxu1 %v2963_v32 }
 0x68c   : > { %3707 = vmatprep.subr.mxu1 %v4718_v15 }
 0x68d   : > { %3708 = vmatpush3.msra.mxu1 %v2962_v49 }
 0x68e   : > { %3709 = vmatprep.subr.mxu1 %v4718_v15 }
 0x68f   : > { %3710 = vmatpush3.msra.mxu1 %v2961_v39 }
 0x690   : > { %3711 = vmatprep.subr.mxu1 %v4718_v15 }
 0x691   : > { %3712 = vmatpush3.msra.mxu1 %v2960_v35 }
 0x692   : > { %3713 = vmatprep.subr.mxu1 %v4718_v15 }
 0x693   : > { %3714 = vmatpush3.msra.mxu1 %v2959_v19 }
 0x694   : > { %3715 = vmatprep.subr.mxu1 %v4718_v15 }
 0x695   : > { %3716 = vmatpush3.msra.mxu1 %v2958_v44 }
 0x696   : > { %3717 = vmatprep.subr.mxu1 %v4718_v15 }
 0x697   : > { %3718 = vmatpush3.msra.mxu1 %v2957_v24 }
 0x698   : > { %3719 = vmatprep.subr.mxu1 %v4718_v15 }
 0x699   : > { %3720 = vmatpush3.msra.mxu1 %v2956_v18 }
 0x69a   : > { %3722 = vmatmul.mubr.f32.vlgmr.msra.gmra.mxu1 %v3243_v56 }
 0x75a   : > { %v3040_v10 = vpop.f32.mrf.mxu1 }
 0x75b   : > { %3044 = vst [vmem:[%s6062_s16 + $0x8] sm:$0xff] %v3040_v10 }
 0x75c   : > { %v3723_v27 = vpop.f32.mrf.mxu1 }
 0x75d   : > { %4647 = shalt.err (!%p4644_p5)
}
 0x75e   : > { %s4648_s9 = scalar_lea.hbm %s6114_s20, 256  ;;  %s4652_s17 = scalar_lea.hbm %s6165_s7, 512 }
 0x75f   : > { %p4649_p9 = scmp.ne.s32.totalorder %s6114_s20, %s4648_s9  ;;  %p4653_p7 = scmp.lt.s32.totalorder %s6114_s20, %s6165_s7 }
 0x760   : > { %p4654_p4 = scmp.lt.s32.totalorder %s4652_s17, %s4648_s9 }
 0x761   : > { %p4650_p1 = pnand %p4649_p9, %p6201_p11 }
 0x762   : > { %p4655_p8 = por %p4654_p4, %p4653_p7 }
 0x763   : > { %p4651_p6 = pneg %p4650_p1 }
 0x765   : > { %p4656_p3 = pnand %p4655_p8, %p4651_p6 }
 0x767   : > { %4659 = shalt.err (!%p4656_p3)
}
 0x768   : > { %s4721_s23 = smov 128   ;;  %s4722_s11 = smov 8  }
 0x769   : > { %3730 = dma.vmem_to_hbm [thread:$0]  (%p6201_p11), %s6109_s10, 256, %s6114_s20, %s3046_s19, %s4721_s23, %s4721_s23, %s4722_s11  }
 0x76a PF: > { %s3074_s18 = sand.u32 1, %s4690_s24   ;;  %p6202_p12 = scmp.ne.s32.totalorder %s6175_s8, 0 }
 0x76b   : > { %p6203_p10 = scmp.ge.s32.totalorder %s4702_s27, 2  ;;  %s3075_s28 = scalar_lea.sflag [#allocation4], %s3074_s18 }
 0x76d   : > { %p3741_p2 = pnand %p6203_p10, %p6202_p12 }
 0x76f   : > { %p3742_p13 = pneg %p3741_p2 }
 0x771   : > { %4685 = dma.done.wait (%p3742_p13), %s3075_s28, 256  }
 0x772   : > { %4687 = vsyncadd (%p3742_p13), %s3075_s28, 4294967040  ;;  %p21_p0 = scmp.ge.s32.totalorder %s4817_s13, 4   ;;  %s6204_s24 = smov %s4694_s25 }
 0x773   : > { %s6205_s25 = smov %s4698_s26  ;;  %s6206_s26 = smov %s4834_s21 }
 0x774   : > { %s6207_s27 = smov %s4817_s13  ;;  %23 = sbr.rel (!%p21_p0) target bundleno = 8 (0x8), region = 107 }
 0x779   :  { %3080 = vsyncpa [#allocation3], 1 }
 0x77a   :  { %3082 = vsyncpa [#allocation3 + $0x1], 1 }
 0x77b   :  { %3083 = vsyncpa [#allocation6], 1 }
 0x77c   :  { %3085 = vsyncpa [#allocation6 + $0x1], 1 }
 0x77d   :  { %3086 = vsyncpa [#allocation4], 1 }
 0x77e   :  { %3088 = vsyncpa [#allocation4 + $0x1], 1 }

</bundles_post_ra>
